<compile_context>
chip_gen: v6e
topology: v6e:2x2x1
jax: 0.10.0
libtpu: 0.0.40
codegen_flags: <defaults>
</compile_context>

<pallas_src>
import jax
import jax.numpy as jnp
from jax.experimental import pallas as pl
from jax.experimental.pallas import tpu as pltpu

# ---------------- scaled-down synthetic sizes ---------------------------------
PART = 6            # opt.part (fixed to 6 by the 6-way word classifier)
D_BB = 64           # stands in for the 2048-channel backbone feature dim
F_LEN = 32          # opt.feature_length
D_MN = 16           # stands in for the 256-d "mn" embedding
C_IN = 4            # raw image channels
H_F, W_F = 12, 4    # backbone-output spatial size (H divisible by PART)
HW = H_F * W_F
RPP = HW // PART    # spatial positions per part (contiguous in flattened H*W)
L_SEQ = 8           # caption length
D_EMB = 32          # word-embedding dim of the text backbone stub
VOCAB = 50
LANES = 128         # lane-dense output width
NEG = -1.0e30       # finite mask sentinel; safe while text_length >= 1 (same as reference)

B_TILE = 4          # batch tile per grid step (raise toward >=128 at production sizes)

# output slab row layouts (big, sublane-aligned blocks first; single-row blocks last)
IMG_ROWS = PART + 1            # rows 0..PART-1: [local|mn], row PART: global
TXT_ROWS = L_SEQ + 1 + PART    # rows 0..L-1: per-token, row L: global, rows L+1..: local


# ============================ fused heads kernel ==============================
def _reid_kernel(tl_ref,
                 x_ref, emb_ref,
                 w_bb_ref, w_txt_ref, w_glob_ref, rhs_img_ref, rhs_txt_ref, w_tok_ref,
                 img_slab_ref, txt_slab_ref):
    bt = x_ref.shape[0]
    start = pl.program_id(0) * bt

    # ------------------------------ image branch ------------------------------
    # TODO(synk): stand-in for the pretrained ResNet50 `ImageExtract` backbone.
    x = x_ref[...].reshape(bt * HW, C_IN).astype(jnp.bfloat16)
    feat = jnp.maximum(
        jnp.dot(x, w_bb_ref[...], preferred_element_type=jnp.float32), 0.0)   # f32
    feat = feat.reshape(bt, PART, RPP, D_BB)

    # AdaptiveMaxPool2d((PART,1)): per-part max over its contiguous spatial block.
    parts = jnp.max(feat, axis=2)                     # (bt, PART, D) f32
    # AdaptiveMaxPool2d((1,1)) == max over the per-part maxima (parts tile H*W).
    g_img = jnp.max(parts, axis=1)                    # (bt, D)       f32

    # rows 0..PART-1: fused [conv_local[p] | conv_img_for_mn | 0]  (aligned 6-row store)
    img_slab_ref[:, :PART, :] = jnp.einsum(
        'bpd,pdf->bpf', parts.astype(jnp.bfloat16), rhs_img_ref[...],
        preferred_element_type=jnp.float32)
    # row PART: [conv_global | 0]
    img_slab_ref[:, PART, :] = jnp.dot(
        g_img.astype(jnp.bfloat16), w_glob_ref[...],
        preferred_element_type=jnp.float32)

    # ------------------------------ text branch -------------------------------
    # TODO(synk): stand-in for the TextExtract_lstm / TextExtract_Bert_lstm backbone.
    emb = emb_ref[...].reshape(bt * L_SEQ, D_EMB).astype(jnp.bfloat16)
    tf = jnp.tanh(
        jnp.dot(emb, w_txt_ref[...], preferred_element_type=jnp.float32))     # (bt*L, D) f32
    tf3 = tf.reshape(bt, L_SEQ, D_BB)

    # fused per-token [conv_txt_for_mn | conv_word_classifier | 0] -> one matmul
    tok = jnp.dot(tf.astype(jnp.bfloat16), w_tok_ref[...],
                  preferred_element_type=jnp.float32)                          # (bt*L, 128)
    tok3 = tok.reshape(bt, L_SEQ, LANES)
    txt_slab_ref[:, :L_SEQ, :] = tok3                 # aligned 8-row store

    # conv_word_classifier + Sigmoid (cols D_MN : D_MN+PART of the fused result), f32
    scores = jax.nn.sigmoid(tok3[:, :, D_MN:D_MN + PART])                      # (bt, L, PART)

    # torch.max(text_feature, dim=2): global max over the FULL (unmasked) sequence,
    # exactly as in the reference.
    g_txt = jnp.max(tf3, axis=1)                      # (bt, D)
    txt_slab_ref[:, L_SEQ, :] = jnp.dot(
        g_txt.astype(jnp.bfloat16), w_glob_ref[...],
        preferred_element_type=jnp.float32)

    # Validity mask from scalar-prefetched lengths (no lane-padded mask DMA).
    seq_iota = jax.lax.broadcasted_iota(jnp.int32, (bt, L_SEQ), 1)
    row_iota = jax.lax.broadcasted_iota(jnp.int32, (bt, L_SEQ), 0)
    valid_f = jnp.zeros((bt, L_SEQ), jnp.float32)
    for b in range(bt):                               # bt is a small static constant
        valid_f = jnp.where(row_iota == b,
                            (seq_iota < tl_ref[start + b]).astype(jnp.float32),
                            valid_f)
    valid3 = valid_f[:, :, None]                      # (bt, L, 1): 1.0 valid / 0.0 pad

    # Sigmoid-gated, length-masked per-part max over tokens, unrolled over PART so the
    # (bt, L, PART, D) intermediate never materializes.  pooled_p stays finite because
    # every sample has text_length >= 1 (same implicit requirement as the reference).
    for p in range(PART):
        gated_p = jnp.where(valid3 > 0.5, tf3 * scores[:, :, p:p + 1], jnp.float32(NEG))
        pooled_p = jnp.max(gated_p, axis=1)           # (bt, D) f32
        txt_slab_ref[:, L_SEQ + 1 + p, :] = jnp.dot(
            pooled_p.astype(jnp.bfloat16), rhs_txt_ref[p],
            preferred_element_type=jnp.float32)       # fused [conv_local[p] | 0]


def reid_heads(x_flat, emb, text_length,
               w_bb, w_txt_proj, w_glob, rhs_img, rhs_txt, w_tok):
    B = x_flat.shape[0]
    assert B % B_TILE == 0, "batch must be divisible by B_TILE"

    def resident(arr):
        nd = arr.ndim
        return pl.BlockSpec(arr.shape, lambda i, tl, _n=nd: (0,) * _n)

    grid_spec = pltpu.PrefetchScalarGridSpec(
        num_scalar_prefetch=1,                        # text_length -> SMEM
        grid=(B // B_TILE,),
        in_specs=[
            pl.BlockSpec((B_TILE, HW, C_IN), lambda i, tl: (i, 0, 0)),
            pl.BlockSpec((B_TILE, L_SEQ, D_EMB), lambda i, tl: (i, 0, 0)),
            resident(w_bb), resident(w_txt_proj), resident(w_glob),
            resident(rhs_img), resident(rhs_txt), resident(w_tok),
        ],
        out_specs=(
            pl.BlockSpec((B_TILE, IMG_ROWS, LANES), lambda i, tl: (i, 0, 0)),
            pl.BlockSpec((B_TILE, TXT_ROWS, LANES), lambda i, tl: (i, 0, 0)),
        ),
    )

    return pl.pallas_call(
        _reid_kernel,
        grid_spec=grid_spec,
        out_shape=(
            jax.ShapeDtypeStruct((B, IMG_ROWS, LANES), jnp.float32),
            jax.ShapeDtypeStruct((B, TXT_ROWS, LANES), jnp.float32),
        ),
        compiler_params=pltpu.CompilerParams(
            dimension_semantics=("parallel",),        # batch axis shards across cores
            vmem_limit_bytes=64 * 1024 * 1024,
        ),
    )(text_length, x_flat, emb, w_bb, w_txt_proj, w_glob, rhs_img, rhs_txt, w_tok)


# --------- host-side fused, lane-padded bf16 weight slabs (built once) --------
def init_params(key):
    ks = jax.random.split(key, 8)

    def kaiming(k, shape, fan_out):
        # kaiming_normal_(mode='fan_out', nonlinearity='relu'): std = sqrt(2/fan_out)
        return jax.random.normal(k, shape, jnp.float32) * jnp.sqrt(2.0 / fan_out)

    w_global = kaiming(ks[0], (D_BB, F_LEN), F_LEN)          # conv_global (shared)
    w_local = kaiming(ks[1], (PART, D_BB, F_LEN), F_LEN)     # conv_local[p] (shared)
    w_mn_img = kaiming(ks[2], (D_BB, D_MN), D_MN)            # conv_img_for_mn
    w_mn_txt = kaiming(ks[3], (D_BB, D_MN), D_MN)            # conv_txt_for_mn
    w_wc = jax.random.normal(ks[4], (D_BB, PART), jnp.float32) * 0.05   # word classifier

    # [conv_global | 0]
    w_glob_pad = jnp.zeros((D_BB, LANES), jnp.float32).at[:, :F_LEN].set(w_global)
    # row p = [conv_local[p] | conv_img_for_mn | 0]
    rhs_img = jnp.zeros((PART, D_BB, LANES), jnp.float32)
    rhs_img = rhs_img.at[:, :, :F_LEN].set(w_local)
    rhs_img = rhs_img.at[:, :, F_LEN:F_LEN + D_MN].set(
        jnp.broadcast_to(w_mn_img, (PART, D_BB, D_MN)))
    # row p = [conv_local[p] | 0]
    rhs_txt = jnp.zeros((PART, D_BB, LANES), jnp.float32).at[:, :, :F_LEN].set(w_local)
    # per-token fused: [conv_txt_for_mn | conv_word_classifier | 0]
    w_tok = jnp.zeros((D_BB, LANES), jnp.float32)
    w_tok = w_tok.at[:, :D_MN].set(w_mn_txt)
    w_tok = w_tok.at[:, D_MN:D_MN + PART].set(w_wc)

    return {
        # backbone stubs; MXU operands stored in bf16, epilogues stay f32 in-kernel
        "w_bb":       kaiming(ks[5], (C_IN, D_BB), D_BB).astype(jnp.bfloat16),
        "w_txt_proj": kaiming(ks[6], (D_EMB, D_BB), D_BB).astype(jnp.bfloat16),
        "emb_table":  jax.random.normal(ks[7], (VOCAB, D_EMB), jnp.float32) * 0.1,
        "w_glob":     w_glob_pad.astype(jnp.bfloat16),
        "rhs_img":    rhs_img.astype(jnp.bfloat16),
        "rhs_txt":    rhs_txt.astype(jnp.bfloat16),
        "w_tok":      w_tok.astype(jnp.bfloat16),
    }


# ============================ full forward pass ===============================
def text_img_person_reid_forward(image, caption_id, caption_mask, text_length, params):
    # caption_mask is only consumed by the BERT branch; wordtype='lstm' here.
    del caption_mask
    B = image.shape[0]

    # image: NCHW -> flattened channel-last (B, H*W, C)
    x = jnp.transpose(image, (0, 2, 3, 1)).reshape(B, HW, C_IN)
    # text backbone glue: embedding gather (part of the TextExtract stub)
    emb = params["emb_table"][caption_id]                                    # (B, L, D_EMB)

    img_slab, txt_slab = reid_heads(
        x, emb, text_length.astype(jnp.int32),
        params["w_bb"], params["w_txt_proj"], params["w_glob"],
        params["rhs_img"], params["rhs_txt"], params["w_tok"])

    # slice / transpose back to the PyTorch output layouts
    image_local = jnp.transpose(img_slab[:, :PART, :F_LEN], (0, 2, 1))            # (B, F, PART)
    image_mn = jnp.transpose(img_slab[:, :PART, F_LEN:F_LEN + D_MN], (0, 2, 1))   # (B, D_MN, PART)
    image_global = img_slab[:, PART, :F_LEN][:, :, None]                          # (B, F, 1)

    text_mn = jnp.transpose(txt_slab[:, :L_SEQ, :D_MN], (0, 2, 1))                # (B, D_MN, L)
    text_global = txt_slab[:, L_SEQ, :F_LEN][:, :, None]                          # (B, F, 1)
    text_local = jnp.transpose(txt_slab[:, L_SEQ + 1:, :F_LEN], (0, 2, 1))        # (B, F, PART)

    return image_global, image_local, text_global, text_local, image_mn, text_mn


# ================================= main =======================================
if __name__ == "__main__":
    key = jax.random.PRNGKey(0)
    pkey, ikey, ckey = jax.random.split(key, 3)
    params = init_params(pkey)

    B = 8                                                        # two grid steps of B_TILE=4
    image = jax.random.normal(ikey, (B, C_IN, H_F, W_F), jnp.float32)        # NCHW like torch
    caption_id = jax.random.randint(ckey, (B, L_SEQ), 0, VOCAB, dtype=jnp.int32)
    text_length = jnp.array([L_SEQ, 5, 3, 1, 7, 2, 8, 4], dtype=jnp.int32)   # >= 1 per sample
    caption_mask = (jnp.arange(L_SEQ)[None, :] < text_length[:, None]).astype(jnp.int32)

    fwd = jax.jit(lambda im, cid, cm, tl:
                  text_img_person_reid_forward(im, cid, cm, tl, params))
    outs = fwd(image, caption_id, caption_mask, text_length)
    jax.block_until_ready(outs)

    ig, il, tg, tl_, imn, tmn = outs
    assert ig.shape == (B, F_LEN, 1)
    assert il.shape == (B, F_LEN, PART)
    assert tg.shape == (B, F_LEN, 1)
    assert tl_.shape == (B, F_LEN, PART)
    assert imn.shape == (B, D_MN, PART)
    assert tmn.shape == (B, D_MN, L_SEQ)
    assert all(bool(jnp.all(jnp.isfinite(o))) for o in outs)

    print("KERNEL_OK")
</pallas_src>

<mosaic_0001>
module attributes {stable_mosaic.version = 11 : i64} {
  func.func @_reid_kernel(%arg0: i32, %arg1: memref<8xi32, #tpu.memory_space<smem>>, %arg2: memref<4x48x4xf32, #tpu.memory_space<vmem>>, %arg3: memref<4x8x32xf32, #tpu.memory_space<vmem>>, %arg4: memref<4x64xbf16, #tpu.memory_space<vmem>>, %arg5: memref<32x64xbf16, #tpu.memory_space<vmem>>, %arg6: memref<64x128xbf16, #tpu.memory_space<vmem>>, %arg7: memref<6x64x128xbf16, #tpu.memory_space<vmem>>, %arg8: memref<6x64x128xbf16, #tpu.memory_space<vmem>>, %arg9: memref<64x128xbf16, #tpu.memory_space<vmem>>, %arg10: memref<4x7x128xf32, #tpu.memory_space<vmem>>, %arg11: memref<4x15x128xf32, #tpu.memory_space<vmem>>) attributes {dimension_semantics = [#tpu.dimension_semantics<parallel>], iteration_bounds = array<i64: 2>, scalar_prefetch = 1 : i64, scratch_operands = 0 : i64, tpu.core_type = #tpu.core_type<tc>, window_params = [{transform_indices = @transform_0, window_bounds = array<i64: 4, 48, 4>}, {transform_indices = @transform_1, window_bounds = array<i64: 4, 8, 32>}, {pipeline_mode = #tpu.pipeline_mode<synchronous>, transform_indices = @transform_2, window_bounds = array<i64: 4, 64>}, {pipeline_mode = #tpu.pipeline_mode<synchronous>, transform_indices = @transform_3, window_bounds = array<i64: 32, 64>}, {pipeline_mode = #tpu.pipeline_mode<synchronous>, transform_indices = @transform_4, window_bounds = array<i64: 64, 128>}, {pipeline_mode = #tpu.pipeline_mode<synchronous>, transform_indices = @transform_5, window_bounds = array<i64: 6, 64, 128>}, {pipeline_mode = #tpu.pipeline_mode<synchronous>, transform_indices = @transform_6, window_bounds = array<i64: 6, 64, 128>}, {pipeline_mode = #tpu.pipeline_mode<synchronous>, transform_indices = @transform_7, window_bounds = array<i64: 64, 128>}, {transform_indices = @transform_8, window_bounds = array<i64: 4, 7, 128>}, {transform_indices = @transform_9, window_bounds = array<i64: 4, 15, 128>}]} {
    %c4_i32 = arith.constant 4 : i32
    %0 = arith.muli %arg0, %c4_i32 : i32
    %c0 = arith.constant 0 : index
    %c0_0 = arith.constant 0 : index
    %c0_1 = arith.constant 0 : index
    %1 = vector.load %arg2[%c0, %c0_0, %c0_1] : memref<4x48x4xf32, #tpu.memory_space<vmem>>, vector<4x48x4xf32>
    %2 = vector.shape_cast %1 : vector<4x48x4xf32> to vector<192x4xf32>
    %3 = arith.truncf %2 : vector<192x4xf32> to vector<192x4xbf16>
    %c0_2 = arith.constant 0 : index
    %c0_3 = arith.constant 0 : index
    %4 = vector.load %arg4[%c0_2, %c0_3] : memref<4x64xbf16, #tpu.memory_space<vmem>>, vector<4x64xbf16>
    %cst = arith.constant dense<0.000000e+00> : vector<192x64xf32>
    %5 = tpu.matmul %3, %4, %cst {dimension_numbers = #tpu.dot_dimension_numbers<[1], [0], [0], [1], [0, 0, 1, 1], [], []>} : vector<192x4xbf16>, vector<4x64xbf16>, vector<192x64xf32> -> vector<192x64xf32>
    %cst_4 = arith.constant 0.000000e+00 : f32
    %6 = vector.broadcast %cst_4 : f32 to vector<192x64xf32>
    %7 = arith.maximumf %5, %6 : vector<192x64xf32>
    %8 = vector.shape_cast %7 : vector<192x64xf32> to vector<4x6x8x64xf32>
    %cst_5 = arith.constant dense<0xFF800000> : vector<4x6x64xf32>
    %9 = vector.multi_reduction <maximumf>, %8, %cst_5 [2] : vector<4x6x8x64xf32> to vector<4x6x64xf32>
    %cst_6 = arith.constant dense<0xFF800000> : vector<4x64xf32>
    %10 = vector.multi_reduction <maximumf>, %9, %cst_6 [1] : vector<4x6x64xf32> to vector<4x64xf32>
    %11 = arith.truncf %9 : vector<4x6x64xf32> to vector<4x6x64xbf16>
    %c0_7 = arith.constant 0 : index
    %c0_8 = arith.constant 0 : index
    %c0_9 = arith.constant 0 : index
    %12 = vector.load %arg7[%c0_7, %c0_8, %c0_9] : memref<6x64x128xbf16, #tpu.memory_space<vmem>>, vector<6x64x128xbf16>
    "tpu.trace_start"() <{level = 10 : i32, message = "bpd,pdf->bpf"}> : () -> ()
    %cst_10 = arith.constant dense<0.000000e+00> : vector<6x128x4xf32>
    %13 = tpu.matmul %12, %11, %cst_10 {dimension_numbers = #tpu.dot_dimension_numbers<[1], [2], [2], [0], [0, 0, 0, 2, 1, 0], [0], [1]>} : vector<6x64x128xbf16>, vector<4x6x64xbf16>, vector<6x128x4xf32> -> vector<6x128x4xf32>
    %14 = tpu.transpose %13, [2, 0, 1] : vector<6x128x4xf32> -> vector<4x6x128xf32>
    "tpu.trace_stop"() : () -> ()
    %c0_11 = arith.constant 0 : index
    %c0_12 = arith.constant 0 : index
    %c0_13 = arith.constant 0 : index
    %15 = vector.load %arg10[%c0_11, %c0_12, %c0_13] : memref<4x7x128xf32, #tpu.memory_space<vmem>>, vector<4x6x128xf32>
    tpu.vector_store %arg10[%c0_11, %c0_12, %c0_13], %14 {strides = array<i32>} : memref<4x7x128xf32, #tpu.memory_space<vmem>>, vector<4x6x128xf32>,
    %16 = arith.truncf %10 : vector<4x64xf32> to vector<4x64xbf16>
    %c0_14 = arith.constant 0 : index
    %c0_15 = arith.constant 0 : index
    %17 = vector.load %arg6[%c0_14, %c0_15] : memref<64x128xbf16, #tpu.memory_space<vmem>>, vector<64x128xbf16>
    %cst_16 = arith.constant dense<0.000000e+00> : vector<4x128xf32>
    %18 = tpu.matmul %16, %17, %cst_16 {dimension_numbers = #tpu.dot_dimension_numbers<[1], [0], [0], [1], [0, 0, 1, 1], [], []>} : vector<4x64xbf16>, vector<64x128xbf16>, vector<4x128xf32> -> vector<4x128xf32>
    %c0_17 = arith.constant 0 : index
    %c6 = arith.constant 6 : index
    %c0_18 = arith.constant 0 : index
    %19 = vector.load %arg10[%c0_17, %c6, %c0_18] : memref<4x7x128xf32, #tpu.memory_space<vmem>>, vector<4x1x128xf32>
    %20 = vector.shape_cast %19 : vector<4x1x128xf32> to vector<4x128xf32>
    %21 = vector.shape_cast %18 : vector<4x128xf32> to vector<4x1x128xf32>
    tpu.vector_store %arg10[%c0_17, %c6, %c0_18], %21 {strides = array<i32>} : memref<4x7x128xf32, #tpu.memory_space<vmem>>, vector<4x1x128xf32>,
    %c0_19 = arith.constant 0 : index
    %c0_20 = arith.constant 0 : index
    %c0_21 = arith.constant 0 : index
    %22 = vector.load %arg3[%c0_19, %c0_20, %c0_21] : memref<4x8x32xf32, #tpu.memory_space<vmem>>, vector<4x8x32xf32>
    %23 = vector.shape_cast %22 : vector<4x8x32xf32> to vector<32x32xf32>
    %24 = arith.truncf %23 : vector<32x32xf32> to vector<32x32xbf16>
    %c0_22 = arith.constant 0 : index
    %c0_23 = arith.constant 0 : index
    %25 = vector.load %arg5[%c0_22, %c0_23] : memref<32x64xbf16, #tpu.memory_space<vmem>>, vector<32x64xbf16>
    %cst_24 = arith.constant dense<0.000000e+00> : vector<32x64xf32>
    %26 = tpu.matmul %24, %25, %cst_24 {dimension_numbers = #tpu.dot_dimension_numbers<[1], [0], [0], [1], [0, 0, 1, 1], [], []>} : vector<32x32xbf16>, vector<32x64xbf16>, vector<32x64xf32> -> vector<32x64xf32>
    %27 = math.tanh %26 : vector<32x64xf32>
    %28 = vector.shape_cast %27 : vector<32x64xf32> to vector<4x8x64xf32>
    %29 = arith.truncf %27 : vector<32x64xf32> to vector<32x64xbf16>
    %c0_25 = arith.constant 0 : index
    %c0_26 = arith.constant 0 : index
    %30 = vector.load %arg9[%c0_25, %c0_26] : memref<64x128xbf16, #tpu.memory_space<vmem>>, vector<64x128xbf16>
    %cst_27 = arith.constant dense<0.000000e+00> : vector<32x128xf32>
    %31 = tpu.matmul %29, %30, %cst_27 {dimension_numbers = #tpu.dot_dimension_numbers<[1], [0], [0], [1], [0, 0, 1, 1], [], []>} : vector<32x64xbf16>, vector<64x128xbf16>, vector<32x128xf32> -> vector<32x128xf32>
    %32 = vector.shape_cast %31 : vector<32x128xf32> to vector<4x8x128xf32>
    %c0_28 = arith.constant 0 : index
    %c0_29 = arith.constant 0 : index
    %c0_30 = arith.constant 0 : index
    %33 = vector.load %arg11[%c0_28, %c0_29, %c0_30] : memref<4x15x128xf32, #tpu.memory_space<vmem>>, vector<4x8x128xf32>
    tpu.vector_store %arg11[%c0_28, %c0_29, %c0_30], %32 {strides = array<i32>} : memref<4x15x128xf32, #tpu.memory_space<vmem>>, vector<4x8x128xf32>,
    %34 = vector.extract_strided_slice %32 {offsets = [0, 0, 16], sizes = [4, 8, 6], strides = [1, 1, 1]} : vector<4x8x128xf32> to vector<4x8x6xf32>
    %35 = arith.negf %34 : vector<4x8x6xf32>
    %36 = math.exp %35 : vector<4x8x6xf32>
    %cst_31 = arith.constant 1.000000e+00 : f32
    %37 = vector.broadcast %cst_31 : f32 to vector<4x8x6xf32>
    %38 = arith.addf %37, %36 : vector<4x8x6xf32>
    %39 = arith.divf %37, %38 : vector<4x8x6xf32>
    %cst_32 = arith.constant dense<0xFF800000> : vector<4x64xf32>
    %40 = vector.multi_reduction <maximumf>, %28, %cst_32 [1] : vector<4x8x64xf32> to vector<4x64xf32>
    %41 = arith.truncf %40 : vector<4x64xf32> to vector<4x64xbf16>
    %c0_33 = arith.constant 0 : index
    %c0_34 = arith.constant 0 : index
    %42 = vector.load %arg6[%c0_33, %c0_34] : memref<64x128xbf16, #tpu.memory_space<vmem>>, vector<64x128xbf16>
    %cst_35 = arith.constant dense<0.000000e+00> : vector<4x128xf32>
    %43 = tpu.matmul %41, %42, %cst_35 {dimension_numbers = #tpu.dot_dimension_numbers<[1], [0], [0], [1], [0, 0, 1, 1], [], []>} : vector<4x64xbf16>, vector<64x128xbf16>, vector<4x128xf32> -> vector<4x128xf32>
    %c0_36 = arith.constant 0 : index
    %c8 = arith.constant 8 : index
    %c0_37 = arith.constant 0 : index
    %44 = vector.load %arg11[%c0_36, %c8, %c0_37] : memref<4x15x128xf32, #tpu.memory_space<vmem>>, vector<4x1x128xf32>
    %45 = vector.shape_cast %44 : vector<4x1x128xf32> to vector<4x128xf32>
    %46 = vector.shape_cast %43 : vector<4x128xf32> to vector<4x1x128xf32>
    tpu.vector_store %arg11[%c0_36, %c8, %c0_37], %46 {strides = array<i32>} : memref<4x15x128xf32, #tpu.memory_space<vmem>>, vector<4x1x128xf32>,
    %47 = tpu.iota {dimensions = array<i32: 1>} : vector<4x8xi32>
    %48 = tpu.iota {dimensions = array<i32: 0>} : vector<4x8xi32>
    %cst_38 = arith.constant 0.000000e+00 : f32
    %49 = vector.broadcast %cst_38 : f32 to vector<4x8xf32>
    %c0_i32 = arith.constant 0 : i32
    %50 = vector.broadcast %c0_i32 : i32 to vector<4x8xi32>
    %51 = arith.cmpi eq, %48, %50 : vector<4x8xi32>
    %c0_i32_39 = arith.constant 0 : i32
    %52 = arith.addi %0, %c0_i32_39 : i32
    %53 = arith.index_cast %52 : i32 to index
    %54 = memref.load %arg1[%53] : memref<8xi32, #tpu.memory_space<smem>>
    %55 = vector.broadcast %54 : i32 to vector<4x8xi32>
    %56 = arith.cmpi slt, %47, %55 : vector<4x8xi32>
    %57 = arith.extui %56 : vector<4x8xi1> to vector<4x8xi32>
    %58 = arith.sitofp %57 : vector<4x8xi32> to vector<4x8xf32>
    %59 = arith.select %51, %58, %49 : vector<4x8xi1>, vector<4x8xf32>
    %c1_i32 = arith.constant 1 : i32
    %60 = vector.broadcast %c1_i32 : i32 to vector<4x8xi32>
    %61 = arith.cmpi eq, %48, %60 : vector<4x8xi32>
    %c1_i32_40 = arith.constant 1 : i32
    %62 = arith.addi %0, %c1_i32_40 : i32
    %63 = arith.index_cast %62 : i32 to index
    %64 = memref.load %arg1[%63] : memref<8xi32, #tpu.memory_space<smem>>
    %65 = vector.broadcast %64 : i32 to vector<4x8xi32>
    %66 = arith.cmpi slt, %47, %65 : vector<4x8xi32>
    %67 = arith.extui %66 : vector<4x8xi1> to vector<4x8xi32>
    %68 = arith.sitofp %67 : vector<4x8xi32> to vector<4x8xf32>
    %69 = arith.select %61, %68, %59 : vector<4x8xi1>, vector<4x8xf32>
    %c2_i32 = arith.constant 2 : i32
    %70 = vector.broadcast %c2_i32 : i32 to vector<4x8xi32>
    %71 = arith.cmpi eq, %48, %70 : vector<4x8xi32>
    %c2_i32_41 = arith.constant 2 : i32
    %72 = arith.addi %0, %c2_i32_41 : i32
    %73 = arith.index_cast %72 : i32 to index
    %74 = memref.load %arg1[%73] : memref<8xi32, #tpu.memory_space<smem>>
    %75 = vector.broadcast %74 : i32 to vector<4x8xi32>
    %76 = arith.cmpi slt, %47, %75 : vector<4x8xi32>
    %77 = arith.extui %76 : vector<4x8xi1> to vector<4x8xi32>
    %78 = arith.sitofp %77 : vector<4x8xi32> to vector<4x8xf32>
    %79 = arith.select %71, %78, %69 : vector<4x8xi1>, vector<4x8xf32>
    %c3_i32 = arith.constant 3 : i32
    %80 = vector.broadcast %c3_i32 : i32 to vector<4x8xi32>
    %81 = arith.cmpi eq, %48, %80 : vector<4x8xi32>
    %c3_i32_42 = arith.constant 3 : i32
    %82 = arith.addi %0, %c3_i32_42 : i32
    %83 = arith.index_cast %82 : i32 to index
    %84 = memref.load %arg1[%83] : memref<8xi32, #tpu.memory_space<smem>>
    %85 = vector.broadcast %84 : i32 to vector<4x8xi32>
    %86 = arith.cmpi slt, %47, %85 : vector<4x8xi32>
    %87 = arith.extui %86 : vector<4x8xi1> to vector<4x8xi32>
    %88 = arith.sitofp %87 : vector<4x8xi32> to vector<4x8xf32>
    %89 = arith.select %81, %88, %79 : vector<4x8xi1>, vector<4x8xf32>
    %90 = vector.shape_cast %89 : vector<4x8xf32> to vector<4x8x1xf32>
    %cst_43 = arith.constant 5.000000e-01 : f32
    %91 = vector.broadcast %cst_43 : f32 to vector<4x8x1xf32>
    %92 = arith.cmpf ogt, %90, %91 : vector<4x8x1xf32>
    %93 = vector.extract_strided_slice %39 {offsets = [0, 0, 0], sizes = [4, 8, 1], strides = [1, 1, 1]} : vector<4x8x6xf32> to vector<4x8x1xf32>
    %94 = vector.broadcast %93 : vector<4x8x1xf32> to vector<4x8x64xf32>
    %95 = arith.mulf %28, %94 : vector<4x8x64xf32>
    %cst_44 = arith.constant -1.000000e+30 : f32
    %96 = vector.shape_cast %92 : vector<4x8x1xi1> to vector<4x8x1xi1>
    %97 = vector.broadcast %96 : vector<4x8x1xi1> to vector<4x8x64xi1>
    %98 = vector.broadcast %cst_44 : f32 to vector<4x8x64xf32>
    %99 = arith.select %97, %95, %98 : vector<4x8x64xi1>, vector<4x8x64xf32>
    %cst_45 = arith.constant dense<0xFF800000> : vector<4x64xf32>
    %100 = vector.multi_reduction <maximumf>, %99, %cst_45 [1] : vector<4x8x64xf32> to vector<4x64xf32>
    %101 = arith.truncf %100 : vector<4x64xf32> to vector<4x64xbf16>
    %c0_46 = arith.constant 0 : index
    %c0_47 = arith.constant 0 : index
    %c0_48 = arith.constant 0 : index
    %102 = vector.load %arg8[%c0_46, %c0_47, %c0_48] : memref<6x64x128xbf16, #tpu.memory_space<vmem>>, vector<1x64x128xbf16>
    %103 = vector.shape_cast %102 : vector<1x64x128xbf16> to vector<64x128xbf16>
    %cst_49 = arith.constant dense<0.000000e+00> : vector<4x128xf32>
    %104 = tpu.matmul %101, %103, %cst_49 {dimension_numbers = #tpu.dot_dimension_numbers<[1], [0], [0], [1], [0, 0, 1, 1], [], []>} : vector<4x64xbf16>, vector<64x128xbf16>, vector<4x128xf32> -> vector<4x128xf32>
    %c0_50 = arith.constant 0 : index
    %c9 = arith.constant 9 : index
    %c0_51 = arith.constant 0 : index
    %105 = vector.load %arg11[%c0_50, %c9, %c0_51] : memref<4x15x128xf32, #tpu.memory_space<vmem>>, vector<4x1x128xf32>
    %106 = vector.shape_cast %105 : vector<4x1x128xf32> to vector<4x128xf32>
    %107 = vector.shape_cast %104 : vector<4x128xf32> to vector<4x1x128xf32>
    tpu.vector_store %arg11[%c0_50, %c9, %c0_51], %107 {strides = array<i32>} : memref<4x15x128xf32, #tpu.memory_space<vmem>>, vector<4x1x128xf32>,
    %cst_52 = arith.constant 5.000000e-01 : f32
    %108 = vector.broadcast %cst_52 : f32 to vector<4x8x1xf32>
    %109 = arith.cmpf ogt, %90, %108 : vector<4x8x1xf32>
    %110 = vector.extract_strided_slice %39 {offsets = [0, 0, 1], sizes = [4, 8, 1], strides = [1, 1, 1]} : vector<4x8x6xf32> to vector<4x8x1xf32>
    %111 = vector.broadcast %110 : vector<4x8x1xf32> to vector<4x8x64xf32>
    %112 = arith.mulf %28, %111 : vector<4x8x64xf32>
    %cst_53 = arith.constant -1.000000e+30 : f32
    %113 = vector.shape_cast %109 : vector<4x8x1xi1> to vector<4x8x1xi1>
    %114 = vector.broadcast %113 : vector<4x8x1xi1> to vector<4x8x64xi1>
    %115 = vector.broadcast %cst_53 : f32 to vector<4x8x64xf32>
    %116 = arith.select %114, %112, %115 : vector<4x8x64xi1>, vector<4x8x64xf32>
    %cst_54 = arith.constant dense<0xFF800000> : vector<4x64xf32>
    %117 = vector.multi_reduction <maximumf>, %116, %cst_54 [1] : vector<4x8x64xf32> to vector<4x64xf32>
    %118 = arith.truncf %117 : vector<4x64xf32> to vector<4x64xbf16>
    %c1 = arith.constant 1 : index
    %c0_55 = arith.constant 0 : index
    %c0_56 = arith.constant 0 : index
    %119 = vector.load %arg8[%c1, %c0_55, %c0_56] : memref<6x64x128xbf16, #tpu.memory_space<vmem>>, vector<1x64x128xbf16>
    %120 = vector.shape_cast %119 : vector<1x64x128xbf16> to vector<64x128xbf16>
    %cst_57 = arith.constant dense<0.000000e+00> : vector<4x128xf32>
    %121 = tpu.matmul %118, %120, %cst_57 {dimension_numbers = #tpu.dot_dimension_numbers<[1], [0], [0], [1], [0, 0, 1, 1], [], []>} : vector<4x64xbf16>, vector<64x128xbf16>, vector<4x128xf32> -> vector<4x128xf32>
    %c0_58 = arith.constant 0 : index
    %c10 = arith.constant 10 : index
    %c0_59 = arith.constant 0 : index
    %122 = vector.load %arg11[%c0_58, %c10, %c0_59] : memref<4x15x128xf32, #tpu.memory_space<vmem>>, vector<4x1x128xf32>
    %123 = vector.shape_cast %122 : vector<4x1x128xf32> to vector<4x128xf32>
    %124 = vector.shape_cast %121 : vector<4x128xf32> to vector<4x1x128xf32>
    tpu.vector_store %arg11[%c0_58, %c10, %c0_59], %124 {strides = array<i32>} : memref<4x15x128xf32, #tpu.memory_space<vmem>>, vector<4x1x128xf32>,
    %cst_60 = arith.constant 5.000000e-01 : f32
    %125 = vector.broadcast %cst_60 : f32 to vector<4x8x1xf32>
    %126 = arith.cmpf ogt, %90, %125 : vector<4x8x1xf32>
    %127 = vector.extract_strided_slice %39 {offsets = [0, 0, 2], sizes = [4, 8, 1], strides = [1, 1, 1]} : vector<4x8x6xf32> to vector<4x8x1xf32>
    %128 = vector.broadcast %127 : vector<4x8x1xf32> to vector<4x8x64xf32>
    %129 = arith.mulf %28, %128 : vector<4x8x64xf32>
    %cst_61 = arith.constant -1.000000e+30 : f32
    %130 = vector.shape_cast %126 : vector<4x8x1xi1> to vector<4x8x1xi1>
    %131 = vector.broadcast %130 : vector<4x8x1xi1> to vector<4x8x64xi1>
    %132 = vector.broadcast %cst_61 : f32 to vector<4x8x64xf32>
    %133 = arith.select %131, %129, %132 : vector<4x8x64xi1>, vector<4x8x64xf32>
    %cst_62 = arith.constant dense<0xFF800000> : vector<4x64xf32>
    %134 = vector.multi_reduction <maximumf>, %133, %cst_62 [1] : vector<4x8x64xf32> to vector<4x64xf32>
    %135 = arith.truncf %134 : vector<4x64xf32> to vector<4x64xbf16>
    %c2 = arith.constant 2 : index
    %c0_63 = arith.constant 0 : index
    %c0_64 = arith.constant 0 : index
    %136 = vector.load %arg8[%c2, %c0_63, %c0_64] : memref<6x64x128xbf16, #tpu.memory_space<vmem>>, vector<1x64x128xbf16>
    %137 = vector.shape_cast %136 : vector<1x64x128xbf16> to vector<64x128xbf16>
    %cst_65 = arith.constant dense<0.000000e+00> : vector<4x128xf32>
    %138 = tpu.matmul %135, %137, %cst_65 {dimension_numbers = #tpu.dot_dimension_numbers<[1], [0], [0], [1], [0, 0, 1, 1], [], []>} : vector<4x64xbf16>, vector<64x128xbf16>, vector<4x128xf32> -> vector<4x128xf32>
    %c0_66 = arith.constant 0 : index
    %c11 = arith.constant 11 : index
    %c0_67 = arith.constant 0 : index
    %139 = vector.load %arg11[%c0_66, %c11, %c0_67] : memref<4x15x128xf32, #tpu.memory_space<vmem>>, vector<4x1x128xf32>
    %140 = vector.shape_cast %139 : vector<4x1x128xf32> to vector<4x128xf32>
    %141 = vector.shape_cast %138 : vector<4x128xf32> to vector<4x1x128xf32>
    tpu.vector_store %arg11[%c0_66, %c11, %c0_67], %141 {strides = array<i32>} : memref<4x15x128xf32, #tpu.memory_space<vmem>>, vector<4x1x128xf32>,
    %cst_68 = arith.constant 5.000000e-01 : f32
    %142 = vector.broadcast %cst_68 : f32 to vector<4x8x1xf32>
    %143 = arith.cmpf ogt, %90, %142 : vector<4x8x1xf32>
    %144 = vector.extract_strided_slice %39 {offsets = [0, 0, 3], sizes = [4, 8, 1], strides = [1, 1, 1]} : vector<4x8x6xf32> to vector<4x8x1xf32>
    %145 = vector.broadcast %144 : vector<4x8x1xf32> to vector<4x8x64xf32>
    %146 = arith.mulf %28, %145 : vector<4x8x64xf32>
    %cst_69 = arith.constant -1.000000e+30 : f32
    %147 = vector.shape_cast %143 : vector<4x8x1xi1> to vector<4x8x1xi1>
    %148 = vector.broadcast %147 : vector<4x8x1xi1> to vector<4x8x64xi1>
    %149 = vector.broadcast %cst_69 : f32 to vector<4x8x64xf32>
    %150 = arith.select %148, %146, %149 : vector<4x8x64xi1>, vector<4x8x64xf32>
    %cst_70 = arith.constant dense<0xFF800000> : vector<4x64xf32>
    %151 = vector.multi_reduction <maximumf>, %150, %cst_70 [1] : vector<4x8x64xf32> to vector<4x64xf32>
    %152 = arith.truncf %151 : vector<4x64xf32> to vector<4x64xbf16>
    %c3 = arith.constant 3 : index
    %c0_71 = arith.constant 0 : index
    %c0_72 = arith.constant 0 : index
    %153 = vector.load %arg8[%c3, %c0_71, %c0_72] : memref<6x64x128xbf16, #tpu.memory_space<vmem>>, vector<1x64x128xbf16>
    %154 = vector.shape_cast %153 : vector<1x64x128xbf16> to vector<64x128xbf16>
    %cst_73 = arith.constant dense<0.000000e+00> : vector<4x128xf32>
    %155 = tpu.matmul %152, %154, %cst_73 {dimension_numbers = #tpu.dot_dimension_numbers<[1], [0], [0], [1], [0, 0, 1, 1], [], []>} : vector<4x64xbf16>, vector<64x128xbf16>, vector<4x128xf32> -> vector<4x128xf32>
    %c0_74 = arith.constant 0 : index
    %c12 = arith.constant 12 : index
    %c0_75 = arith.constant 0 : index
    %156 = vector.load %arg11[%c0_74, %c12, %c0_75] : memref<4x15x128xf32, #tpu.memory_space<vmem>>, vector<4x1x128xf32>
    %157 = vector.shape_cast %156 : vector<4x1x128xf32> to vector<4x128xf32>
    %158 = vector.shape_cast %155 : vector<4x128xf32> to vector<4x1x128xf32>
    tpu.vector_store %arg11[%c0_74, %c12, %c0_75], %158 {strides = array<i32>} : memref<4x15x128xf32, #tpu.memory_space<vmem>>, vector<4x1x128xf32>,
    %cst_76 = arith.constant 5.000000e-01 : f32
    %159 = vector.broadcast %cst_76 : f32 to vector<4x8x1xf32>
    %160 = arith.cmpf ogt, %90, %159 : vector<4x8x1xf32>
    %161 = vector.extract_strided_slice %39 {offsets = [0, 0, 4], sizes = [4, 8, 1], strides = [1, 1, 1]} : vector<4x8x6xf32> to vector<4x8x1xf32>
    %162 = vector.broadcast %161 : vector<4x8x1xf32> to vector<4x8x64xf32>
    %163 = arith.mulf %28, %162 : vector<4x8x64xf32>
    %cst_77 = arith.constant -1.000000e+30 : f32
    %164 = vector.shape_cast %160 : vector<4x8x1xi1> to vector<4x8x1xi1>
    %165 = vector.broadcast %164 : vector<4x8x1xi1> to vector<4x8x64xi1>
    %166 = vector.broadcast %cst_77 : f32 to vector<4x8x64xf32>
    %167 = arith.select %165, %163, %166 : vector<4x8x64xi1>, vector<4x8x64xf32>
    %cst_78 = arith.constant dense<0xFF800000> : vector<4x64xf32>
    %168 = vector.multi_reduction <maximumf>, %167, %cst_78 [1] : vector<4x8x64xf32> to vector<4x64xf32>
    %169 = arith.truncf %168 : vector<4x64xf32> to vector<4x64xbf16>
    %c4 = arith.constant 4 : index
    %c0_79 = arith.constant 0 : index
    %c0_80 = arith.constant 0 : index
    %170 = vector.load %arg8[%c4, %c0_79, %c0_80] : memref<6x64x128xbf16, #tpu.memory_space<vmem>>, vector<1x64x128xbf16>
    %171 = vector.shape_cast %170 : vector<1x64x128xbf16> to vector<64x128xbf16>
    %cst_81 = arith.constant dense<0.000000e+00> : vector<4x128xf32>
    %172 = tpu.matmul %169, %171, %cst_81 {dimension_numbers = #tpu.dot_dimension_numbers<[1], [0], [0], [1], [0, 0, 1, 1], [], []>} : vector<4x64xbf16>, vector<64x128xbf16>, vector<4x128xf32> -> vector<4x128xf32>
    %c0_82 = arith.constant 0 : index
    %c13 = arith.constant 13 : index
    %c0_83 = arith.constant 0 : index
    %173 = vector.load %arg11[%c0_82, %c13, %c0_83] : memref<4x15x128xf32, #tpu.memory_space<vmem>>, vector<4x1x128xf32>
    %174 = vector.shape_cast %173 : vector<4x1x128xf32> to vector<4x128xf32>
    %175 = vector.shape_cast %172 : vector<4x128xf32> to vector<4x1x128xf32>
    tpu.vector_store %arg11[%c0_82, %c13, %c0_83], %175 {strides = array<i32>} : memref<4x15x128xf32, #tpu.memory_space<vmem>>, vector<4x1x128xf32>,
    %cst_84 = arith.constant 5.000000e-01 : f32
    %176 = vector.broadcast %cst_84 : f32 to vector<4x8x1xf32>
    %177 = arith.cmpf ogt, %90, %176 : vector<4x8x1xf32>
    %178 = vector.extract_strided_slice %39 {offsets = [0, 0, 5], sizes = [4, 8, 1], strides = [1, 1, 1]} : vector<4x8x6xf32> to vector<4x8x1xf32>
    %179 = vector.broadcast %178 : vector<4x8x1xf32> to vector<4x8x64xf32>
    %180 = arith.mulf %28, %179 : vector<4x8x64xf32>
    %cst_85 = arith.constant -1.000000e+30 : f32
    %181 = vector.shape_cast %177 : vector<4x8x1xi1> to vector<4x8x1xi1>
    %182 = vector.broadcast %181 : vector<4x8x1xi1> to vector<4x8x64xi1>
    %183 = vector.broadcast %cst_85 : f32 to vector<4x8x64xf32>
    %184 = arith.select %182, %180, %183 : vector<4x8x64xi1>, vector<4x8x64xf32>
    %cst_86 = arith.constant dense<0xFF800000> : vector<4x64xf32>
    %185 = vector.multi_reduction <maximumf>, %184, %cst_86 [1] : vector<4x8x64xf32> to vector<4x64xf32>
    %186 = arith.truncf %185 : vector<4x64xf32> to vector<4x64xbf16>
    %c5 = arith.constant 5 : index
    %c0_87 = arith.constant 0 : index
    %c0_88 = arith.constant 0 : index
    %187 = vector.load %arg8[%c5, %c0_87, %c0_88] : memref<6x64x128xbf16, #tpu.memory_space<vmem>>, vector<1x64x128xbf16>
    %188 = vector.shape_cast %187 : vector<1x64x128xbf16> to vector<64x128xbf16>
    %cst_89 = arith.constant dense<0.000000e+00> : vector<4x128xf32>
    %189 = tpu.matmul %186, %188, %cst_89 {dimension_numbers = #tpu.dot_dimension_numbers<[1], [0], [0], [1], [0, 0, 1, 1], [], []>} : vector<4x64xbf16>, vector<64x128xbf16>, vector<4x128xf32> -> vector<4x128xf32>
    %c0_90 = arith.constant 0 : index
    %c14 = arith.constant 14 : index
    %c0_91 = arith.constant 0 : index
    %190 = vector.load %arg11[%c0_90, %c14, %c0_91] : memref<4x15x128xf32, #tpu.memory_space<vmem>>, vector<4x1x128xf32>
    %191 = vector.shape_cast %190 : vector<4x1x128xf32> to vector<4x128xf32>
    %192 = vector.shape_cast %189 : vector<4x128xf32> to vector<4x1x128xf32>
    tpu.vector_store %arg11[%c0_90, %c14, %c0_91], %192 {strides = array<i32>} : memref<4x15x128xf32, #tpu.memory_space<vmem>>, vector<4x1x128xf32>,
    return
  }
  func.func @transform_0(%arg0: i32, %arg1: memref<8xi32, #tpu.memory_space<smem>>) -> (i32, i32, i32) {
    %c0_i32 = arith.constant 0 : i32
    %c0_i32_0 = arith.constant 0 : i32
    %c0_i32_1 = arith.constant 0 : i32
    return %arg0, %c0_i32, %c0_i32_0 : i32, i32, i32
  }
  func.func @transform_1(%arg0: i32, %arg1: memref<8xi32, #tpu.memory_space<smem>>) -> (i32, i32, i32) {
    %c0_i32 = arith.constant 0 : i32
    %c0_i32_0 = arith.constant 0 : i32
    %c0_i32_1 = arith.constant 0 : i32
    return %arg0, %c0_i32, %c0_i32_0 : i32, i32, i32
  }
  func.func @transform_2(%arg0: i32, %arg1: memref<8xi32, #tpu.memory_space<smem>>) -> (i32, i32) {
    %c0_i32 = arith.constant 0 : i32
    %c0_i32_0 = arith.constant 0 : i32
    %c0_i32_1 = arith.constant 0 : i32
    return %c0_i32, %c0_i32_0 : i32, i32
  }
  func.func @transform_3(%arg0: i32, %arg1: memref<8xi32, #tpu.memory_space<smem>>) -> (i32, i32) {
    %c0_i32 = arith.constant 0 : i32
    %c0_i32_0 = arith.constant 0 : i32
    %c0_i32_1 = arith.constant 0 : i32
    return %c0_i32, %c0_i32_0 : i32, i32
  }
  func.func @transform_4(%arg0: i32, %arg1: memref<8xi32, #tpu.memory_space<smem>>) -> (i32, i32) {
    %c0_i32 = arith.constant 0 : i32
    %c0_i32_0 = arith.constant 0 : i32
    %c0_i32_1 = arith.constant 0 : i32
    return %c0_i32, %c0_i32_0 : i32, i32
  }
  func.func @transform_5(%arg0: i32, %arg1: memref<8xi32, #tpu.memory_space<smem>>) -> (i32, i32, i32) {
    %c0_i32 = arith.constant 0 : i32
    %c0_i32_0 = arith.constant 0 : i32
    %c0_i32_1 = arith.constant 0 : i32
    %c0_i32_2 = arith.constant 0 : i32
    return %c0_i32, %c0_i32_0, %c0_i32_1 : i32, i32, i32
  }
  func.func @transform_6(%arg0: i32, %arg1: memref<8xi32, #tpu.memory_space<smem>>) -> (i32, i32, i32) {
    %c0_i32 = arith.constant 0 : i32
    %c0_i32_0 = arith.constant 0 : i32
    %c0_i32_1 = arith.constant 0 : i32
    %c0_i32_2 = arith.constant 0 : i32
    return %c0_i32, %c0_i32_0, %c0_i32_1 : i32, i32, i32
  }
  func.func @transform_7(%arg0: i32, %arg1: memref<8xi32, #tpu.memory_space<smem>>) -> (i32, i32) {
    %c0_i32 = arith.constant 0 : i32
    %c0_i32_0 = arith.constant 0 : i32
    %c0_i32_1 = arith.constant 0 : i32
    return %c0_i32, %c0_i32_0 : i32, i32
  }
  func.func @transform_8(%arg0: i32, %arg1: memref<8xi32, #tpu.memory_space<smem>>) -> (i32, i32, i32) {
    %c0_i32 = arith.constant 0 : i32
    %c0_i32_0 = arith.constant 0 : i32
    %c0_i32_1 = arith.constant 0 : i32
    return %arg0, %c0_i32, %c0_i32_0 : i32, i32, i32
  }
  func.func @transform_9(%arg0: i32, %arg1: memref<8xi32, #tpu.memory_space<smem>>) -> (i32, i32, i32) {
    %c0_i32 = arith.constant 0 : i32
    %c0_i32_0 = arith.constant 0 : i32
    %c0_i32_1 = arith.constant 0 : i32
    return %arg0, %c0_i32, %c0_i32_0 : i32, i32, i32
  }
}

</mosaic_0001>

<bundles_post_ra>
// kernel: _lambda_.1
= control target key start
LH: loop header
LB: loop body
LE: loop exit
PB: predicated region body
PF: predicated region fallthrough
CT: control target
= control target key end

     0   :  { %s8745_s0 = inlined_call_operand.vmem [shape: s32[8], index: 0, kind: input, shape index: {}]   ;;  %s8746_s1 = inlined_call_operand.vmem [shape: f32[8,48,4], index: 1, kind: input, shape index: {}]   ;;  %s8747_s2 = inlined_call_operand.vmem [shape: f32[8,8,32], index: 2, kind: input, shape index: {}]   ;;  %s8748_s3 = inlined_call_operand.vmem [shape: bf16[4,64], index: 3, kind: input, shape index: {}]   ;;  %s8749_s4 = inlined_call_operand.vmem [shape: bf16[32,64], index: 4, kind: input, shape index: {}]   ;;  %s8750_s5 = inlined_call_operand.vmem [shape: bf16[64,128], index: 5, kind: input, shape index: {}]   ;;  %s8751_s6 = inlined_call_operand.vmem [shape: bf16[6,64,128], index: 6, kind: input, shape index: {}]   ;;  %s8752_s7 = inlined_call_operand.vmem [shape: bf16[6,64,128], index: 7, kind: input, shape index: {}]   ;;  %s8753_s8 = inlined_call_operand.vmem [shape: bf16[64,128], index: 8, kind: input, shape index: {}]   ;;  %s8754_s9 = inlined_call_operand.vmem [shape: f32[8,7,128], index: 9, kind: output, shape index: {0}]   ;;  %s8755_s10 = inlined_call_operand.vmem [shape: f32[8,15,128], index: 10, kind: output, shape index: {1}]  }
   0x1   :  { %s16_s15 = sshll.u32 %s8745_s0, 4  ;;  %s17_s15 = int_to_ptr.vmem [resolvable:$true] %s16_s15 }
   0x2   :  { %s7017_s16 = scalar_lea.vmem %s17_s15, 16  ;;  %p7022_p1 = scmp.lt.s32.totalorder %s17_s15, %s17_s15 }
   0x3   :  { %p7018_p0 = scmp.ne.s32.totalorder %s17_s15, %s7017_s16  ;;  %p7023_p2 = scmp.lt.s32.totalorder %s7017_s16, %s7017_s16 }
   0x5   :  { %p7024_p3 = por %p7023_p2, %p7022_p1 }
   0x7   :  { %p7025_p4 = pnand %p7024_p3, %p7018_p0 }
   0x9   :  { %7028 = shalt.err (!%p7025_p4)  }
   0xa   :  { %s7039_s17 = smov [#allocation3]  }
   0xb   :  { %19 = dma.vmem_to_smem %s17_s15, 16, %s7039_s17, [#allocation2] }
   0xc   :  { %7033 = dma.done.wait [#allocation2], 16 }
   0xd   :  { %7034 = vsyncadd [#allocation2], 4294967280 }
   0xe   :  { %21 = sfence }
   0xf   :  { %s7110_s18 = smov 0  }
  0x10 LB: > { %s6248_s0 = sadd.s32 4294967295, %s7037_s18   ;;  %p6252_p5 = scmp.ge.s32.totalorder %s7037_s18, 1  ;;  %s7037_s18 = sphi %s7110_s18, %s27_s18  }
  0x11   : > { %p310_p6 = scmp.lt.s32.totalorder %s7037_s18, 3 }
  0x13   : > { %p311_p7 = pnand %p6252_p5, %p310_p6 }
  0x15   : > { %314 = sbr.rel (%p311_p7) target bundleno = 1648 (0x670), region = 52 }
  0x1a   : > { %v422_v0 = vld [vmem:[%s8748_s3] sm:$0x3]  ;;  %vm460_vm0 = vcmask 1041408   ;;  %s7121_s21 = sshll.u32 %s6248_s0, 2  ;;  %vm423_vm1 = vcmask 31744   ;;  %vm617_vm2 = vcmask 523264  }
  0x1b   : > { %6885 = vmatprep.subr.msk.bf16.mxu0 %vm460_vm0, %v422_v0  ;;  %v462_v1 = vsel %vm460_vm0, %v422_v0, 0  ;;  %p359_p8 = scmp.lt.s32.totalorder %s7121_s21, 7  ;;  %vm950_vm3 = vcmask 1041409   ;;  %vm952_vm4 = vcmask 1042434   ;;  %vm954_vm5 = vcmask 1043459   ;;  %s5016_s19 = sadd.s32 1, %s7121_s21 }
  0x1c   : > { %6600 = vmatpush3.bf16.msra.mxu0 %v462_v1  ;;  %vm956_vm6 = vcmask 1044484   ;;  %vm958_vm7 = vcmask 1045509   ;;  %vm7044_vm8 = vmmov 0   ;;  %vm4675_vm9 = vcmask 261120   ;;  %s5017_s20 = sld [smem:[#allocation3 + %s5016_s19]]  ;;  %s5032_s25 = sadd.s32 3, %s7121_s21 }
  0x1d   : > { %s7125_s22 = scalar_select %p359_p8, %s7121_s21, 7 }
  0x1f   : > { %s6886_s23 = smul.u32 48, %s7125_s22  ;;  %s6256_s27 = sshll.u32 %s7125_s22, 3 }
  0x20   : > { %s369_s30 = scalar_lea.vmem %s8747_s2, %s6256_s27  ;;  %s8105_s0 = scalar_lea.vmem %s8754_s9, %s6256_s27 }
  0x21   : > { %s7131_s26 = scalar_lea.vmem %s8746_s1, %s6886_s23  ;;  %s5009_s27 = sld [smem:[#allocation3 + %s7121_s21]] }
  0x22   : > { %v386_v2 = vld [vmem:[%s7131_s26] sm:$0xff]  ;;  %v387_v3 = vld [vmem:[%s7131_s26 + $0x8] sm:$0xff]  ;;  %v388_v4 = vld [vmem:[%s7131_s26 + $0x10] sm:$0xff]  ;;  %s5024_s23 = sadd.s32 2, %s7121_s21  ;;  %s6463_s21 = sshll.u32 %s7125_s22, 4 }
  0x23   : > { %v410_v5 = vpack.c.bf16 %v387_v3, %v386_v2  ;;  %v389_v6 = vld [vmem:[%s7131_s26 + $0x18] sm:$0xff]  ;;  %v390_v7 = vld [vmem:[%s7131_s26 + $0x20] sm:$0xff]  ;;  %v391_v8 = vld [vmem:[%s7131_s26 + $0x28] sm:$0xff]  ;;  %s5025_s24 = sld [smem:[#allocation3 + %s5024_s23]] }
  0x24   : > { %v411_v9 = vpack.c.bf16 %v389_v6, %v388_v4  ;;  %v412_v10 = vpack.c.bf16 %v391_v8, %v390_v7  ;;  %v392_v11 = vld [vmem:[%s7131_s26 + $0x30] sm:$0xff]  ;;  %v393_v12 = vld [vmem:[%s7131_s26 + $0x38] sm:$0xff]  ;;  %v394_v13 = vld [vmem:[%s7131_s26 + $0x40] sm:$0xff] }
  0x25   : > { %6601 = vmatprep.mubr.msk.bf16.mxu0 %vm423_vm1, %v410_v5  ;;  %v395_v14 = vld [vmem:[%s7131_s26 + $0x48] sm:$0xff]  ;;  %v413_v15 = vpack.c.bf16 %v393_v12, %v392_v11  ;;  %v396_v17 = vld [vmem:[%s7131_s26 + $0x50] sm:$0xff]  ;;  %v397_v18 = vld [vmem:[%s7131_s26 + $0x58] sm:$0xff] }
  0x26   : > { %6602 = vmatmul.mubr.msk.bf16.vlgmr.msra.gmra.mxu0 %vm423_vm1, %v411_v9  ;;  %v414_v16 = vpack.c.bf16 %v395_v14, %v394_v13  ;;  %v398_v19 = vld [vmem:[%s7131_s26 + $0x60] sm:$0xff]  ;;  %v399_v20 = vld [vmem:[%s7131_s26 + $0x68] sm:$0xff]  ;;  %v415_v21 = vpack.c.bf16 %v397_v18, %v396_v17  ;;  %v400_v23 = vld [vmem:[%s7131_s26 + $0x70] sm:$0xff] }
  0x27   : > { %6605 = vmatprep.mubr.msk.bf16.mxu0 %vm423_vm1, %v412_v10  ;;  %v416_v22 = vpack.c.bf16 %v399_v20, %v398_v19  ;;  %v401_v24 = vld [vmem:[%s7131_s26 + $0x78] sm:$0xff]  ;;  %v402_v25 = vld [vmem:[%s7131_s26 + $0x80] sm:$0xff]  ;;  %v403_v26 = vld [vmem:[%s7131_s26 + $0x88] sm:$0xff] }
  0x28   : > { %v417_v27 = vpack.c.bf16 %v401_v24, %v400_v23  ;;  %v418_v28 = vpack.c.bf16 %v403_v26, %v402_v25  ;;  %v404_v29 = vld [vmem:[%s7131_s26 + $0x90] sm:$0xff]  ;;  %v405_v30 = vld [vmem:[%s7131_s26 + $0x98] sm:$0xff]  ;;  %v406_v31 = vld [vmem:[%s7131_s26 + $0xa0] sm:$0xff] }
  0x29   : > { %v407_v32 = vld [vmem:[%s7131_s26 + $0xa8] sm:$0xff]  ;;  %v419_v33 = vpack.c.bf16 %v405_v30, %v404_v29  ;;  %v408_v35 = vld [vmem:[%s7131_s26 + $0xb0] sm:$0xff]  ;;  %v409_v36 = vld [vmem:[%s7131_s26 + $0xb8] sm:$0xff]  ;;  %s5033_s26 = sld [smem:[#allocation3 + %s5032_s25]] }
  0x2a   : > { %v420_v34 = vpack.c.bf16 %v407_v32, %v406_v31  ;;  %v421_v37 = vpack.c.bf16 %v409_v36, %v408_v35 }
  0x2e   : > { %6606 = vmatmul.mubr.msk.bf16.gmra.mxu0 %vm423_vm1, %v413_v15 }
  0x2f   : > { %6609 = vmatprep.mubr.msk.bf16.mxu0 %vm423_vm1, %v414_v16 }
  0x36   : > { %6610 = vmatmul.mubr.msk.bf16.gmra.mxu0 %vm423_vm1, %v415_v21 }
  0x37   : > { %6613 = vmatprep.mubr.msk.bf16.mxu0 %vm423_vm1, %v416_v22 }
  0x3e   : > { %6614 = vmatmul.mubr.msk.bf16.gmra.mxu0 %vm423_vm1, %v417_v27 }
  0x3f   : > { %6617 = vmatprep.mubr.msk.bf16.mxu0 %vm423_vm1, %v418_v28 }
  0x46   : > { %6618 = vmatmul.mubr.msk.bf16.gmra.mxu0 %vm423_vm1, %v419_v33 }
  0x47   : > { %6621 = vmatprep.mubr.msk.bf16.mxu0 %vm423_vm1, %v420_v34 }
  0x4e   : > { %6622 = vmatmul.mubr.msk.bf16.gmra.mxu0 %vm423_vm1, %v421_v37 }
  0xe6   : > { %v6603_v38 = vpop.f32.mrf.mxu0 }
  0xe7   : > { %v595_v39 = vmax.f32 %v6603_v38, 0.0 }
  0xe8   : > { %v498_v40 = vpop.f32.mrf.mxu0 }
  0xe9   : > { %v632_v41 = vsel %vm617_vm2, %v595_v39, -inf  ;;  %v593_v42 = vmax.f32 %v498_v40, 0.0 }
  0xea   : > { %v633_v43 = vrot.slane %v632_v41, 4  ;;  %v6604_v44 = vpop.f32.mrf.mxu0 }
  0xeb   : > { %v618_v45 = vsel %vm617_vm2, %v593_v42, -inf  ;;  %v596_v46 = vmax.f32 %v6604_v44, 0.0 }
  0xec   : > { %v634_v47 = vmax.f32 %v632_v41, %v633_v43  ;;  %v619_v48 = vrot.slane %v618_v45, 4  ;;  %v501_v49 = vpop.f32.mrf.mxu0 }
  0xed   : > { %v639_v50 = vsel %vm617_vm2, %v596_v46, -inf  ;;  %v594_v51 = vmax.f32 %v501_v49, 0.0 }
  0xee   : > { %v635_v52 = vrot.slane %v634_v47, 2  ;;  %v620_v53 = vmax.f32 %v618_v45, %v619_v48  ;;  %v640_v54 = vrot.slane %v639_v50, 4  ;;  %v6607_v55 = vpop.f32.mrf.mxu0 }
  0xef   : > { %v625_v56 = vsel %vm617_vm2, %v594_v51, -inf  ;;  %v599_v57 = vmax.f32 %v6607_v55, 0.0 }
  0xf0   : > { %v636_v58 = vmax.f32 %v634_v47, %v635_v52  ;;  %v621_v59 = vrot.slane %v620_v53, 2  ;;  %v641_v60 = vmax.f32 %v639_v50, %v640_v54  ;;  %v626_v61 = vrot.slane %v625_v56, 4  ;;  %v514_v62 = vpop.f32.mrf.mxu0 }
  0xf1   : > { %v660_v63 = vsel %vm617_vm2, %v599_v57, -inf  ;;  %v597_v0 = vmax.f32 %v514_v62, 0.0 }
  0xf2   : > { %v637_v1 = vrot.slane %v636_v58, 1  ;;  %v622_v2 = vmax.f32 %v620_v53, %v621_v59  ;;  %v642_v3 = vrot.slane %v641_v60, 2  ;;  %v627_v4 = vmax.f32 %v625_v56, %v626_v61  ;;  %v6608_v5 = vpop.f32.mrf.mxu0 }
  0xf3   : > { %v661_v6 = vrot.slane %v660_v63, 4  ;;  %v646_v7 = vsel %vm617_vm2, %v597_v0, -inf  ;;  %v600_v8 = vmax.f32 %v6608_v5, 0.0 }
  0xf4   : > { %v638_v9 = vmax.f32 %v636_v58, %v637_v1  ;;  %v623_v10 = vrot.slane %v622_v2, 1  ;;  %v643_v11 = vmax.f32 %v641_v60, %v642_v3  ;;  %v628_v12 = vrot.slane %v627_v4, 2  ;;  %v517_v13 = vpop.f32.mrf.mxu0 }
  0xf5   : > { %v662_v14 = vmax.f32 %v660_v63, %v661_v6  ;;  %v647_v15 = vrot.slane %v646_v7, 4  ;;  %v667_v16 = vsel %vm617_vm2, %v600_v8, -inf  ;;  %v598_v19 = vmax.f32 %v517_v13, 0.0 }
  0xf6   : > { %v624_v17 = vmax.f32 %v622_v2, %v623_v10  ;;  %v644_v18 = vrot.slane %v643_v11, 1  ;;  %v6611_v20 = vpop.f32.mrf.mxu0  ;;  %v629_v21 = vmax.f32 %v627_v4, %v628_v12  ;;  %v668_v24 = vrot.slane %v667_v16, 4 }
  0xf7   : > { %v663_v22 = vrot.slane %v662_v14, 2  ;;  %v648_v23 = vmax.f32 %v646_v7, %v647_v15  ;;  %v789_v25 = vsel %vm617_vm2, %v638_v9, -inf  ;;  %v832_v31 = vpack.c.bf16 %v638_v9, %v638_v9 }
  0xf8   : > { %v530_v26 = vpop.f32.mrf.mxu0  ;;  %v630_v27 = vrot.slane %v629_v21, 1  ;;  %v669_v30 = vmax.f32 %v667_v16, %v668_v24  ;;  %v786_v32 = vsel %vm617_vm2, %v624_v17, -inf  ;;  %v830_v33 = vpack.c.bf16 %v624_v17, %v624_v17 }
  0xf9   : > { %v664_v28 = vmax.f32 %v662_v14, %v663_v22  ;;  %v649_v29 = vrot.slane %v648_v23, 2  ;;  %v653_v34 = vsel %vm617_vm2, %v598_v19, -inf  ;;  %v7179_v36 = vmax.f32 %v643_v11, %v644_v18 }
  0xfa   : > { %v6612_v35 = vpop.f32.mrf.mxu0  ;;  %v631_v37 = vmax.f32 %v629_v21, %v630_v27  ;;  %v670_v39 = vrot.slane %v669_v30, 2  ;;  %v654_v41 = vrot.slane %v653_v34, 4  ;;  %v603_v42 = vmax.f32 %v6611_v20, 0.0 }
  0xfb   : > { %v650_v38 = vmax.f32 %v648_v23, %v649_v29  ;;  %v665_v40 = vrot.slane %v664_v28, 1  ;;  %v601_v43 = vmax.f32 %v530_v26, 0.0  ;;  %v604_v48 = vmax.f32 %v6612_v35, 0.0 }
  0xfc   : > { %v533_v44 = vpop.f32.mrf.mxu0  ;;  %v787_v45 = vsel %vm617_vm2, %v631_v37, -inf  ;;  %v831_v46 = vpack.c.bf16 %v631_v37, %v631_v37  ;;  %v7182_v49 = vunpack.c.l.b16 %v832_v31  ;;  %v671_v51 = vmax.f32 %v669_v30, %v670_v39 }
  0xfd   : > { %v651_v47 = vrot.slane %v650_v38, 1  ;;  %v788_v50 = vmax.f32 %v786_v32, %v787_v45  ;;  %v688_v52 = vsel %vm617_vm2, %v603_v42, -inf  ;;  %v7185_v54 = vunpack.c.l.b16 %v830_v33 }
  0xfe   : > { %v6615_v53 = vpop.f32.mrf.mxu0  ;;  %v791_v55 = vsel %vm617_vm2, %v7179_v36, -inf  ;;  %v833_v56 = vpack.c.bf16 %v7179_v36, %v7179_v36  ;;  %v666_v59 = vmax.f32 %v664_v28, %v665_v40  ;;  %v672_v60 = vrot.slane %v671_v51, 1 }
  0xff   : > { %v7191_v57 = vmax.f32 %v650_v38, %v651_v47  ;;  %v790_v58 = vmax.f32 %v788_v50, %v789_v25  ;;  %v689_v61 = vrot.slane %v688_v52, 4  ;;  %v7193_v63 = vunpack.c.l.b16 %v831_v46 }
 0x100   : > { %v546_v62 = vpop.f32.mrf.mxu0  ;;  %v655_v0 = vmax.f32 %v653_v34, %v654_v41  ;;  %v674_v1 = vsel %vm617_vm2, %v601_v43, -inf  ;;  %v695_v2 = vsel %vm617_vm2, %v604_v48, -inf  ;;  %v7199_v5 = vmax.f32 %v671_v51, %v672_v60 }
 0x101   : > { %v792_v3 = vmax.f32 %v790_v58, %v791_v55  ;;  %v793_v4 = vsel %vm617_vm2, %v7191_v57, -inf  ;;  %v690_v6 = vmax.f32 %v688_v52, %v689_v61  ;;  %v675_v8 = vrot.slane %v674_v1, 4 }
 0x102   : > { %v6616_v7 = vpop.f32.mrf.mxu0  ;;  %v696_v9 = vrot.slane %v695_v2, 4  ;;  %v602_v10 = vmax.f32 %v533_v44, 0.0  ;;  %v607_v11 = vmax.f32 %v6615_v53, 0.0  ;;  %v797_v12 = vsel %vm617_vm2, %v666_v59, -inf }
 0x103   : > { %v836_v13 = vpack.c.bf16 %v666_v59, %v666_v59  ;;  %v7202_v14 = vmax.f32 %v792_v3, %v793_v4  ;;  %v798_v15 = vsel %vm617_vm2, %v7199_v5, -inf  ;;  %v691_v18 = vrot.slane %v690_v6, 2 }
 0x104   : > { %v549_v16 = vpop.f32.mrf.mxu0  ;;  %v799_v17 = vmax.f32 %v797_v12, %v798_v15  ;;  %v676_v19 = vmax.f32 %v674_v1, %v675_v8  ;;  %v697_v20 = vmax.f32 %v695_v2, %v696_v9  ;;  %v656_v21 = vrot.slane %v655_v0, 2 }
 0x105   : > { %v681_v22 = vsel %vm617_vm2, %v602_v10, -inf  ;;  %v716_v23 = vsel %vm617_vm2, %v607_v11, -inf  ;;  %v605_v24 = vmax.f32 %v546_v62, 0.0  ;;  %v692_v25 = vmax.f32 %v690_v6, %v691_v18 }
 0x106   : > { %v677_v26 = vrot.slane %v676_v19, 2  ;;  %v698_v27 = vrot.slane %v697_v20, 2  ;;  %v682_v28 = vrot.slane %v681_v22, 4  ;;  %v6619_v29 = vpop.f32.mrf.mxu0  ;;  %v717_v30 = vrot.slane %v716_v23, 4 }
 0x107   : > { %v702_v31 = vsel %vm617_vm2, %v605_v24, -inf  ;;  %v608_v32 = vmax.f32 %v6616_v7, 0.0  ;;  %v606_v33 = vmax.f32 %v549_v16, 0.0  ;;  %v7209_v34 = vunpack.c.l.b16 %v836_v13 }
 0x108   : > { %v678_v35 = vmax.f32 %v676_v19, %v677_v26  ;;  %v699_v37 = vmax.f32 %v697_v20, %v698_v27  ;;  %v683_v38 = vmax.f32 %v681_v22, %v682_v28  ;;  %v718_v39 = vmax.f32 %v716_v23, %v717_v30  ;;  %v562_v47 = vpop.f32.mrf.mxu0 }
 0x109   : > { %v703_v40 = vrot.slane %v702_v31, 4  ;;  %v723_v41 = vsel %vm617_vm2, %v608_v32, -inf  ;;  %v709_v42 = vsel %vm617_vm2, %v606_v33, -inf  ;;  %v7213_v43 = vmax.f32 %v655_v0, %v656_v21 }
 0x10a   : > { %v693_v44 = vrot.slane %v692_v25, 1  ;;  %v679_v45 = vrot.slane %v678_v35, 1  ;;  %v684_v46 = vrot.slane %v683_v38, 2  ;;  %v719_v48 = vrot.slane %v718_v39, 2  ;;  %v6620_v6 = vpop.f32.mrf.mxu0 }
 0x10b   : > { %v704_v50 = vmax.f32 %v702_v31, %v703_v40  ;;  %v724_v51 = vrot.slane %v723_v41, 4  ;;  %v710_v52 = vrot.slane %v709_v42, 4  ;;  %v837_v53 = vpack.c.bf16 %v7199_v5, %v7199_v5 }
 0x10c   : > { %v680_v55 = vmax.f32 %v678_v35, %v679_v45  ;;  %v700_v58 = vrot.slane %v699_v37, 1  ;;  %v685_v59 = vmax.f32 %v683_v38, %v684_v46  ;;  %v720_v60 = vmax.f32 %v718_v39, %v719_v48 }
 0x10d   : > { %v705_v61 = vrot.slane %v704_v50, 2  ;;  %v725_v62 = vmax.f32 %v723_v41, %v724_v51  ;;  %v711_v1 = vmax.f32 %v709_v42, %v710_v52  ;;  %v658_v0 = vrot.slane %v7213_v43, 1 }
 0x10e   : > { %v7218_v2 = vmax.f32 %v692_v25, %v693_v44  ;;  %v800_v3 = vsel %vm617_vm2, %v680_v55, -inf  ;;  %v686_v4 = vrot.slane %v685_v59, 1  ;;  %v721_v8 = vrot.slane %v720_v60, 1 }
 0x10f   : > { %v801_v7 = vmax.f32 %v799_v17, %v800_v3  ;;  %v706_v9 = vmax.f32 %v704_v50, %v705_v61  ;;  %v726_v10 = vrot.slane %v725_v62, 2  ;;  %v7221_v5 = vmax.f32 %v699_v37, %v700_v58  ;;  %v7225_v17 = vpop.f32.mrf.mxu0 }
 0x110   : > { %v687_v11 = vmax.f32 %v685_v59, %v686_v4  ;;  %v712_v12 = vrot.slane %v711_v1, 2  ;;  %v611_v13 = vmax.f32 %v6619_v29, 0.0  ;;  %v838_v15 = vpack.c.bf16 %v680_v55, %v680_v55 }
 0x111   : > { %v722_v16 = vmax.f32 %v720_v60, %v721_v8  ;;  %v707_v18 = vrot.slane %v706_v9, 1  ;;  %v727_v19 = vmax.f32 %v725_v62, %v726_v10  ;;  %v609_v23 = vmax.f32 %v562_v47, 0.0  ;;  %v6623_v42 = vpop.f32.mrf.mxu0 }
 0x112   : > { %v802_v20 = vsel %vm617_vm2, %v687_v11, -inf  ;;  %v713_v21 = vmax.f32 %v711_v1, %v712_v12  ;;  %v744_v22 = vsel %vm617_vm2, %v611_v13, -inf  ;;  %v804_v24 = vsel %vm617_vm2, %v7218_v2, -inf }
 0x113   : > { %v803_v25 = vmax.f32 %v801_v7, %v802_v20  ;;  %v839_v26 = vpack.c.bf16 %v687_v11, %v687_v11  ;;  %v844_v27 = vpack.c.bf16 %v722_v16, %v722_v16  ;;  %v708_v28 = vmax.f32 %v706_v9, %v707_v18  ;;  %v578_v3 = vpop.f32.mrf.mxu0 }
 0x114   : > { %v728_v29 = vrot.slane %v727_v19, 1  ;;  %v714_v30 = vrot.slane %v713_v21, 1  ;;  %v745_v31 = vrot.slane %v744_v22, 4  ;;  %v7229_v32 = vunpack.c.l.b16 %v837_v53 }
 0x115   : > { %v7231_v33 = vunpack.c.l.b16 %v838_v15  ;;  %v806_v35 = vsel %vm617_vm2, %v7221_v5, -inf  ;;  %v805_v37 = vmax.f32 %v803_v25, %v804_v24  ;;  %v730_v41 = vsel %vm617_vm2, %v609_v23, -inf  ;;  %v6624_v20 = vpop.f32.mrf.mxu0 }
 0x116   : > { %v7235_v38 = vmax.f32 %v727_v19, %v728_v29  ;;  %v7237_v39 = vmax.f32 %v713_v21, %v714_v30  ;;  %v746_v40 = vmax.f32 %v744_v22, %v745_v31  ;;  %v811_v45 = vsel %vm617_vm2, %v722_v16, -inf }
 0x117   : > { %v807_v44 = vmax.f32 %v805_v37, %v806_v35  ;;  %v731_v46 = vrot.slane %v730_v41, 4  ;;  %v612_v47 = vmax.f32 %v6620_v6, 0.0  ;;  %v7241_v48 = vunpack.c.l.b16 %v839_v26  ;;  %v581_v35 = vpop.f32.mrf.mxu0 }
 0x118   : > { %v7243_v50 = vunpack.c.l.b16 %v844_v27  ;;  %v808_v51 = vsel %vm617_vm2, %v708_v28, -inf  ;;  %v809_v52 = vsel %vm617_vm2, %v7237_v39, -inf  ;;  %v842_v53 = vpack.c.bf16 %v708_v28, %v708_v28 }
 0x119   : > { %v810_v55 = vmax.f32 %v808_v51, %v809_v52  ;;  %v747_v58 = vrot.slane %v746_v40, 2  ;;  %v732_v59 = vmax.f32 %v730_v41, %v731_v46  ;;  %v813_v60 = vsel %vm617_vm2, %v7235_v38, -inf }
 0x11a   : > { %v751_v61 = vsel %vm617_vm2, %v612_v47, -inf  ;;  %v659_v62 = vmax.f32 %v7213_v43, %v658_v0  ;;  %v834_v1 = vpack.c.bf16 %v7191_v57, %v7191_v57  ;;  %v4530_v4 = vpack.c.bf16 %v807_v44, %v807_v44 }
 0x11b   : > { %v812_v6 = vmax.f32 %v810_v55, %v811_v45  ;;  %v748_v7 = vmax.f32 %v746_v40, %v747_v58  ;;  %v733_v8 = vrot.slane %v732_v59, 2  ;;  %v752_v9 = vrot.slane %v751_v61, 4 }
 0x11c   : > { %v835_v10 = vpack.c.bf16 %v659_v62, %v659_v62  ;;  %v929_v11 = vunpack.c.l.b16 %v833_v56  ;;  %v930_v12 = vunpack.c.l.b16 %v834_v1  ;;  %v951_v43 = vsel %vm950_vm3, %v7193_v63, %v7185_v54 }
 0x11d   : > { %v749_v13 = vrot.slane %v748_v7, 1  ;;  %v734_v15 = vmax.f32 %v732_v59, %v733_v8  ;;  %v814_v16 = vmax.f32 %v812_v6, %v813_v60  ;;  %v753_v57 = vmax.f32 %v751_v61, %v752_v9 }
 0x11e   : > { %v931_v0 = vunpack.c.l.b16 %v835_v10  ;;  %v953_v18 = vsel %vm952_vm4, %v7182_v49, %v951_v43  ;;  %v795_v19 = vsel %vm617_vm2, %v659_v62, -inf  ;;  %v7263_v21 = vunpack.c.l.b16 %v842_v53 }
 0x11f   : > { %v735_v36 = vrot.slane %v734_v15, 1  ;;  %v955_v56 = vsel %vm954_vm5, %v929_v11, %v953_v18  ;;  %v796_v22 = vmax.f32 %v7202_v14, %v795_v19  ;;  %v754_v23 = vrot.slane %v753_v57, 2 }
 0x120   : > { %v957_v24 = vsel %vm956_vm6, %v930_v12, %v955_v56  ;;  %v610_v54 = vmax.f32 %v7225_v17, 0.0  ;;  %v615_v63 = vmax.f32 %v6623_v42, 0.0  ;;  %v4546_v25 = vunpack.c.l.b16 %v4530_v4 }
 0x121   : > { %v7269_v26 = vmax.f32 %v748_v7, %v749_v13  ;;  %v7271_v49 = vmax.f32 %v734_v15, %v735_v36  ;;  %v959_v27 = vsel %vm958_vm7, %v931_v0, %v957_v24  ;;  %v755_v28 = vmax.f32 %v753_v57, %v754_v23 }
 0x122   : > { %v975_v29 = vpack.c.b16 %v959_v27, %v959_v27  ;;  %v4529_v30 = vpack.c.bf16 %v796_v22, %v796_v22  ;;  %v737_v31 = vsel %vm617_vm2, %v610_v54, -inf  ;;  %v843_v14 = vpack.c.bf16 %v7237_v39, %v7237_v39 }
 0x123   : > { %v815_v17 = vsel %vm617_vm2, %v7271_v49, -inf  ;;  %v738_v37 = vrot.slane %v737_v31, 4  ;;  %v772_v40 = vsel %vm617_vm2, %v615_v63, -inf  ;;  %v756_v42 = vrot.slane %v755_v28, 1 }
 0x124   : > { %v7280_v41 = vmax.f32 %v814_v16, %v815_v17  ;;  %983 = vxpose.xlu0.c.b16.start.end [1/1] (short) (narrow) %v975_v29, 64  ;;  %v4545_v44 = vunpack.c.l.b16 %v4529_v30  ;;  %v773_v45 = vrot.slane %v772_v40, 4  ;;  %v613_v47 = vmax.f32 %v578_v3, 0.0 }
 0x125   : > { %v739_v46 = vmax.f32 %v737_v31, %v738_v37  ;;  %v616_v51 = vmax.f32 %v6624_v20, 0.0  ;;  %v614_v52 = vmax.f32 %v581_v35, 0.0  ;;  %v819_v53 = vsel %vm617_vm2, %v7269_v26, -inf }
 0x126   : > { %v7284_v39 = vmax.f32 %v755_v28, %v756_v42  ;;  %v7287_v55 = vsel %vm950_vm3, %v4546_v25, %v4545_v44  ;;  %v774_v58 = vmax.f32 %v772_v40, %v773_v45  ;;  %v758_v60 = vsel %vm617_vm2, %v613_v47, -inf }
 0x127   : > { %v740_v59 = vrot.slane %v739_v46, 2  ;;  %v779_v61 = vsel %vm617_vm2, %v616_v51, -inf  ;;  %v765_v62 = vsel %vm617_vm2, %v614_v52, -inf  ;;  %v759_v4 = vrot.slane %v758_v60, 4 }
 0x128   : > { %v820_v1 = vsel %vm617_vm2, %v7284_v39, -inf  ;;  %v775_v3 = vrot.slane %v774_v58, 2  ;;  %v840_v6 = vpack.c.bf16 %v7218_v2, %v7218_v2  ;;  %v780_v9 = vrot.slane %v779_v61, 4 }
 0x129   : > { %v821_v7 = vmax.f32 %v819_v53, %v820_v1  ;;  %v741_v8 = vmax.f32 %v739_v46, %v740_v59  ;;  %v766_v10 = vrot.slane %v765_v62, 4  ;;  %v845_v11 = vpack.c.bf16 %v7235_v38, %v7235_v38 }
 0x12a   : > { %v939_v12 = vunpack.c.l.b16 %v843_v14  ;;  %v760_v13 = vmax.f32 %v758_v60, %v759_v4  ;;  %v841_v15 = vpack.c.bf16 %v7221_v5, %v7221_v5  ;;  %v848_v16 = vpack.c.bf16 %v7269_v26, %v7269_v26 }
 0x12b   : > { %v742_v43 = vrot.slane %v741_v8, 1  ;;  %v781_v57 = vmax.f32 %v779_v61, %v780_v9  ;;  %v767_v0 = vmax.f32 %v765_v62, %v766_v10  ;;  %v776_v18 = vmax.f32 %v774_v58, %v775_v3 }
 0x12c   : > { %v761_v2 = vrot.slane %v760_v13, 2  ;;  %v936_v19 = vunpack.c.l.b16 %v840_v6  ;;  %v960_v20 = vsel %vm950_vm3, %v7229_v32, %v7209_v34  ;;  %v937_v23 = vunpack.c.l.b16 %v841_v15 }
 0x12d   : > { %v782_v36 = vrot.slane %v781_v57, 2  ;;  %v768_v38 = vrot.slane %v767_v0, 2  ;;  %v961_v56 = vsel %vm952_vm4, %v7231_v33, %v960_v20  ;;  %v743_v22 = vmax.f32 %v741_v8, %v742_v43 }
 0x12e   : > { %v762_v5 = vmax.f32 %v760_v13, %v761_v2  ;;  %v962_v24 = vsel %vm954_vm5, %v7241_v48, %v961_v56  ;;  %v846_v54 = vpack.c.bf16 %v7271_v49, %v7271_v49  ;;  %v849_v34 = vpack.c.bf16 %v7284_v39, %v7284_v39 }
 0x12f   : > { %v783_v63 = vmax.f32 %v781_v57, %v782_v36  ;;  %v769_v25 = vmax.f32 %v767_v0, %v768_v38  ;;  %v963_v26 = vsel %vm956_vm6, %v936_v19, %v962_v24  ;;  %v847_v27 = vpack.c.bf16 %v743_v22, %v743_v22 }
 0x130   : > { %v777_v32 = vrot.slane %v776_v18, 1  ;;  %v763_v28 = vrot.slane %v762_v5, 1  ;;  %v964_v33 = vsel %vm958_vm7, %v937_v23, %v963_v26  ;;  %v941_v35 = vunpack.c.l.b16 %v845_v11 }
 0x131   : > { %v784_v29 = vrot.slane %v783_v63, 1  ;;  %v770_v30 = vrot.slane %v769_v25, 1  ;;  %v976_v31 = vpack.c.b16 %v964_v33, %v964_v33  ;;  %v942_v14 = vunpack.c.l.b16 %v846_v54 }
 0x132   : > { %v764_v48 = vmax.f32 %v762_v5, %v763_v28  ;;  %v965_v49 = vsel %vm950_vm3, %v939_v12, %v7263_v21  ;;  %v817_v17 = vsel %vm617_vm2, %v743_v22, -inf  ;;  %v943_v40 = vunpack.c.l.b16 %v847_v27 }
 0x133   : > { %v771_v37 = vmax.f32 %v769_v25, %v770_v30  ;;  %999 = vxpose.xlu0.c.b16.start.end [1/1] (short) (narrow) %v976_v31, 64  ;;  %v966_v42 = vsel %vm952_vm4, %v7243_v50, %v965_v49  ;;  %v818_v44 = vmax.f32 %v7280_v41, %v817_v17  ;;  %v778_v45 = vmax.f32 %v776_v18, %v777_v32 }
 0x134   : > { %v822_v46 = vsel %vm617_vm2, %v764_v48, -inf  ;;  %v850_v47 = vpack.c.bf16 %v764_v48, %v764_v48  ;;  %v967_v51 = vsel %vm954_vm5, %v941_v35, %v966_v42  ;;  %v945_v39 = vunpack.c.l.b16 %v849_v34 }
 0x135   : > { %v823_v52 = vmax.f32 %v821_v7, %v822_v46  ;;  %v824_v53 = vsel %vm617_vm2, %v771_v37, -inf  ;;  %v851_v21 = vpack.c.bf16 %v771_v37, %v771_v37  ;;  %v785_v58 = vmax.f32 %v783_v63, %v784_v29 }
 0x136   : > { %v968_v59 = vsel %vm956_vm6, %v942_v14, %v967_v51  ;;  %v4531_v60 = vpack.c.bf16 %v818_v44, %v818_v44  ;;  %v944_v61 = vunpack.c.l.b16 %v848_v16  ;;  %v946_v62 = vunpack.c.l.b16 %v850_v47 }
 0x137   : > { %v825_v50 = vmax.f32 %v823_v52, %v824_v53  ;;  %v969_v41 = vsel %vm958_vm7, %v943_v40, %v968_v59  ;;  %v826_v1 = vsel %vm617_vm2, %v778_v45, -inf  ;;  %v947_v3 = vunpack.c.l.b16 %v851_v21 }
 0x138   : > { %v977_v4 = vpack.c.b16 %v969_v41, %v969_v41  ;;  %v4547_v6 = vunpack.c.l.b16 %v4531_v60  ;;  %v852_v7 = vpack.c.bf16 %v778_v45, %v778_v45  ;;  %v828_v9 = vsel %vm617_vm2, %v785_v58, -inf }
 0x139   : > { %v827_v8 = vmax.f32 %v825_v50, %v826_v1  ;;  %v970_v11 = vsel %vm950_vm3, %v945_v39, %v944_v61  ;;  %v853_v15 = vpack.c.bf16 %v785_v58, %v785_v58  ;;  %v7040_v26 = vmov 0  }
 0x13a   : > { %1015 = vxpose.xlu1.c.b16.start.end [1/1] (short) (narrow) %v977_v4, 64  ;;  %v4550_v10 = vsel %vm952_vm4, %v4547_v6, %v7287_v55  ;;  %v971_v13 = vsel %vm952_vm4, %v946_v62, %v970_v11  ;;  %v948_v57 = vunpack.c.l.b16 %v852_v7  ;;  %v7350_v27 = vpack.i.b16 %v7040_v26, %v7040_v26 }
 0x13b   : > { %v829_v12 = vmax.f32 %v827_v8, %v828_v9  ;;  %v972_v16 = vsel %vm954_vm5, %v947_v3, %v971_v13  ;;  %v949_v2 = vunpack.c.l.b16 %v853_v15  ;;  %v7041_v32 = vmov 1983009808  }
 0x13c   : > { %v973_v18 = vsel %vm956_vm6, %v948_v57, %v972_v16  ;;  %v1119_v28 = vunpack.c.l.s4 %v7041_v32  ;;  %v8756_v33 = vlaneseq  ;;  %v7042_v37 = vmov 1934713408  }
 0x13d   : > { %v4532_v43 = vpack.c.bf16 %v829_v12, %v829_v12  ;;  %v974_v20 = vsel %vm958_vm7, %v949_v2, %v973_v18  ;;  %v1150_v40 = vunpack.c.l.s4 %v7042_v37 }
 0x13e   : > { %v978_v55 = vpack.c.b16 %v974_v20, %v974_v20  ;;  %v1120_v14 = vunpack.c.0.s8 %v1119_v28  ;;  %v7361_v49 = vshrl.u32 %v8756_v33, 7 }
 0x13f   : > { %v4548_v0 = vunpack.c.l.b16 %v4532_v43  ;;  %v1151_v51 = vunpack.c.0.s8 %v1150_v40 }
 0x140   : > { %v7366_v46 = vsub.s32 %v1120_v14, %v7361_v49  ;;  %vm5008_vm10 = vcmp.eq.s32.totalorder %v7361_v49, 0  ;;  %vm5015_vm11 = vcmp.eq.s32.totalorder %v7361_v49, 1  ;;  %vm5023_vm13 = vcmp.eq.s32.totalorder %v7361_v49, 2 }
 0x141   : > { %v7335_v19 = vsel %vm954_vm5, %v4548_v0, %v4550_v10  ;;  %v7371_v62 = vsub.s32 %v1151_v51, %v7361_v49  ;;  %vm5031_vm14 = vcmp.eq.s32.totalorder %v7361_v49, 3 }
 0x142   : > { %8769 = vst [vmem:[#allocation5_spill] sm:$0xff] %v7366_v46 }
 0x143   : > { %8770 = vst [vmem:[#allocation6_spill] sm:$0xff] %v7371_v62 }
 0x147   : > { %1031 = vxpose.xlu1.c.b16.start.end [1/1] (short) (narrow) %v978_v55, 64 }
 0x186   : > { %v991_v36 = vpop.trf.xlu0 }
 0x187   : > { %v1051_v44 = vshrl.u32 %v991_v36, 16 }
 0x18a   : > { %v7338_v38 = vpop.trf.xlu0 }
 0x18e   : > { %v7340_v56 = vpop.trf.xlu0 }
 0x192   : > { %v994_v22 = vpop.trf.xlu0 }
 0x193   : > { %v1105_v25 = vshrl.u32 %v994_v22, 16 }
 0x196   : > { %v1007_v5 = vpop.trf.xlu0 }
 0x197   : > { %v1052_v45 = vshrl.u32 %v1007_v5, 16  ;;  %v1049_v47 = vpack.i.b16 %v1007_v5, %v991_v36 }
 0x199   : > { %v1053_v58 = vpack.i.b16 %v1052_v45, %v1051_v44  ;;  %v1124_v59 = vrot.slane %v1049_v47, %v7366_v46  ;;  %v1117_v15 = vcombine.high %v1049_v47, %v7350_v27 }
 0x19a   : > { %v7342_v23 = vpop.trf.xlu0 }
 0x19b   : > { %v1190_v1 = vrot.slane %v1053_v58, %v7366_v46  ;;  %v1071_v28 = vpack.i.b16 %v7342_v23, %v7338_v38  ;;  %v7400_v14 = vrot.slane %v1117_v15, %v7366_v46 }
 0x19c   : > { %v1023_v24 = vpop.trf.xlu1 }
 0x19d   : > { %v1059_v53 = vshrl.u32 %v1023_v24, 16  ;;  %v1256_v47 = vrot.slane %v1071_v28, %v7366_v46 }
 0x19e   : > { %v7344_v54 = vpop.trf.xlu0 }
 0x1a0   : > { %v7346_v63 = vpop.trf.xlu1 }
 0x1a1   : > { %v1081_v32 = vshrl.u32 %v7346_v63, 16 }
 0x1a2   : > { %v1010_v34 = vpop.trf.xlu0 }
 0x1a3   : > { %v7352_v29 = vpack.i.b16 %v1010_v34, %v994_v22  ;;  %v1106_v30 = vshrl.u32 %v1010_v34, 16  ;;  %v1074_v34 = vshrl.u32 %v7342_v23, 16 }
 0x1a4   : > { %v7354_v31 = vpop.trf.xlu1 }
 0x1a5   : > { %v7356_v35 = vpack.i.b16 %v1106_v30, %v1105_v25  ;;  %v1513_v48 = vcombine.high %v7352_v29, %v7350_v27  ;;  %v1183_v25 = vcombine.high %v1053_v58, %v7350_v27 }
 0x1a7   : > { %v1579_v17 = vcombine.high %v7356_v35, %v7350_v27  ;;  %v7414_v45 = vrot.slane %v1183_v25, %v7366_v46 }
 0x1a8   : > { %v1026_v42 = vpop.trf.xlu1 }
 0x1a9   : > { %v1113_v16 = vshrl.u32 %v1026_v42, 16  ;;  %v7470_v15 = vrot.slane %v1579_v17, %v7366_v46  ;;  %v1249_v17 = vcombine.high %v1071_v28, %v7350_v27 }
 0x1ac   : > { %v1039_v52 = vpop.trf.xlu1 }
 0x1ad   : > { %v1057_v21 = vpack.i.b16 %v1039_v52, %v1023_v24  ;;  %v1060_v39 = vshrl.u32 %v1039_v52, 16  ;;  %v1073_v24 = vshrl.u32 %v7338_v38, 16 }
 0x1af   : > { %v1061_v60 = vpack.i.b16 %v1060_v39, %v1059_v53  ;;  %v1139_v61 = vrot.slane %v1057_v21, %v7366_v46  ;;  %v1132_v11 = vcombine.high %v1057_v21, %v7350_v27  ;;  %v7411_v23 = vpack.i.b16 %v1074_v34, %v1073_v24 }
 0x1b0   : > { %v1040_v50 = vpop.trf.xlu1  ;;  %v7426_v39 = vrot.slane %v7352_v29, %v7366_v46  ;;  %v1263_v34 = vrot.slane %v1249_v17, %v7366_v46 }
 0x1b1   : > { %v1147_v41 = vcombine.low %v1124_v59, %v1139_v61  ;;  %v1205_v3 = vrot.slane %v1061_v60, %v7366_v46  ;;  %v1148_v6 = vcombine.high %v1124_v59, %v1139_v61  ;;  %v1198_v0 = vcombine.high %v1061_v60, %v7350_v27 }
 0x1b2   : > { %v7384_v18 = vpack.i.b16 %v1040_v50, %v7346_v63  ;;  %v1082_v2 = vshrl.u32 %v1040_v50, 16  ;;  %v7390_v5 = vrot.slane %v1132_v11, %v7366_v46  ;;  %v1322_v60 = vrot.slane %v7411_v23, %v7366_v46 }
 0x1b3   : > { %v1155_v4 = vrot.slane %v1147_v41, %v7371_v62  ;;  %v1213_v7 = vcombine.low %v1190_v1, %v1205_v3  ;;  %v1214_v10 = vcombine.high %v1190_v1, %v1205_v3  ;;  %v1162_v12 = vrot.slane %v1148_v6, %v7371_v62 }
 0x1b4   : > { %v7376_v8 = vpop.trf.xlu1  ;;  %v1083_v37 = vpack.i.b16 %v1082_v2, %v1081_v32  ;;  %v1271_v44 = vrot.slane %v7384_v18, %v7366_v46  ;;  %v1163_v38 = vcombine.low %v7400_v14, %v7390_v5  ;;  %v7438_v50 = vrot.slane %v7356_v35, %v7366_v46 }
 0x1b5   : > { %1645 = vxpose.xlu0.c.b16.start.end [1/1] (short) (narrow) %v1155_v4, 16  ;;  %v1221_v9 = vrot.slane %v1213_v7, %v7371_v62  ;;  %v1228_v20 = vrot.slane %v1214_v10, %v7371_v62  ;;  %v1179_v22 = vcombine.high %v1155_v4, %v7040_v26  ;;  %v1180_v63 = vcombine.high %v1162_v12, %v7040_v26 }
 0x1b6   : > { %v1337_v21 = vrot.slane %v1083_v37, %v7366_v46  ;;  %v7429_v58 = vrot.slane %v1163_v38, %v7371_v62  ;;  %v1279_v59 = vcombine.low %v1256_v47, %v1271_v44  ;;  %v1280_v7 = vcombine.high %v1256_v47, %v1271_v44 }
 0x1b7   : > { %1661 = vxpose.xlu1.c.b16.start.end [1/1] (short) (narrow) %v1221_v9, 16  ;;  %v1245_v40 = vcombine.high %v1221_v9, %v7040_v26  ;;  %v1246_v52 = vcombine.high %v1228_v20, %v7040_v26  ;;  %v1315_v25 = vcombine.high %v7411_v23, %v7350_v27  ;;  %v1098_v32 = vshrl.u32 %v7376_v8, 16 }
 0x1b8   : > { %v1042_v13 = vpop.trf.xlu1  ;;  %v1345_v1 = vcombine.low %v1322_v60, %v1337_v21  ;;  %v1287_v6 = vrot.slane %v1279_v59, %v7371_v62  ;;  %v1090_v38 = vshrl.u32 %v7344_v54, 16  ;;  %v1097_v23 = vshrl.u32 %v7354_v31, 16 }
 0x1b9   : > { %v1111_v43 = vpack.i.b16 %v1042_v13, %v1026_v42  ;;  %v1114_v57 = vshrl.u32 %v1042_v13, 16  ;;  %1709 = vxpose.xlu0.c.b16.start.end [1/1] (short) (narrow) %v1162_v12, 16  ;;  %v7404_v42 = vrot.slane %v1198_v0, %v7366_v46  ;;  %v7464_v13 = vrot.slane %v1513_v48, %v7366_v46 }
 0x1ba   : > { %v1294_v0 = vrot.slane %v1280_v7, %v7371_v62  ;;  %v1329_v47 = vrot.slane %v1315_v25, %v7366_v46 }
 0x1bb   : > { %v1115_v55 = vpack.i.b16 %v1114_v57, %v1113_v16  ;;  %v1528_v36 = vcombine.high %v1111_v43, %v7350_v27  ;;  %1725 = vxpose.xlu1.c.b16.start.end [1/1] (short) (narrow) %v1228_v20, 16  ;;  %v7418_v51 = vrot.slane %v1111_v43, %v7366_v46  ;;  %v1229_v53 = vcombine.low %v7414_v45, %v7404_v42 }
 0x1bc   : > { %v1353_v16 = vrot.slane %v1345_v1, %v7371_v62  ;;  %v1346_v43 = vcombine.high %v1322_v60, %v1337_v21  ;;  %v1264_v57 = vcombine.high %v7384_v18, %v7350_v27  ;;  %v1330_v18 = vcombine.high %v1083_v37, %v7350_v27 }
 0x1bd   : > { %v1594_v30 = vcombine.high %v1115_v55, %v7350_v27  ;;  %1677 = vxpose.xlu0.c.b16.start.end [1/1] (short) (narrow) %v1179_v22, 16  ;;  %v1543_v61 = vcombine.low %v7426_v39, %v7418_v51  ;;  %v7441_v41 = vrot.slane %v1229_v53, %v7371_v62  ;;  %v7444_v3 = vrot.slane %v1115_v55, %v7366_v46 }
 0x1be   : > { %v1544_v4 = vcombine.high %v7426_v39, %v7418_v51  ;;  %v7450_v9 = vrot.slane %v1528_v36, %v7366_v46  ;;  %v1360_v20 = vrot.slane %v1346_v43, %v7371_v62  ;;  %v1164_v55 = vcombine.high %v7400_v14, %v7390_v5 }
 0x1bf   : > { %1693 = vxpose.xlu1.c.b16.start.end [1/1] (short) (narrow) %v1245_v40, 16  ;;  %v7453_v10 = vrot.slane %v1594_v30, %v7366_v46  ;;  %v1609_v11 = vcombine.low %v7438_v50, %v7444_v3  ;;  %v1610_v12 = vcombine.high %v7438_v50, %v7444_v3  ;;  %v1230_v36 = vcombine.high %v7414_v45, %v7404_v42  ;;  %v6935_v42 = vld [vmem:[%s8751_s6 + $0x80] sm:$0xff]   ;;  %v6932_v45 = vld [vmem:[%s8751_s6 + $0x48] sm:$0xff]  }
 0x1c0   : > { %v1559_v2 = vcombine.low %v7464_v13, %v7450_v9  ;;  %v1560_v35 = vcombine.high %v7464_v13, %v7450_v9  ;;  %v1311_v22 = vcombine.high %v1287_v6, %v7040_v26  ;;  %v1278_v24 = vrot.slane %v1264_v57, %v7366_v46 }
 0x1c1   : > { %1741 = vxpose.xlu0.c.b16.start.end [1/1] (short) (narrow) %v1180_v63, 16  ;;  %v1625_v29 = vcombine.low %v7470_v15, %v7453_v10  ;;  %v1626_v48 = vcombine.high %v7470_v15, %v7453_v10  ;;  %v1377_v28 = vcombine.high %v1353_v16, %v7040_v26  ;;  %v1344_v30 = vrot.slane %v1330_v18, %v7366_v46 }
 0x1c2   : > { %v1095_v37 = vpack.i.b16 %v7376_v8, %v7354_v31  ;;  %v1312_v40 = vcombine.high %v1294_v0, %v7040_v26  ;;  %v1295_v44 = vcombine.low %v1263_v34, %v1278_v24  ;;  %v1089_v63 = vshrl.u32 %v7340_v56, 16 }
 0x1c3   : > { %1757 = vxpose.xlu1.c.b16.start.end [1/1] (short) (narrow) %v1246_v52, 16  ;;  %v1087_v52 = vpack.i.b16 %v7344_v54, %v7340_v56  ;;  %v1099_v53 = vpack.i.b16 %v1098_v32, %v1097_v23  ;;  %v1378_v21 = vcombine.high %v1360_v20, %v7040_v26  ;;  %v1361_v8 = vcombine.low %v1329_v47, %v1344_v30 }
 0x1c4   : > { %v1303_v59 = vrot.slane %v1295_v44, %v7371_v62  ;;  %v1296_v60 = vcombine.high %v1263_v34, %v1278_v24  ;;  %v1403_v1 = vrot.slane %v1095_v37, %v7366_v46 }
 0x1c5   : > { %1773 = vxpose.xlu0.c.b16.start.end [1/1] (short) (narrow) %v7429_v58, 16  ;;  %v1388_v31 = vrot.slane %v1087_v52, %v7366_v46  ;;  %v1369_v7 = vrot.slane %v1361_v8, %v7371_v62  ;;  %v1469_v56 = vrot.slane %v1099_v53, %v7366_v46  ;;  %v1381_v44 = vcombine.high %v1087_v52, %v7350_v27 }
 0x1c6   : > { %v1310_v54 = vrot.slane %v1296_v60, %v7371_v62  ;;  %v1313_v32 = vcombine.high %v1303_v59, %v7040_v26 }
 0x1c7   : > { %1789 = vxpose.xlu1.c.b16.start.end [1/1] (short) (narrow) %v7441_v41, 16  ;;  %v1411_v43 = vcombine.low %v1388_v31, %v1403_v1 }
 0x1c9   : > { %1901 = vxpose.xlu0.c.b16.start.end [1/1] (short) (narrow) %v1287_v6, 16  ;;  %v1091_v6 = vpack.i.b16 %v1090_v38, %v1089_v63  ;;  %v1419_v18 = vrot.slane %v1411_v43, %v7371_v62  ;;  %v1462_v38 = vcombine.high %v1099_v53, %v7350_v27  ;;  %v1551_v43 = vrot.slane %v1543_v61, %v7371_v62 }
 0x1cb   : > { %1917 = vxpose.xlu1.c.b16.start.end [1/1] (short) (narrow) %v1353_v16, 16  ;;  %v1362_v16 = vcombine.high %v1329_v47, %v1344_v30  ;;  %v1454_v57 = vrot.slane %v1091_v6, %v7366_v46  ;;  %v1396_v30 = vcombine.high %v1095_v37, %v7350_v27  ;;  %v1443_v23 = vcombine.high %v1419_v18, %v7040_v26 }
 0x1cc   : > { %v1395_v37 = vrot.slane %v1381_v44, %v7366_v46  ;;  %v1575_v39 = vcombine.high %v1551_v43, %v7040_v26 }
 0x1cd   : > { %1965 = vxpose.xlu0.c.b16.start.end [1/1] (short) (narrow) %v1294_v0, 16  ;;  %v1376_v0 = vrot.slane %v1362_v16, %v7371_v62  ;;  %v1477_v17 = vcombine.low %v1454_v57, %v1469_v56  ;;  %v1478_v24 = vcombine.high %v1454_v57, %v1469_v56  ;;  %v1410_v47 = vrot.slane %v1396_v30, %v7366_v46 }
 0x1ce   : > { %v1617_v57 = vrot.slane %v1609_v11, %v7371_v62 }
 0x1cf   : > { %1981 = vxpose.xlu1.c.b16.start.end [1/1] (short) (narrow) %v1360_v20, 16  ;;  %v1412_v20 = vcombine.high %v1388_v31, %v1403_v1  ;;  %v1492_v34 = vrot.slane %v1478_v24, %v7371_v62  ;;  %v1380_v63 = vcombine.high %v1376_v0, %v7040_v26  ;;  %v1427_v60 = vcombine.low %v1395_v37, %v1410_v47 }
 0x1d0   : > { %v1633_v24 = vrot.slane %v1625_v29, %v7371_v62 }
 0x1d1   : > { %1933 = vxpose.xlu0.c.b16.start.end [1/1] (short) (narrow) %v1311_v22, 16  ;;  %v1485_v22 = vrot.slane %v1477_v17, %v7371_v62  ;;  %v1426_v25 = vrot.slane %v1412_v20, %v7371_v62  ;;  %v1510_v1 = vcombine.high %v1492_v34, %v7040_v26  ;;  %v1624_v17 = vrot.slane %v1610_v12, %v7371_v62 }
 0x1d2   : > { %v1567_v20 = vrot.slane %v1559_v2, %v7371_v62  ;;  %v1640_v2 = vrot.slane %v1626_v48, %v7371_v62 }
 0x1d3   : > { %1949 = vxpose.xlu1.c.b16.start.end [1/1] (short) (narrow) %v1377_v28, 16  ;;  %v1379_v28 = vcombine.high %v1369_v7, %v7040_v26  ;;  %v1509_v8 = vcombine.high %v1485_v22, %v7040_v26  ;;  %v1444_v52 = vcombine.high %v1426_v25, %v7040_v26  ;;  %v1642_v3 = vcombine.high %v1624_v17, %v7040_v26 }
 0x1d4   : > { %v1577_v44 = vcombine.high %v1567_v20, %v7040_v26  ;;  %v1644_v48 = vcombine.high %v1640_v2, %v7040_v26 }
 0x1d5   : > { %1997 = vxpose.xlu0.c.b16.start.end [1/1] (short) (narrow) %v1312_v40, 16  ;;  %v1314_v40 = vcombine.high %v1310_v54, %v7040_v26 }
 0x1d7   : > { %2013 = vxpose.xlu1.c.b16.start.end [1/1] (short) (narrow) %v1378_v21, 16  ;;  %v1447_v21 = vcombine.high %v1091_v6, %v7350_v27  ;;  %v1428_v27 = vcombine.high %v1395_v37, %v1410_v47 }
 0x1d9   : > { %2029 = vxpose.xlu0.c.b16.start.end [1/1] (short) (narrow) %v1303_v59, 16  ;;  %v1476_v59 = vrot.slane %v1462_v38, %v7366_v46  ;;  %v1461_v53 = vrot.slane %v1447_v21, %v7366_v46  ;;  %v1442_v56 = vrot.slane %v1428_v27, %v7371_v62  ;;  %v1181_v21 = vcombine.high %v7429_v58, %v7040_v26 }
 0x1db   : > { %2045 = vxpose.xlu1.c.b16.start.end [1/1] (short) (narrow) %v1369_v7, 16  ;;  %v1493_v31 = vcombine.low %v1461_v53, %v1476_v59  ;;  %v1435_v7 = vrot.slane %v1427_v60, %v7371_v62  ;;  %v1494_v16 = vcombine.high %v1461_v53, %v1476_v59  ;;  %v1446_v11 = vcombine.high %v1442_v56, %v7040_v26 }
 0x1dc   : > { %v1247_v53 = vcombine.high %v7441_v41, %v7040_v26  ;;  %v1244_v41 = vrot.slane %v1230_v36, %v7371_v62 }
 0x1dd   : > { %2093 = vxpose.xlu0.c.b16.start.end [1/1] (short) (narrow) %v1310_v54, 16  ;;  %v1501_v6 = vrot.slane %v1493_v31, %v7371_v62  ;;  %v1508_v54 = vrot.slane %v1494_v16, %v7371_v62  ;;  %v1445_v61 = vcombine.high %v1435_v7, %v7040_v26 }
 0x1de   : > { %v1248_v14 = vcombine.high %v1244_v41, %v7040_v26 }
 0x1df   : > { %2109 = vxpose.xlu1.c.b16.start.end [1/1] (short) (narrow) %v1376_v0, 16  ;;  %v1558_v0 = vrot.slane %v1544_v4, %v7371_v62  ;;  %v1512_v51 = vcombine.high %v1508_v54, %v7040_v26  ;;  %v1641_v4 = vcombine.high %v1617_v57, %v7040_v26 }
 0x1e1   : > { %2157 = vxpose.xlu0.c.b16.start.end [1/1] (short) (narrow) %v1419_v18, 16  ;;  %v1511_v18 = vcombine.high %v1501_v6, %v7040_v26  ;;  %v1576_v50 = vcombine.high %v1558_v0, %v7040_v26 }
 0x1e3   : > { %2173 = vxpose.xlu1.c.b16.start.end [1/1] (short) (narrow) %v1485_v22, 16 }
 0x1e5   : > { %2221 = vxpose.xlu0.c.b16.start.end [1/1] (short) (narrow) %v1426_v25, 16 }
 0x1e7   : > { %2237 = vxpose.xlu1.c.b16.start.end [1/1] (short) (narrow) %v1492_v34, 16  ;;  %v1574_v34 = vrot.slane %v1560_v35, %v7371_v62 }
 0x1e9   : > { %2061 = vxpose.xlu0.c.b16.start.end [1/1] (short) (narrow) %v1313_v32, 16  ;;  %v1578_v13 = vcombine.high %v1574_v34, %v7040_v26 }
 0x1eb   : > { %2077 = vxpose.xlu1.c.b16.start.end [1/1] (short) (narrow) %v1379_v28, 16 }
 0x1ed   : > { %2125 = vxpose.xlu0.c.b16.start.end [1/1] (short) (narrow) %v1314_v40, 16 }
 0x1ef   : > { %2141 = vxpose.xlu1.c.b16.start.end [1/1] (short) (narrow) %v1380_v63, 16  ;;  %v1643_v63 = vcombine.high %v1633_v24, %v7040_v26 }
 0x1f1   : > { %2189 = vxpose.xlu0.c.b16.start.end [1/1] (short) (narrow) %v1443_v23, 16 }
 0x1f3   : > { %2205 = vxpose.xlu1.c.b16.start.end [1/1] (short) (narrow) %v1509_v8, 16 }
 0x1f5   : > { %2253 = vxpose.xlu0.c.b16.start.end [1/1] (short) (narrow) %v1444_v52, 16 }
 0x1f7   : > { %2269 = vxpose.xlu1.c.b16.start.end [1/1] (short) (narrow) %v1510_v1, 16 }
 0x1f9   : > { %2285 = vxpose.xlu0.c.b16.start.end [1/1] (short) (narrow) %v1435_v7, 16  ;;  %v1178_v7 = vrot.slane %v1164_v55, %v7371_v62 }
 0x1fb   : > { %2301 = vxpose.xlu1.c.b16.start.end [1/1] (short) (narrow) %v1501_v6, 16  ;;  %v1182_v16 = vcombine.high %v1178_v7, %v7040_v26  ;;  %v6933_v26 = vld [vmem:[%s8751_s6 + $0x50] sm:$0xff]  }
 0x1fd   : > { %2349 = vxpose.xlu0.c.b16.start.end [1/1] (short) (narrow) %v1442_v56, 16 }
 0x1ff   : > { %2365 = vxpose.xlu1.c.b16.start.end [1/1] (short) (narrow) %v1508_v54, 16  ;;  %v6931_v54 = vld [vmem:[%s8751_s6 + $0x40] sm:$0xff]  }
 0x201   : > { %2413 = vxpose.xlu0.c.b16.start.end [1/1] (short) (narrow) %v1551_v43, 16 }
 0x203   : > { %2429 = vxpose.xlu1.c.b16.start.end [1/1] (short) (narrow) %v1617_v57, 16  ;;  %v6937_v57 = vld [vmem:[%s8751_s6 + $0x88] sm:$0xff]  }
 0x205   : > { %2477 = vxpose.xlu0.c.b16.start.end [1/1] (short) (narrow) %v1558_v0, 16 }
 0x207   : > { %2493 = vxpose.xlu1.c.b16.start.end [1/1] (short) (narrow) %v1624_v17, 16 }
 0x209   : > { %2317 = vxpose.xlu0.c.b16.start.end [1/1] (short) (narrow) %v1445_v61, 16  ;;  %v6939_v61 = vld [vmem:[%s8751_s6 + $0x90] sm:$0xff]  }
 0x20b   : > { %2333 = vxpose.xlu1.c.b16.start.end [1/1] (short) (narrow) %v1511_v18, 16  ;;  %v6934_v18 = vld [vmem:[%s8751_s6 + $0x58] sm:$0xff]  }
 0x20d   : > { %2381 = vxpose.xlu0.c.b16.start.end [1/1] (short) (narrow) %v1446_v11, 16 }
 0x20f   : > { %2397 = vxpose.xlu1.c.b16.start.end [1/1] (short) (narrow) %v1512_v51, 16 }
 0x211   : > { %2445 = vxpose.xlu0.c.b16.start.end [1/1] (short) (narrow) %v1575_v39, 16  ;;  %v6941_v39 = vld [vmem:[%s8751_s6 + $0x98] sm:$0xff]  }
 0x213   : > { %2461 = vxpose.xlu1.c.b16.start.end [1/1] (short) (narrow) %v1641_v4, 16 }
 0x215   : > { %2509 = vxpose.xlu0.c.b16.start.end [1/1] (short) (narrow) %v1576_v50, 16 }
 0x217   : > { %v1653_v12 = vpop.trf.xlu0  ;;  %2525 = vxpose.xlu1.c.b16.start.end [1/1] (short) (narrow) %v1642_v3, 16 }
 0x219   : > { %2541 = vxpose.xlu0.c.b16.start.end [1/1] (short) (narrow) %v1567_v20, 16  ;;  %v1669_v22 = vpop.trf.xlu1 }
 0x21b   : > { %v1717_v25 = vpop.trf.xlu0  ;;  %2557 = vxpose.xlu1.c.b16.start.end [1/1] (short) (narrow) %v1633_v24, 16 }
 0x21c   : > { %v2669_v32 = vcombine.low %v1653_v12, %v1717_v25 }
 0x21d   : > { %2605 = vxpose.xlu0.c.b16.start.end [1/1] (short) (narrow) %v1574_v34, 16  ;;  %v1733_v28 = vpop.trf.xlu1 }
 0x21e   : > { %v2736_v30 = vcombine.low %v1669_v22, %v1733_v28  ;;  %v7585_v38 = vrot.slane %v2669_v32, %v7366_v46 }
 0x21f   : > { %v1685_v40 = vpop.trf.xlu0  ;;  %2621 = vxpose.xlu1.c.b16.start.end [1/1] (short) (narrow) %v1640_v2, 16  ;;  %v6936_v2 = vld [vmem:[%s8751_s6] sm:$0xff]  }
 0x220   : > { %v7600_v59 = vrot.slane %v2736_v30, %v7366_v46 }
 0x221   : > { %2573 = vxpose.xlu0.c.b16.start.end [1/1] (short) (narrow) %v1577_v44, 16  ;;  %v1701_v29 = vpop.trf.xlu1 }
 0x223   : > { %v1749_v9 = vpop.trf.xlu0  ;;  %2589 = vxpose.xlu1.c.b16.start.end [1/1] (short) (narrow) %v1643_v63, 16 }
 0x224   : > { %v2677_v35 = vcombine.low %v1685_v40, %v1749_v9 }
 0x225   : > { %2637 = vxpose.xlu0.c.b16.start.end [1/1] (short) (narrow) %v1578_v13, 16  ;;  %v1765_v15 = vpop.trf.xlu1  ;;  %v6943_v13 = vld [vmem:[%s8751_s6 + $0x20] sm:$0xff]  }
 0x226   : > { %v7588_v10 = vrot.slane %v2677_v35, %v7366_v46  ;;  %v2744_v23 = vcombine.low %v1701_v29, %v1765_v15 }
 0x227   : > { %v7591_v47 = vpop.trf.xlu0  ;;  %2653 = vxpose.xlu1.c.b16.start.end [1/1] (short) (narrow) %v1644_v48, 16 }
 0x228   : > { %v2701_v37 = vcombine.low %v7585_v38, %v7588_v10  ;;  %v2702_v8 = vcombine.high %v7585_v38, %v7588_v10  ;;  %v7603_v52 = vrot.slane %v2744_v23, %v7366_v46 }
 0x229   : > { %1805 = vxpose.xlu0.c.b16.start.end [1/1] (short) (narrow) %v1181_v21, 16  ;;  %v7605_v60 = vpop.trf.xlu1 }
 0x22a   : > { %v2768_v58 = vcombine.low %v7600_v59, %v7603_v52  ;;  %v2769_v1 = vcombine.high %v7600_v59, %v7603_v52 }
 0x22b   : > { %v1909_v31 = vpop.trf.xlu0  ;;  %1821 = vxpose.xlu1.c.b16.start.end [1/1] (short) (narrow) %v1247_v53, 16  ;;  %v6938_v53 = vld [vmem:[%s8751_s6 + $0x8] sm:$0xff]  }
 0x22d   : > { %1837 = vxpose.xlu0.c.b16.start.end [1/1] (short) (narrow) %v1178_v7, 16  ;;  %v1925_v27 = vpop.trf.xlu1 }
 0x22f   : > { %v1973_v6 = vpop.trf.xlu0  ;;  %1853 = vxpose.xlu1.c.b16.start.end [1/1] (short) (narrow) %v1244_v41, 16 }
 0x230   : > { %v2803_v56 = vcombine.low %v1909_v31, %v1973_v6 }
 0x231   : > { %1869 = vxpose.xlu0.c.b16.start.end [1/1] (short) (narrow) %v1182_v16, 16  ;;  %v1989_v5 = vpop.trf.xlu1 }
 0x232   : > { %v2870_v30 = vcombine.low %v1925_v27, %v1989_v5  ;;  %v2810_v44 = vrot.slane %v2803_v56, %v7366_v46 }
 0x233   : > { %v1941_v55 = vpop.trf.xlu0  ;;  %1885 = vxpose.xlu1.c.b16.start.end [1/1] (short) (narrow) %v1248_v14, 16  ;;  %v6944_v14 = vld [vmem:[%s8751_s6 + $0x28] sm:$0xff]  }
 0x234   : > { %v2877_v31 = vrot.slane %v2870_v30, %v7366_v46 }
 0x235   : > { %3647 = vxpose.xlu0.c.b16.start [1/4] (short) %v6931_v54, 128  ;;  %v1957_v36 = vpop.trf.xlu1 }
 0x237   : > { %v2005_v43 = vpop.trf.xlu0  ;;  %3969 = vxpose.xlu1.c.b16.start [1/4] (short) %v6935_v42, 128 }
 0x238   : > { %v2811_v20 = vcombine.low %v1941_v55, %v2005_v43 }
 0x239   : > { %3648 = vxpose.xlu0.c.b16.cont [2/4] (short) %v6932_v45, 128  ;;  %v2021_v0 = vpop.trf.xlu1 }
 0x23a   : > { %v2878_v25 = vcombine.low %v1957_v36, %v2021_v0  ;;  %v2818_v34 = vrot.slane %v2811_v20, %v7366_v46 }
 0x23b   : > { %v2037_v17 = vpop.trf.xlu0  ;;  %3970 = vxpose.xlu1.c.b16.cont [2/4] (short) %v6937_v57, 128  ;;  %v6940_v57 = vld [vmem:[%s8751_s6 + $0x10] sm:$0xff]  }
 0x23c   : > { %v2885_v63 = vrot.slane %v2878_v25, %v7366_v46  ;;  %v2835_v35 = vcombine.low %v2810_v44, %v2818_v34  ;;  %v2836_v15 = vcombine.high %v2810_v44, %v2818_v34  ;;  %v6942_v34 = vld [vmem:[%s8751_s6 + $0x18] sm:$0xff]  }
 0x23d   : > { %3649 = vxpose.xlu0.c.b16.cont [3/4] (short) %v6933_v26, 128  ;;  %v2053_v11 = vpop.trf.xlu1 }
 0x23e   : > { %v2902_v16 = vcombine.low %v2877_v31, %v2885_v63  ;;  %v2903_v56 = vcombine.high %v2877_v31, %v2885_v63  ;;  %v2843_v55 = vrot.slane %v2835_v35, %v7371_v62  ;;  %v2850_v42 = vrot.slane %v2836_v15, %v7371_v62 }
 0x23f   : > { %v2101_v51 = vpop.trf.xlu0  ;;  %3971 = vxpose.xlu1.c.b16.cont [3/4] (short) %v6939_v61, 128 }
 0x240   : > { %v2819_v32 = vcombine.low %v2037_v17, %v2101_v51  ;;  %v2910_v51 = vrot.slane %v2902_v16, %v7371_v62 }
 0x241   : > { %3650 = vxpose.xlu0.c.b16.end [4/4] (short) %v6934_v18, 128  ;;  %v2117_v4 = vpop.trf.xlu1 }
 0x242   : > { %v2886_v9 = vcombine.low %v2053_v11, %v2117_v4  ;;  %v2826_v48 = vrot.slane %v2819_v32, %v7366_v46 }
 0x243   : > { %v7647_v50 = vpop.trf.xlu0  ;;  %3972 = vxpose.xlu1.c.b16.end [4/4] (short) %v6941_v39, 128  ;;  %v2917_v39 = vrot.slane %v2903_v56, %v7371_v62 }
 0x244   : > { %v2893_v54 = vrot.slane %v2886_v9, %v7366_v46 }
 0x245   : > { %v7649_v3 = vpop.trf.xlu1 }
 0x247   : > { %v7651_v12 = vpop.trf.xlu0 }
 0x249   : > { %v7653_v22 = vpop.trf.xlu1 }
 0x24b   : > { %v2069_v24 = vpop.trf.xlu0 }
 0x24d   : > { %v2085_v28 = vpop.trf.xlu1 }
 0x24f   : > { %v2133_v40 = vpop.trf.xlu0 }
 0x250   : > { %v2827_v29 = vcombine.low %v2069_v24, %v2133_v40  ;;  %v6945_v24 = vld [vmem:[%s8751_s6 + $0x30] sm:$0xff]   ;;  %v6946_v40 = vld [vmem:[%s8751_s6 + $0x38] sm:$0xff]  }
 0x251   : > { %v2149_v21 = vpop.trf.xlu1 }
 0x252   : > { %v2834_v23 = vrot.slane %v2827_v29, %v7366_v46  ;;  %3325 = vxpose.xlu0.c.b16.start [1/4] (short) %v6936_v2, 128  ;;  %v2894_v7 = vcombine.low %v2085_v28, %v2149_v21 }
 0x253   : > { %v7670_v27 = vpop.trf.xlu0 }
 0x254   : > { %v2851_v41 = vcombine.low %v2826_v48, %v2834_v23  ;;  %v2852_v6 = vcombine.high %v2826_v48, %v2834_v23  ;;  %v2901_v5 = vrot.slane %v2894_v7, %v7366_v46  ;;  %3486 = vxpose.xlu1.c.b16.start [1/4] (short) %v6943_v13, 128 }
 0x255   : > { %v2213_v43 = vpop.trf.xlu1 }
 0x256   : > { %v2859_v45 = vrot.slane %v2851_v41, %v7371_v62  ;;  %v2866_v36 = vrot.slane %v2852_v6, %v7371_v62  ;;  %3326 = vxpose.xlu0.c.b16.cont [2/4] (short) %v6938_v53, 128  ;;  %v2918_v26 = vcombine.low %v2893_v54, %v2901_v5  ;;  %v2919_v0 = vcombine.high %v2893_v54, %v2901_v5 }
 0x257   : > { %v2261_v17 = vpop.trf.xlu0 }
 0x258   : > { %v2867_v61 = vcombine.low %v2843_v55, %v2859_v45  ;;  %v2868_v18 = vcombine.high %v2843_v55, %v2859_v45  ;;  %v2869_v11 = vcombine.low %v2850_v42, %v2866_v36  ;;  %v2926_v4 = vrot.slane %v2918_v26, %v7371_v62  ;;  %3487 = vxpose.xlu1.c.b16.cont [2/4] (short) %v6944_v14, 128  ;;  %v6947_v55 = vld [vmem:[%s8751_s6 + $0x60] sm:$0xff]  }
 0x259   : > { %v2933_v20 = vrot.slane %v2919_v0, %v7371_v62  ;;  %v2277_v25 = vpop.trf.xlu1  ;;  %v2945_v42 = vcombine.low %v7670_v27, %v2261_v17  ;;  %v2937_v36 = vcombine.low %v7647_v50, %v7651_v12  ;;  %v3004_v0 = vcombine.low %v7649_v3, %v7653_v22 }
 0x25a   : > { %3327 = vxpose.xlu0.c.b16.cont [3/4] (short) %v6940_v57, 128  ;;  %v2934_v28 = vcombine.low %v2910_v51, %v2926_v4  ;;  %v2935_v2 = vcombine.high %v2910_v51, %v2926_v4  ;;  %v3233_v13 = vshrl.u32 %v2867_v61, 16  ;;  %v3241_v15 = vshrl.u32 %v2868_v18, 16 }
 0x25b   : > { %v2293_v32 = vpop.trf.xlu0  ;;  %v2936_v30 = vcombine.low %v2917_v39, %v2933_v20  ;;  %v3249_v21 = vshrl.u32 %v2869_v11, 16  ;;  %v3012_v45 = vcombine.low %v2213_v43, %v2277_v25  ;;  %v2944_v17 = vrot.slane %v2937_v36, %v7366_v46  ;;  %v6949_v20 = vld [vmem:[%s8751_s6 + $0x70] sm:$0xff]  }
 0x25c   : > { %3488 = vxpose.xlu1.c.b16.cont [3/4] (short) %v6945_v24, 128  ;;  %v7697_v44 = vpack.i.b16 %v2934_v28, %v2867_v61  ;;  %v7699_v29 = vpack.i.b16 %v2935_v2, %v2868_v18  ;;  %v3234_v35 = vshrl.u32 %v2934_v28, 16  ;;  %v3242_v48 = vshrl.u32 %v2935_v2, 16  ;;  %v6948_v18 = vld [vmem:[%s8751_s6 + $0x68] sm:$0xff]  }
 0x25d   : > { %v7701_v63 = vpack.i.b16 %v2936_v30, %v2869_v11  ;;  %v2309_v9 = vpop.trf.xlu1  ;;  %v3250_v53 = vshrl.u32 %v2936_v30, 16  ;;  %v2952_v11 = vrot.slane %v2945_v42, %v7366_v46  ;;  %v3019_v27 = vrot.slane %v3012_v45, %v7366_v46 }
 0x25e   : > { %3328 = vxpose.xlu0.c.b16.end [4/4] (short) %v6942_v34, 128  ;;  %v7703_v31 = vpack.i.b16 %v3234_v35, %v3233_v13  ;;  %v7705_v7 = vpack.i.b16 %v3242_v48, %v3241_v15  ;;  %v3011_v3 = vrot.slane %v3004_v0, %v7366_v46 }
 0x25f   : > { %v2357_v23 = vpop.trf.xlu0  ;;  %v7707_v41 = vpack.i.b16 %v3250_v53, %v3249_v21  ;;  %v2969_v24 = vcombine.low %v2944_v17, %v2952_v11  ;;  %v2970_v25 = vcombine.high %v2944_v17, %v2952_v11  ;;  %v6950_v21 = vld [vmem:[%s8751_s6 + $0x78] sm:$0xff]  }
 0x260   : > { %3489 = vxpose.xlu1.c.b16.end [4/4] (short) %v6946_v40, 128  ;;  %v2953_v57 = vcombine.low %v2293_v32, %v2357_v23  ;;  %v3036_v28 = vcombine.low %v3011_v3, %v3019_v27  ;;  %v3037_v2 = vcombine.high %v3011_v3, %v3019_v27 }
 0x261   : > { %v2373_v6 = vpop.trf.xlu1  ;;  %v7747_v53 = vrot.slane %v2969_v24, %v7371_v62 }
 0x262   : > { %v3020_v43 = vcombine.low %v2309_v9, %v2373_v6  ;;  %v2960_v50 = vrot.slane %v2953_v57, %v7366_v46  ;;  %v2984_v6 = vrot.slane %v2970_v25, %v7371_v62 }
 0x263   : > { %v7709_v16 = vpop.trf.xlu0 }
 0x264   : > { %v3027_v30 = vrot.slane %v3020_v43, %v7366_v46 }
 0x265   : > { %v7711_v56 = vpop.trf.xlu1 }
 0x267   : > { %v7713_v54 = vpop.trf.xlu0 }
 0x268   : > { %v3071_v25 = vcombine.low %v7709_v16, %v7713_v54 }
 0x269   : > { %v7715_v5 = vpop.trf.xlu1 }
 0x26b   : > { %v2325_v14 = vpop.trf.xlu0 }
 0x26d   : > { %v2341_v26 = vpop.trf.xlu1 }
 0x26f   : > { %v2389_v61 = vpop.trf.xlu0  ;;  %3808 = vxpose.xlu0.c.b16.start [1/4] (short) %v6947_v55, 128  ;;  %v3051_v55 = vrot.slane %v3037_v2, %v7371_v62 }
 0x270   : > { %v2961_v51 = vcombine.low %v2325_v14, %v2389_v61  ;;  %v7751_v14 = vrot.slane %v3036_v28, %v7371_v62  ;;  %v3138_v28 = vcombine.low %v7711_v56, %v7715_v5 }
 0x271   : > { %v2405_v39 = vpop.trf.xlu1 }
 0x272   : > { %v2968_v12 = vrot.slane %v2961_v51, %v7366_v46  ;;  %v3028_v22 = vcombine.low %v2341_v26, %v2405_v39  ;;  %v3145_v56 = vrot.slane %v3138_v28, %v7366_v46 }
 0x273   : > { %v2453_v4 = vpop.trf.xlu0  ;;  %3809 = vxpose.xlu0.c.b16.cont [2/4] (short) %v6948_v18, 128 }
 0x274   : > { %v2985_v34 = vcombine.low %v2960_v50, %v2968_v12  ;;  %v2986_v32 = vcombine.high %v2960_v50, %v2968_v12  ;;  %v3035_v40 = vrot.slane %v3028_v22, %v7366_v46 }
 0x275   : > { %v2469_v13 = vpop.trf.xlu1 }
 0x276   : > { %v7740_v9 = vrot.slane %v2985_v34, %v7371_v62  ;;  %v3000_v35 = vrot.slane %v2986_v32, %v7371_v62  ;;  %v3052_v15 = vcombine.low %v3027_v30, %v3035_v40  ;;  %v3053_v48 = vcombine.high %v3027_v30, %v3035_v40 }
 0x277   : > { %v2517_v23 = vpop.trf.xlu0  ;;  %3810 = vxpose.xlu0.c.b16.cont [3/4] (short) %v6949_v20, 128 }
 0x278   : > { %v7755_v42 = vrot.slane %v3052_v15, %v7371_v62  ;;  %v3067_v45 = vrot.slane %v3053_v48, %v7371_v62  ;;  %v7760_v57 = vcombine.high %v7747_v53, %v7740_v9  ;;  %v7766_v61 = vcombine.low %v2984_v6, %v3000_v35 }
 0x279   : > { %v2533_v36 = vpop.trf.xlu1  ;;  %v3079_v20 = vcombine.low %v2453_v4, %v2517_v23  ;;  %v6957_v4 = vld [vmem:[%s8751_s6 + $0xa0] sm:$0xff]  }
 0x27a   : > { %v7764_v0 = vcombine.high %v7751_v14, %v7755_v42  ;;  %v7768_v18 = vcombine.low %v3051_v55, %v3067_v45  ;;  %v3265_v51 = vshrl.u32 %v7760_v57, 16  ;;  %v3273_v17 = vshrl.u32 %v7766_v61, 16  ;;  %4130 = vxpose.xlu1.c.b16.start [1/4] (short) %v6957_v4, 128 }
 0x27b   : > { %v2549_v26 = vpop.trf.xlu0  ;;  %3811 = vxpose.xlu0.c.b16.end [4/4] (short) %v6950_v21, 128  ;;  %v3146_v24 = vcombine.low %v2469_v13, %v2533_v36  ;;  %v3086_v30 = vrot.slane %v3079_v20, %v7366_v46  ;;  %v3078_v13 = vrot.slane %v3071_v25, %v7366_v46  ;;  %v6958_v21 = vld [vmem:[%s8751_s6 + $0xa8] sm:$0xff]   ;;  %v7811_v4 = vcombine.low %v7751_v14, %v7755_v42 }
 0x27c   : > { %v3266_v27 = vshrl.u32 %v7764_v0, 16  ;;  %v3274_v50 = vshrl.u32 %v7768_v18, 16  ;;  %v7828_v14 = vcombine.low %v7747_v53, %v7740_v9 }
 0x27d   : > { %v2565_v11 = vpop.trf.xlu1  ;;  %v3153_v35 = vrot.slane %v3146_v24, %v7366_v46  ;;  %v3103_v6 = vcombine.low %v3078_v13, %v3086_v30  ;;  %v3104_v55 = vcombine.high %v3078_v13, %v3086_v30 }
 0x27e   : > { %v7774_v12 = vpack.i.b16 %v3266_v27, %v3265_v51  ;;  %v7776_v39 = vpack.i.b16 %v3274_v50, %v3273_v17  ;;  %4131 = vxpose.xlu1.c.b16.cont [2/4] (short) %v6958_v21, 128 }
 0x27f   : > { %v2613_v43 = vpop.trf.xlu0  ;;  %v3118_v24 = vrot.slane %v3104_v55, %v7371_v62  ;;  %v3111_v25 = vrot.slane %v3103_v6, %v7371_v62 }
 0x280   : > { %v3087_v34 = vcombine.low %v2549_v26, %v2613_v43  ;;  %v3170_v26 = vcombine.low %v3145_v56, %v3153_v35 }
 0x281   : > { %v2629_v3 = vpop.trf.xlu1 }
 0x282   : > { %v3154_v15 = vcombine.low %v2565_v11, %v2629_v3  ;;  %v3094_v16 = vrot.slane %v3087_v34, %v7366_v46  ;;  %v3171_v11 = vcombine.high %v3145_v56, %v3153_v35  ;;  %v3178_v28 = vrot.slane %v3170_v26, %v7371_v62 }
 0x283   : > { %v2581_v22 = vpop.trf.xlu0  ;;  %v3255_v26 = vpack.i.b16 %v7811_v4, %v7828_v14 }
 0x284   : > { %v3161_v51 = vrot.slane %v3154_v15, %v7366_v46  ;;  %v3185_v34 = vrot.slane %v3171_v11, %v7371_v62  ;;  %v3263_v11 = vpack.i.b16 %v7764_v0, %v7760_v57 }
 0x285   : > { %v2597_v32 = vpop.trf.xlu1 }
 0x287   : > { %v2645_v2 = vpop.trf.xlu0 }
 0x288   : > { %v3095_v40 = vcombine.low %v2581_v22, %v2645_v2 }
 0x289   : > { %v2661_v48 = vpop.trf.xlu1 }
 0x28a   : > { %v3102_v54 = vrot.slane %v3095_v40, %v7366_v46  ;;  %v3162_v5 = vcombine.low %v2597_v32, %v2661_v48 }
 0x28b   : > { %v1813_v23 = vpop.trf.xlu0 }
 0x28c   : > { %v3119_v45 = vcombine.low %v3094_v16, %v3102_v54  ;;  %v3120_v36 = vcombine.high %v3094_v16, %v3102_v54  ;;  %v3169_v27 = vrot.slane %v3162_v5, %v7366_v46 }
 0x28d   : > { %v1829_v43 = vpop.trf.xlu1 }
 0x28e   : > { %v3127_v17 = vrot.slane %v3119_v45, %v7371_v62  ;;  %v3134_v50 = vrot.slane %v3120_v36, %v7371_v62  ;;  %v3186_v3 = vcombine.low %v3161_v51, %v3169_v27  ;;  %v3187_v22 = vcombine.high %v3161_v51, %v3169_v27 }
 0x28f   : > { %v1845_v20 = vpop.trf.xlu0 }
 0x290   : > { %v3201_v32 = vrot.slane %v3187_v22, %v7371_v62  ;;  %v3194_v2 = vrot.slane %v3186_v3, %v7371_v62  ;;  %v2685_v30 = vcombine.low %v7591_v47, %v1845_v20  ;;  %v7805_v35 = vcombine.low %v3111_v25, %v3127_v17 }
 0x291   : > { %v1861_v40 = vpop.trf.xlu1  ;;  %v7807_v15 = vcombine.high %v3111_v25, %v3127_v17  ;;  %v7817_v48 = vcombine.low %v3118_v24, %v3134_v50  ;;  %v2709_v50 = vrot.slane %v2701_v37, %v7371_v62  ;;  %v2716_v25 = vrot.slane %v2702_v8, %v7371_v62 }
 0x292   : > { %v7813_v16 = vcombine.low %v3178_v28, %v3194_v2  ;;  %v7815_v54 = vcombine.high %v3178_v28, %v3194_v2  ;;  %v7819_v56 = vcombine.low %v3185_v34, %v3201_v32  ;;  %v2752_v47 = vcombine.low %v7605_v60, %v1861_v40 }
 0x293   : > { %v1877_v13 = vpop.trf.xlu0  ;;  %v2692_v42 = vrot.slane %v2685_v30, %v7366_v46  ;;  %v3297_v9 = vshrl.u32 %v7817_v48, 16  ;;  %v2776_v37 = vrot.slane %v2768_v58, %v7371_v62  ;;  %v2783_v32 = vrot.slane %v2769_v1, %v7371_v62 }
 0x294   : > { %v2693_v5 = vcombine.low %v1813_v23, %v1877_v13  ;;  %v3279_v21 = vpack.i.b16 %v7813_v16, %v7805_v35  ;;  %v3287_v6 = vpack.i.b16 %v7815_v54, %v7807_v15  ;;  %v3298_v36 = vshrl.u32 %v7819_v56, 16 }
 0x295   : > { %v1893_v45 = vpop.trf.xlu1  ;;  %v2759_v27 = vrot.slane %v2752_v47, %v7366_v46  ;;  %v3282_v58 = vshrl.u32 %v7813_v16, 16  ;;  %v3281_v59 = vshrl.u32 %v7805_v35, 16  ;;  %v3295_v35 = vpack.i.b16 %v7819_v56, %v7817_v48 }
 0x296   : > { %v2700_v55 = vrot.slane %v2693_v5, %v7366_v46  ;;  %v2760_v23 = vcombine.low %v1829_v43, %v1893_v45  ;;  %6625 = vmatprep.subr.bf16.mxu1 %v3279_v21  ;;  %6673 = vmatprep.subr.bf16.mxu0 %v3287_v6  ;;  %v7840_v43 = vpack.i.b16 %v3298_v36, %v3297_v9 }
 0x297   : > { %v3655_v60 = vpop.trf.xlu0  ;;  %6626 = vmatpush3.bf16.msra.mxu1 %v3279_v21  ;;  %6674 = vmatpush3.bf16.msra.mxu0 %v3287_v6  ;;  %v3271_v9 = vpack.i.b16 %v7768_v18, %v7766_v61  ;;  %v8757_v18 = vmov 0.0  }
 0x298   : > { %v2717_v53 = vcombine.low %v2692_v42, %v2700_v55  ;;  %v2718_v51 = vcombine.high %v2692_v42, %v2700_v55  ;;  %v2767_v17 = vrot.slane %v2760_v23, %v7366_v46  ;;  %6627 = vmatprep.subr.bf16.mxu1 %v3255_v26  ;;  %6675 = vmatprep.subr.bf16.mxu0 %v3263_v11 }
 0x299   : > { %6681 = vmatprep.mubr.msk.bf16.mxu0 %vm617_vm2, %v3655_v60  ;;  %v7849_v3 = vpop.trf.xlu1  ;;  %v3283_v23 = vpack.i.b16 %v3282_v58, %v3281_v59 }
 0x29a   : > { %v2725_v57 = vrot.slane %v2717_v53, %v7371_v62  ;;  %v2732_v0 = vrot.slane %v2718_v51, %v7371_v62  ;;  %v2784_v22 = vcombine.low %v2759_v27, %v2767_v17  ;;  %v2785_v20 = vcombine.high %v2759_v27, %v2767_v17 }
 0x29b   : > { %v3656_v24 = vpop.trf.xlu0  ;;  %6628 = vmatpush3.bf16.msra.mxu1 %v3255_v26  ;;  %6676 = vmatpush3.bf16.msra.mxu0 %v3263_v11 }
 0x29c   : > { %v2733_v34 = vcombine.low %v2709_v50, %v2725_v57  ;;  %v2792_v28 = vrot.slane %v2784_v22, %v7371_v62  ;;  %v2799_v2 = vrot.slane %v2785_v20, %v7371_v62  ;;  %6629 = vmatprep.subr.bf16.mxu1 %v7697_v44  ;;  %6677 = vmatprep.subr.bf16.mxu0 %v7699_v29 }
 0x29d   : > { %v2734_v38 = vcombine.high %v2709_v50, %v2725_v57  ;;  %v2735_v10 = vcombine.low %v2716_v25, %v2732_v0  ;;  %v7867_v8 = vpop.trf.xlu1  ;;  %v3258_v50 = vshrl.u32 %v7811_v4, 16  ;;  %v6951_v25 = vld [vmem:[%s8750_s5 + $0x18] sm:$0xff]  }
 0x29e   : > { %v2800_v40 = vcombine.low %v2776_v37, %v2792_v28  ;;  %v2801_v13 = vcombine.high %v2776_v37, %v2792_v28  ;;  %v2802_v5 = vcombine.low %v2783_v32, %v2799_v2  ;;  %v3209_v52 = vshrl.u32 %v2733_v34, 16  ;;  %v6953_v28 = vld [vmem:[%s8750_s5 + $0x8] sm:$0xff]  }
 0x29f   : > { %v3657_v30 = vpop.trf.xlu0  ;;  %6630 = vmatpush3.bf16.msra.mxu1 %v7697_v44  ;;  %6678 = vmatpush3.bf16.msra.mxu0 %v7699_v29  ;;  %v3217_v42 = vshrl.u32 %v2734_v38, 16  ;;  %v3225_v45 = vshrl.u32 %v2735_v10, 16  ;;  %v3289_v37 = vshrl.u32 %v7807_v15, 16 }
 0x2a0   : > { %v3207_v1 = vpack.i.b16 %v2800_v40, %v2733_v34  ;;  %v3215_v47 = vpack.i.b16 %v2801_v13, %v2734_v38  ;;  %v3223_v21 = vpack.i.b16 %v2802_v5, %v2735_v10  ;;  %v3210_v6 = vshrl.u32 %v2800_v40, 16  ;;  %v6954_v38 = vld [vmem:[%s8750_s5] sm:$0xff]   ;;  %v6955_v10 = vld [vmem:[%s8749_s4 + $0x8] sm:$0xff]  }
 0x2a1   : > { %v3218_v55 = vshrl.u32 %v2801_v13, 16  ;;  %v3226_v36 = vshrl.u32 %v2802_v5, 16  ;;  %v3979_v60 = vpop.trf.xlu1  ;;  %v4653_v13 = vld [vmem:[%s369_s30] sm:$0xff]  ;;  %v4654_v5 = vld [vmem:[%s369_s30 + $0x8] sm:$0xff] }
 0x2a2   : > { %6631 = vmatprep.subr.bf16.mxu1 %v3207_v1  ;;  %6679 = vmatprep.subr.bf16.mxu0 %v3215_v47  ;;  %v3211_v44 = vpack.i.b16 %v3210_v6, %v3209_v52  ;;  %v4657_v59 = vpack.c.bf16 %v4654_v5, %v4653_v13  ;;  %v4552_v52 = vpack.c.b16 %v7335_v19, %v7335_v19  ;;  %v4655_v19 = vld [vmem:[%s369_s30 + $0x10] sm:$0xff] }
 0x2a3   : > { %v3658_v16 = vpop.trf.xlu0  ;;  %6632 = vmatpush3.bf16.msra.mxu1 %v3207_v1  ;;  %6680 = vmatpush3.bf16.msra.mxu0 %v3215_v47  ;;  %v7875_v29 = vpack.i.b16 %v3218_v55, %v3217_v42  ;;  %v7877_v26 = vpack.i.b16 %v3226_v36, %v3225_v45  ;;  %v6956_v1 = vld [vmem:[%s8749_s4] sm:$0xff]   ;;  %v6960_v42 = vld [vmem:[%s8751_s6 + $0xb8] sm:$0xff]  }
 0x2a4   : > { %6649 = vmatprep.subr.bf16.mxu1 %v3283_v23  ;;  %6721 = vmatprep.subr.bf16.mxu0 %v3295_v35 }
 0x2a5   : > { %v3980_v48 = vpop.trf.xlu1 }
 0x2a6   : > { %6682 = vmatmul.mubr.msk.bf16.vlgmr.msra.gmra.mxu0 %vm617_vm2, %v3656_v24  ;;  %v3290_v24 = vshrl.u32 %v7815_v54, 16 }
 0x2a7   : > { %v3659_v11 = vpop.trf.xlu0  ;;  %6722 = vmatpush3.bf16.msra.mxu0 %v3295_v35  ;;  %6685 = vmatprep.mubr.msk.bf16.mxu0 %vm617_vm2, %v3657_v30  ;;  %v6963_v35 = vld [vmem:[%s8753_s8 + $0x8] sm:$0xff]  }
 0x2a8   : > { %6723 = vmatprep.subr.bf16.mxu0 %v3271_v9  ;;  %v3291_v32 = vpack.i.b16 %v3290_v24, %v3289_v37 }
 0x2a9   : > { %v3981_v51 = vpop.trf.xlu1 }
 0x2ab   : > { %v3660_v56 = vpop.trf.xlu0  ;;  %6724 = vmatpush3.bf16.msra.mxu0 %v3271_v9 }
 0x2ac   : > { %6725 = vmatprep.subr.bf16.mxu0 %v7701_v63 }
 0x2ad   : > { %v3982_v61 = vpop.trf.xlu1 }
 0x2ae   : > { %6686 = vmatmul.mubr.msk.bf16.gmra.mxu0 %vm617_vm2, %v3658_v16 }
 0x2af   : > { %v3661_v53 = vpop.trf.xlu0  ;;  %6726 = vmatpush3.bf16.msra.mxu0 %v7701_v63  ;;  %6689 = vmatprep.mubr.msk.bf16.mxu0 %vm617_vm2, %v3659_v11  ;;  %v3257_v63 = vshrl.u32 %v7828_v14, 16 }
 0x2b0   : > { %6727 = vmatprep.subr.bf16.mxu0 %v3223_v21 }
 0x2b1   : > { %v3983_v0 = vpop.trf.xlu1  ;;  %v3259_v22 = vpack.i.b16 %v3258_v50, %v3257_v63 }
 0x2b3   : > { %v3662_v27 = vpop.trf.xlu0  ;;  %6728 = vmatpush3.bf16.msra.mxu0 %v3223_v21 }
 0x2b4   : > { %6769 = vmatprep.subr.bf16.mxu0 %v8757_v18 }
 0x2b5   : > { %v3984_v4 = vpop.trf.xlu1 }
 0x2b6   : > { %6690 = vmatmul.mubr.msk.bf16.gmra.mxu0 %vm617_vm2, %v3660_v56 }
 0x2b7   : > { %v3333_v17 = vpop.trf.xlu0  ;;  %6693 = vmatprep.mubr.msk.bf16.mxu0 %vm617_vm2, %v3661_v53  ;;  %v6966_v53 = vld [vmem:[%s8750_s5 + $0x10] sm:$0xff]  }
 0x2b8   : > { %6633 = vmatprep.mubr.msk.bf16.mxu1 %vm617_vm2, %v3333_v17  ;;  %v6968_v17 = vld [vmem:[%s8750_s5] sm:$0xff]  }
 0x2b9   : > { %v3494_v34 = vpop.trf.xlu1 }
 0x2bb   : > { %v3334_v57 = vpop.trf.xlu0 }
 0x2bc   : > { %6634 = vmatmul.mubr.msk.bf16.vlgmr.msra.gmra.mxu1 %vm617_vm2, %v3334_v57 }
 0x2bd   : > { %6650 = vmatpush3.bf16.msra.mxu1 %v3283_v23  ;;  %v3495_v54 = vpop.trf.xlu1 }
 0x2be   : > { %6651 = vmatprep.subr.bf16.mxu1 %v3259_v22  ;;  %6694 = vmatmul.mubr.msk.bf16.gmra.mxu0 %vm617_vm2, %v3662_v27  ;;  %v6967_v27 = vld [vmem:[%s8750_s5 + $0x8] sm:$0xff]  }
 0x2bf   : > { %v3335_v20 = vpop.trf.xlu0  ;;  %6729 = vmatprep.mubr.msk.bf16.mxu0 %vm617_vm2, %v7849_v3 }
 0x2c0   : > { %6637 = vmatprep.mubr.msk.bf16.mxu1 %vm617_vm2, %v3335_v20 }
 0x2c1   : > { %6652 = vmatpush3.bf16.msra.mxu1 %v3259_v22  ;;  %v3496_v58 = vpop.trf.xlu1 }
 0x2c2   : > { %6653 = vmatprep.subr.bf16.mxu1 %v7703_v31 }
 0x2c3   : > { %v3336_v14 = vpop.trf.xlu0 }
 0x2c4   : > { %6638 = vmatmul.mubr.msk.bf16.gmra.mxu1 %vm617_vm2, %v3336_v14 }
 0x2c5   : > { %6654 = vmatpush3.bf16.msra.mxu1 %v7703_v31  ;;  %v6952_v31 = vld [vmem:[%s8750_s5 + $0x10] sm:$0xff]   ;;  %v3497_v30 = vpop.trf.xlu1 }
 0x2c6   : > { %6655 = vmatprep.subr.bf16.mxu1 %v3211_v44  ;;  %6730 = vmatmul.mubr.msk.bf16.vlgmr.msra.gmra.mxu0 %vm617_vm2, %v7867_v8 }
 0x2c7   : > { %v3337_v3 = vpop.trf.xlu0  ;;  %6733 = vmatprep.mubr.msk.bf16.mxu0 %vm617_vm2, %v3979_v60  ;;  %6770 = vmatpush3.bf16.msra.mxu0 %v6951_v25 }
 0x2c8   : > { %6641 = vmatprep.mubr.msk.bf16.mxu1 %vm617_vm2, %v3337_v3  ;;  %6771 = vmatprep.subr.bf16.mxu0 %v8757_v18 }
 0x2c9   : > { %6656 = vmatpush3.bf16.msra.mxu1 %v3211_v44  ;;  %v3498_v40 = vpop.trf.xlu1  ;;  %v6964_v44 = vld [vmem:[%s8753_s8] sm:$0xff]  }
 0x2ca   : > { %6697 = vmatprep.subr.bf16.mxu1 %v3291_v32 }
 0x2cb   : > { %v3338_v15 = vpop.trf.xlu0  ;;  %6772 = vmatpush3.bf16.msra.mxu0 %v6952_v31 }
 0x2cc   : > { %6642 = vmatmul.mubr.msk.bf16.gmra.mxu1 %vm617_vm2, %v3338_v15  ;;  %6773 = vmatprep.subr.bf16.mxu0 %v8757_v18 }
 0x2cd   : > { %v3499_v47 = vpop.trf.xlu1 }
 0x2ce   : > { %6734 = vmatmul.mubr.msk.bf16.gmra.mxu0 %vm617_vm2, %v3980_v48  ;;  %v6965_v48 = vld [vmem:[%s8750_s5 + $0x18] sm:$0xff]  }
 0x2cf   : > { %v3339_v2 = vpop.trf.xlu0  ;;  %6737 = vmatprep.mubr.msk.bf16.mxu0 %vm617_vm2, %v3981_v51  ;;  %6774 = vmatpush3.bf16.msra.mxu0 %v6953_v28 }
 0x2d0   : > { %6645 = vmatprep.mubr.msk.bf16.mxu1 %vm617_vm2, %v3339_v2  ;;  %6775 = vmatprep.subr.bf16.mxu0 %v8757_v18 }
 0x2d1   : > { %v3500_v6 = vpop.trf.xlu1 }
 0x2d3   : > { %v3340_v8 = vpop.trf.xlu0  ;;  %6776 = vmatpush3.bf16.msra.mxu0 %v6954_v38 }
 0x2d4   : > { %6646 = vmatmul.mubr.msk.bf16.gmra.mxu1 %vm617_vm2, %v3340_v8  ;;  %6781 = vmatprep.subr.bf16.mxu0 %v6955_v10 }
 0x2d5   : > { %6657 = vmatprep.mubr.msk.bf16.mxu1 %vm617_vm2, %v3494_v34  ;;  %v3501_v55 = vpop.trf.xlu1 }
 0x2d6   : > { %6738 = vmatmul.mubr.msk.bf16.gmra.mxu0 %vm617_vm2, %v3982_v61 }
 0x2d7   : > { %6741 = vmatprep.mubr.msk.bf16.mxu0 %vm617_vm2, %v3983_v0  ;;  %v3816_v45 = vpop.trf.xlu0 }
 0x2db   : > { %v3817_v36 = vpop.trf.xlu0 }
 0x2dc   : > { %6658 = vmatmul.mubr.msk.bf16.vlgmr.msra.gmra.mxu1 %vm617_vm2, %v3495_v54 }
 0x2dd   : > { %6698 = vmatpush3.bf16.msra.mxu1 %v3291_v32  ;;  %6661 = vmatprep.mubr.msk.bf16.mxu1 %vm617_vm2, %v3496_v58 }
 0x2de   : > { %6699 = vmatprep.subr.bf16.mxu1 %v7774_v12  ;;  %6742 = vmatmul.mubr.msk.bf16.gmra.mxu0 %vm617_vm2, %v3984_v4 }
 0x2df   : > { %6777 = vmatprep.mubr.msk.bf16.mxu0 %vm7044_vm8, %v8757_v18  ;;  %v3818_v16 = vpop.trf.xlu0 }
 0x2e1   : > { %6700 = vmatpush3.bf16.msra.mxu1 %v7774_v12  ;;  %v6959_v12 = vld [vmem:[%s8751_s6 + $0xb0] sm:$0xff]  }
 0x2e2   : > { %6701 = vmatprep.subr.bf16.mxu1 %v7705_v7  ;;  %4132 = vxpose.xlu1.c.b16.cont [3/4] (short) %v6959_v12, 128  ;;  %v7045_v12 = vmov 1966171168  }
 0x2e3   : > { %v3819_v23 = vpop.trf.xlu0 }
 0x2e4   : > { %6662 = vmatmul.mubr.msk.bf16.gmra.mxu1 %vm617_vm2, %v3497_v30 }
 0x2e5   : > { %6702 = vmatpush3.bf16.msra.mxu1 %v7705_v7  ;;  %6665 = vmatprep.mubr.msk.bf16.mxu1 %vm617_vm2, %v3498_v40  ;;  %v4656_v7 = vld [vmem:[%s369_s30 + $0x18] sm:$0xff]  ;;  %s8281_s30 = scalar_lea.vmem %s8755_s10, %s6463_s21 }
 0x2e6   : > { %6703 = vmatprep.subr.bf16.mxu1 %v7875_v29  ;;  %6778 = vmatmul.mubr.msk.bf16.vlgmr.msra.gmra.mxu0 %vm617_vm2, %v4552_v52  ;;  %v4658_v21 = vpack.c.bf16 %v4656_v7, %v4655_v19  ;;  %v4622_v19 = vunpack.c.l.s4 %v7045_v12 }
 0x2e7   : > { %6782 = vmatpush3.bf16.msra.mxu0 %v6955_v10  ;;  %6785 = vmatprep.mubr.msk.bf16.mxu0 %vm4675_vm9, %v4657_v59 }
 0x2e8   : > { %6783 = vmatprep.subr.bf16.mxu0 %v6956_v1  ;;  %4133 = vxpose.xlu1.c.b16.end [4/4] (short) %v6960_v42, 128  ;;  %v4623_v42 = vunpack.c.0.s8 %v4622_v19 }
 0x2e9   : > { %6704 = vmatpush3.bf16.msra.mxu1 %v7875_v29 }
 0x2ea   : > { %6745 = vmatprep.subr.bf16.mxu1 %v7840_v43 }
 0x2eb   : > { %6784 = vmatpush3.bf16.msra.mxu0 %v6956_v1 }
 0x2ec   : > { %6666 = vmatmul.mubr.msk.bf16.gmra.mxu1 %vm617_vm2, %v3499_v47 }
 0x2ed   : > { %6669 = vmatprep.mubr.msk.bf16.mxu1 %vm617_vm2, %v3500_v6 }
 0x2ee   : > { %6786 = vmatmul.mubr.msk.bf16.vlgmr.msra.gmra.mxu0 %vm4675_vm9, %v4658_v21 }
 0x2f4   : > { %6670 = vmatmul.mubr.msk.bf16.gmra.mxu1 %vm617_vm2, %v3501_v55 }
 0x2f5   : > { %6705 = vmatprep.mubr.msk.bf16.mxu1 %vm617_vm2, %v3816_v45 }
 0x2fc   : > { %6706 = vmatmul.mubr.msk.bf16.vlgmr.msra.gmra.mxu1 %vm617_vm2, %v3817_v36 }
 0x2fd   : > { %6746 = vmatpush3.bf16.msra.mxu1 %v7840_v43  ;;  %6709 = vmatprep.mubr.msk.bf16.mxu1 %vm617_vm2, %v3818_v16  ;;  %v3820_v43 = vpop.trf.xlu0  ;;  %v8094_v16 = vsub.s32 %v4623_v42, %v7361_v49 }
 0x2fe   : > { %6747 = vmatprep.subr.bf16.mxu1 %v7776_v39 }
 0x301   : > { %6748 = vmatpush3.bf16.msra.mxu1 %v7776_v39  ;;  %v6961_v39 = vld [vmem:[%s8753_s8 + $0x18] sm:$0xff]   ;;  %v3821_v60 = vpop.trf.xlu0 }
 0x302   : > { %6749 = vmatprep.subr.bf16.mxu1 %v7707_v41  ;;  %6789 = vmatprep.subr.bf16.mxu0 %v6961_v39 }
 0x303   : > { %6790 = vmatpush3.bf16.msra.mxu0 %v6961_v39 }
 0x304   : > { %6710 = vmatmul.mubr.msk.bf16.gmra.mxu1 %vm617_vm2, %v3819_v23 }
 0x305   : > { %6750 = vmatpush3.bf16.msra.mxu1 %v7707_v41  ;;  %v6962_v41 = vld [vmem:[%s8753_s8 + $0x10] sm:$0xff]   ;;  %6713 = vmatprep.mubr.msk.bf16.mxu1 %vm617_vm2, %v3820_v43  ;;  %v3822_v29 = vpop.trf.xlu0 }
 0x306   : > { %6751 = vmatprep.subr.bf16.mxu1 %v7877_v26  ;;  %6791 = vmatprep.subr.bf16.mxu0 %v6962_v41 }
 0x307   : > { %6792 = vmatpush3.bf16.msra.mxu0 %v6962_v41 }
 0x308   : > { %6793 = vmatprep.subr.bf16.mxu0 %v6963_v35 }
 0x309   : > { %6752 = vmatpush3.bf16.msra.mxu1 %v7877_v26  ;;  %v3823_v26 = vpop.trf.xlu0 }
 0x30a   : > { %6801 = vmatprep.subr.bf16.mxu1 %v8757_v18 }
 0x30b   : > { %6794 = vmatpush3.bf16.msra.mxu0 %v6963_v35 }
 0x30c   : > { %6714 = vmatmul.mubr.msk.bf16.gmra.mxu1 %vm617_vm2, %v3821_v60  ;;  %6795 = vmatprep.subr.bf16.mxu0 %v6964_v44 }
 0x30d   : > { %6717 = vmatprep.mubr.msk.bf16.mxu1 %vm617_vm2, %v3822_v29 }
 0x30f   : > { %6796 = vmatpush3.bf16.msra.mxu0 %v6964_v44 }
 0x310   : > { %6813 = vmatprep.subr.bf16.mxu0 %v8757_v18 }
 0x314   : > { %6718 = vmatmul.mubr.msk.bf16.gmra.mxu1 %vm617_vm2, %v3823_v26 }
 0x33e   : > { %v4138_v11 = vpop.trf.xlu1 }
 0x33f   : > { %6753 = vmatprep.mubr.msk.bf16.mxu1 %vm617_vm2, %v4138_v11 }
 0x342   : > { %v4139_v9 = vpop.trf.xlu1 }
 0x343   : > { %6754 = vmatmul.mubr.msk.bf16.vlgmr.msra.gmra.mxu1 %vm617_vm2, %v4139_v9 }
 0x344   : > { %6802 = vmatpush3.bf16.msra.mxu1 %v6965_v48 }
 0x345   : > { %6803 = vmatprep.subr.bf16.mxu1 %v8757_v18 }
 0x346   : > { %v4140_v56 = vpop.trf.xlu1 }
 0x347   : > { %6757 = vmatprep.mubr.msk.bf16.mxu1 %vm617_vm2, %v4140_v56 }
 0x348   : > { %6804 = vmatpush3.bf16.msra.mxu1 %v6966_v53 }
 0x349   : > { %6805 = vmatprep.subr.bf16.mxu1 %v8757_v18 }
 0x34a   : > { %v4141_v51 = vpop.trf.xlu1 }
 0x34b   : > { %6758 = vmatmul.mubr.msk.bf16.gmra.mxu1 %vm617_vm2, %v4141_v51 }
 0x34c   : > { %6806 = vmatpush3.bf16.msra.mxu1 %v6967_v27 }
 0x34d   : > { %6807 = vmatprep.subr.bf16.mxu1 %v8757_v18 }
 0x34e   : > { %v4142_v61 = vpop.trf.xlu1 }
 0x34f   : > { %6761 = vmatprep.mubr.msk.bf16.mxu1 %vm617_vm2, %v4142_v61 }
 0x350   : > { %6808 = vmatpush3.bf16.msra.mxu1 %v6968_v17 }
 0x351   : > { %6825 = vmatprep.subr.bf16.mxu1 %v8757_v18 }
 0x352   : > { %v4143_v50 = vpop.trf.xlu1 }
 0x353   : > { %6762 = vmatmul.mubr.msk.bf16.gmra.mxu1 %vm617_vm2, %v4143_v50 }
 0x356   : > { %v4144_v63 = vpop.trf.xlu1 }
 0x357   : > { %6765 = vmatprep.mubr.msk.bf16.mxu1 %vm617_vm2, %v4144_v63 }
 0x35a   : > { %v4145_v57 = vpop.trf.xlu1 }
 0x35b   : > { %6766 = vmatmul.mubr.msk.bf16.gmra.mxu1 %vm617_vm2, %v4145_v57 }
 0x35c   : > { %6809 = vmatprep.mubr.msk.bf16.mxu1 %vm7044_vm8, %v8757_v18 }
 0x366   : > { %v8025_v0 = vpop.f32.mrf.mxu0 }
 0x368   : > { %v8027_v22 = vpop.f32.mrf.mxu0 }
 0x36a   : > { %v8029_v20 = vpop.f32.mrf.mxu0 }
 0x36c   : > { %v8031_v4 = vpop.f32.mrf.mxu0 }
 0x36e   : > { %v8033_v14 = vpop.f32.mrf.mxu0 }
 0x36f   : > { %8771 = vst [vmem:[#allocation7_spill] sm:$0xff] %v8033_v14 }
 0x370   : > { %v8035_v24 = vpop.f32.mrf.mxu0 }
 0x372   : > { %v8037_v25 = vpop.f32.mrf.mxu0 }
 0x373   : > { %8772 = vst [vmem:[#allocation8_spill] sm:$0xff] %v8037_v25  ;;  %v5055_v25 = vsub.s32 2, %v7361_v49 }
 0x374   : > { %v8039_v37 = vpop.f32.mrf.mxu0 }
 0x376   : > { %v8041_v3 = vpop.f32.mrf.mxu0 }
 0x377   : > { %8773 = vst [vmem:[#allocation9_spill] sm:$0xff] %v8041_v3 }
 0x378   : > { %v8043_v34 = vpop.f32.mrf.mxu0 }
 0x379   : > { %8774 = vst [vmem:[#allocation10_spill] sm:$0xff] %v8043_v34 }
 0x37a   : > { %v8045_v32 = vpop.f32.mrf.mxu0 }
 0x37b   : > { %8775 = vst [vmem:[#allocation11_spill] sm:$0xff] %v8045_v32 }
 0x37c   : > { %v8047_v31 = vpop.f32.mrf.mxu0  ;;  %v8077_v1 = vpop.f32.mrf.mxu1 }
 0x37d   : > { %8776 = vst [vmem:[#allocation12_spill] sm:$0xff] %v8047_v31 }
 0x37e   : > { %v8049_v15 = vpop.f32.mrf.mxu0  ;;  %v8083_v21 = vpop.f32.mrf.mxu1 }
 0x37f   : > { %8777 = vst [vmem:[#allocation13_spill] sm:$0xff] %v8049_v15 }
 0x380   : > { %v8051_v54 = vpop.f32.mrf.mxu0  ;;  %v8089_v45 = vpop.f32.mrf.mxu1 }
 0x381   : > { %8778 = vst [vmem:[#allocation14_spill] sm:$0xff] %v8051_v54 }
 0x382   : > { %v8053_v28 = vpop.f32.mrf.mxu0  ;;  %v8098_v39 = vpop.f32.mrf.mxu1 }
 0x383   : > { %8779 = vst [vmem:[#allocation15_spill] sm:$0xff] %v8053_v28  ;;  %v5041_v28 = vsub.s32 0, %v7361_v49 }
 0x384   : > { %v8055_v2 = vpop.f32.mrf.mxu0  ;;  %v8110_v29 = vpop.f32.mrf.mxu1 }
 0x385   : > { %8780 = vst [vmem:[#allocation16_spill] sm:$0xff] %v8055_v2  ;;  %v5034_v2 = vstv %s5033_s26 }
 0x386   : > { %v8057_v38 = vpop.f32.mrf.mxu0  ;;  %v8115_v53 = vpop.f32.mrf.mxu1 }
 0x387   : > { %8781 = vst [vmem:[#allocation17_spill] sm:$0xff] %v8057_v38 }
 0x388   : > { %v8059_v10 = vpop.f32.mrf.mxu0  ;;  %v8118_v61 = vpop.f32.mrf.mxu1 }
 0x389   : > { %8782 = vst [vmem:[#allocation18_spill] sm:$0xff] %v8059_v10  ;;  %v5018_v10 = vstv %s5017_s20 }
 0x38a   : > { %v8061_v8 = vpop.f32.mrf.mxu0  ;;  %v8120_v63 = vpop.f32.mrf.mxu1 }
 0x38b   : > { %8783 = vst [vmem:[#allocation19_spill] sm:$0xff] %v8061_v8  ;;  %v8765_v8 = vmov 16  }
 0x38c   : > { %v8063_v58 = vpop.f32.mrf.mxu0  ;;  %v8122_v57 = vpop.f32.mrf.mxu1  ;;  %6908 = vset.pattern.permute.xlu1 %v8765_v8 }
 0x38d   : > { %8784 = vst [vmem:[#allocation20_spill] sm:$0xff] %v8063_v58  ;;  %v5010_v58 = vstv %s5009_s27 }
 0x38e   : > { %v8065_v30 = vpop.f32.mrf.mxu0  ;;  %v8128_v42 = vpop.f32.mrf.mxu1 }
 0x38f   : > { %8785 = vst [vmem:[#allocation21_spill] sm:$0xff] %v8065_v30 }
 0x390   : > { %v8067_v40 = vpop.f32.mrf.mxu0 }
 0x391   : > { %8786 = vst [vmem:[#allocation22_spill] sm:$0xff] %v8067_v40 }
 0x392   : > { %v8069_v13 = vpop.f32.mrf.mxu0 }
 0x393   : > { %8787 = vst [vmem:[#allocation23_spill] sm:$0xff] %v8069_v13 }
 0x394   : > { %v8071_v5 = vpop.f32.mrf.mxu0 }
 0x395   : > { %8788 = vst [vmem:[#allocation24_spill] sm:$0xff] %v8071_v5 }
 0x396   : > { %v8073_v59 = vpop.f32.mrf.mxu0 }
 0x397   : > { %8789 = vst [vmem:[#allocation25_spill] sm:$0xff] %v8073_v59 }
 0x398   : > { %v8075_v52 = vpop.f32.mrf.mxu0 }
 0x399   : > { %8790 = vst [vmem:[#allocation26_spill] sm:$0xff] %v8075_v52 }
 0x39a   : > { %v8079_v47 = vpop.f32.mrf.mxu0 }
 0x39b   : > { %8791 = vst [vmem:[#allocation27_spill] sm:$0xff] %v8079_v47 }
 0x39c   : > { %v8081_v7 = vpop.f32.mrf.mxu0 }
 0x39d   : > { %8792 = vst [vmem:[#allocation28_spill] sm:$0xff] %v8081_v7 }
 0x39e   : > { %v8085_v6 = vpop.f32.mrf.mxu0 }
 0x39f   : > { %8793 = vst [vmem:[#allocation29_spill] sm:$0xff] %v8085_v6 }
 0x3a0   : > { %v8087_v55 = vpop.f32.mrf.mxu0 }
 0x3a1   : > { %8794 = vst [vmem:[#allocation30_spill] sm:$0xff] %v8087_v55 }
 0x3a2   : > { %v8091_v36 = vpop.f32.mrf.mxu0 }
 0x3a3   : > { %8795 = vst [vmem:[#allocation31_spill] sm:$0xff] %v8091_v36 }
 0x3a4   : > { %v8096_v23 = vpop.f32.mrf.mxu0 }
 0x3a5   : > { %8796 = vst [vmem:[#allocation32_spill] sm:$0xff] %v8096_v23  ;;  %v8798_v23 = vmov 0.0  }
 0x3a6   : > { %v4614_v41 = vpop.f32.mrf.mxu0 }
 0x3a7   : > { %v4627_v43 = vrot.slane %v4614_v41, %v8094_v16 }
 0x3a8   : > { %v6779_v35 = vpop.f32.mrf.mxu0 }
 0x3a9   : > { %v4628_v60 = vcombine.high %v4627_v43, %v4627_v43  ;;  %v4635_v44 = vrot.slane %v4627_v43, %v8094_v16  ;;  %6352 = vst.sshfl [vmem:[%s8105_s0 + $0x6] sm:$0x1 pattern:$0x73625140] %v4627_v43 }
 0x3aa   : > { %v4617_v26 = vpop.f32.mrf.mxu0 }
 0x3ab   : > { %v4642_v11 = vrot.slane %v4628_v60, %v8094_v16  ;;  %v4643_v9 = vcombine.high %v4635_v44, %v4635_v44  ;;  %6353 = vst.sshfl [vmem:[%s8105_s0 + $0xe] sm:$0x1 pattern:$0x73625140] %v4628_v60 }
 0x3ac   : > { %v6780_v48 = vpop.f32.mrf.mxu0 }
 0x3ad   : > { %v4644_v56 = vcombine.high %v4642_v11, %v4642_v11  ;;  %4651 = vst [vmem:[%s8105_s0 + $0x16] sm:$0x1] %v4643_v9  ;;  %v8138_v9 = vpop.f32.mrf.mxu1 }
 0x3ae   : > { %v6787_v51 = vpop.f32.mrf.mxu0 }
 0x3af   : > { %4652 = vst [vmem:[%s8105_s0 + $0x1e] sm:$0x1] %v4644_v56  ;;  %6993 = vtanh.f32 %v6787_v51  ;;  %v8149_v46 = vpop.f32.mrf.mxu1 }
 0x3b0   : > { %v4716_v27 = vpop.f32.mrf.mxu0 }
 0x3b1   : > { %6995 = vtanh.f32 %v4716_v27  ;;  %v8154_v7 = vpop.f32.mrf.mxu1 }
 0x3b2   : > { %v6788_v17 = vpop.f32.mrf.mxu0 }
 0x3b3   : > { %6997 = vtanh.f32 %v6788_v17  ;;  %v8156_v13 = vpop.f32.mrf.mxu1 }
 0x3b4   : > { %v4719_v50 = vpop.f32.mrf.mxu0 }
 0x3b5   : > { %6999 = vtanh.f32 %v4719_v50  ;;  %v8158_v30 = vpop.f32.mrf.mxu1 }
 0x3bc   : > { %v8124_v12 = vpop.eup %6993 }
 0x3bd   : > { %v4866_v19 = vsel %vm617_vm2, %v8124_v12, -inf }
 0x3be   : > { %v8130_v41 = vpop.eup %6995  ;;  %v4867_v43 = vrot.slane %v4866_v19, 4 }
 0x3bf   : > { %v4852_v35 = vsel %vm617_vm2, %v8130_v41, -inf }
 0x3c0   : > { %v8134_v60 = vpop.eup %6997  ;;  %v4853_v44 = vrot.slane %v4852_v35, 4  ;;  %v4868_v26 = vmax.f32 %v4866_v19, %v4867_v43 }
 0x3c1   : > { %v4873_v11 = vsel %vm617_vm2, %v8134_v60, -inf  ;;  %v4736_v50 = vpack.c.bf16 %v8134_v60, %v8124_v12 }
 0x3c2   : > { %v8140_v48 = vpop.eup %6999  ;;  %v4854_v56 = vmax.f32 %v4852_v35, %v4853_v44  ;;  %v4869_v51 = vrot.slane %v4868_v26, 2  ;;  %v4874_v27 = vrot.slane %v4873_v11, 4 }
 0x3c3   : > { %8797 = vst [vmem:[#allocation33_spill] sm:$0xff] %v8140_v48  ;;  %v4735_v17 = vpack.c.bf16 %v8140_v48, %v8130_v41  ;;  %v4859_v33 = vsel %vm617_vm2, %v8140_v48, -inf  ;;  %v5048_v48 = vsub.s32 1, %v7361_v49 }
 0x3c4   : > { %v4855_v19 = vrot.slane %v4854_v56, 2  ;;  %v4860_v43 = vrot.slane %v4859_v33, 4  ;;  %v4870_v18 = vmax.f32 %v4868_v26, %v4869_v51  ;;  %v4875_v62 = vmax.f32 %v4873_v11, %v4874_v27 }
 0x3c5   : > { %6797 = vmatprep.mubr.msk.bf16.mxu0 %vm617_vm2, %v4735_v17 }
 0x3c6   : > { %6798 = vmatmul.mubr.msk.bf16.vlgmr.msra.gmra.mxu0 %vm617_vm2, %v4736_v50  ;;  %v4856_v35 = vmax.f32 %v4854_v56, %v4855_v19  ;;  %v4861_v44 = vmax.f32 %v4859_v33, %v4860_v43  ;;  %v4876_v36 = vrot.slane %v4875_v62, 2  ;;  %v4871_v6 = vrot.slane %v4870_v18, 1 }
 0x3c7   : > { %6821 = vmatprep.mubr.msk.bf16.mxu0 %vm7044_vm8, %v8798_v23 }
 0x3c8   : > { %v4857_v55 = vrot.slane %v4856_v35, 1  ;;  %v4862_v47 = vrot.slane %v4861_v44, 2  ;;  %v4877_v59 = vmax.f32 %v4875_v62, %v4876_v36  ;;  %v4872_v27 = vmax.f32 %v4870_v18, %v4871_v6  ;;  %v8162_v18 = vpop.f32.mrf.mxu1 }
 0x3ca   : > { %v4858_v26 = vmax.f32 %v4856_v35, %v4857_v55  ;;  %v4863_v11 = vmax.f32 %v4861_v44, %v4862_v47  ;;  %v4878_v51 = vrot.slane %v4877_v59, 1  ;;  %v4882_v50 = vpack.c.bf16 %v4872_v27, %v4872_v27  ;;  %v8166_v35 = vpop.f32.mrf.mxu1 }
 0x3cc   : > { %v4864_v17 = vrot.slane %v4863_v11, 1  ;;  %v4879_v52 = vmax.f32 %v4877_v59, %v4878_v51  ;;  %v4880_v33 = vpack.c.bf16 %v4858_v26, %v4858_v26  ;;  %v4898_v62 = vunpack.c.l.b16 %v4882_v50 }
 0x3ce   : > { %v4865_v56 = vmax.f32 %v4863_v11, %v4864_v17  ;;  %v4883_v43 = vpack.c.bf16 %v4879_v52, %v4879_v52  ;;  %v4896_v5 = vunpack.c.l.b16 %v4880_v33  ;;  %v8170_v52 = vpop.f32.mrf.mxu1 }
 0x3d0   : > { %v4881_v19 = vpack.c.bf16 %v4865_v56, %v4865_v56  ;;  %v4899_v36 = vunpack.c.l.b16 %v4883_v43  ;;  %v8172_v44 = vpop.f32.mrf.mxu1 }
 0x3d2   : > { %v4897_v40 = vunpack.c.l.b16 %v4881_v19 }
 0x3d4   : > { %v4900_v55 = vsel %vm950_vm3, %v4897_v40, %v4896_v5  ;;  %v8174_v40 = vpop.f32.mrf.mxu1 }
 0x3d5   : > { %v4901_v47 = vsel %vm952_vm4, %v4898_v62, %v4900_v55 }
 0x3d6   : > { %v4902_v59 = vsel %vm954_vm5, %v4899_v36, %v4901_v47  ;;  %v8176_v5 = vpop.f32.mrf.mxu1  ;;  %v8799_v47 = vlaneseq }
 0x3d7   : > { %v4903_v6 = vpack.c.b16 %v4902_v59, %v4902_v59 }
 0x3d8   : > { %v8178_v26 = vpop.f32.mrf.mxu1  ;;  %v5005_v59 = vand.u32 127, %v8799_v47 }
 0x3d9   : > { %6810 = vmatmul.mubr.msk.bf16.vlgmr.msra.gmra.mxu1 %vm617_vm2, %v4903_v6  ;;  %v8763_v6 = vmov 18  }
 0x3da   : > { %6833 = vmatprep.mubr.msk.bf16.mxu1 %vm7044_vm8, %v8798_v23  ;;  %v8180_v11 = vpop.f32.mrf.mxu1  ;;  %6910 = vset.pattern.permute.xlu0 %v8763_v6  ;;  %vm5011_vm12 = vcmp.lt.s32.totalorder %v5005_v59, %v5010_v58  ;;  %vm5019_vm15 = vcmp.lt.s32.totalorder %v5005_v59, %v5018_v10  ;;  %v5026_v6 = vstv %s5025_s24  ;;  %vm5035_vm1 = vcmp.lt.s32.totalorder %v5005_v59, %v5034_v2 }
 0x3db   : > { %v6375_v47 = vsel %vm5011_vm12, 1.0, %v8798_v23  ;;  %v6376_v15 = vsel %vm5019_vm15, 1.0, %v8798_v23  ;;  %vm5027_vm0 = vcmp.lt.s32.totalorder %v5005_v59, %v5026_v6  ;;  %v6378_v31 = vsel %vm5035_vm1, 1.0, %v8798_v23 }
 0x3dc   : > { %v8182_v51 = vpop.f32.mrf.mxu1  ;;  %v5014_v8 = vsel %vm5008_vm10, %v6375_v47, 0.0  ;;  %v6377_v58 = vsel %vm5027_vm0, 1.0, %v8798_v23 }
 0x3dd   : > { %v5022_v32 = vsel %vm5015_vm11, %v6376_v15, %v5014_v8 }
 0x3de   : > { %v8184_v27 = vpop.f32.mrf.mxu1  ;;  %v5030_v3 = vsel %vm5023_vm13, %v6377_v58, %v5022_v32  ;;  %v5062_v32 = vsub.s32 3, %v7361_v49 }
 0x3df   : > { %v5038_v10 = vsel %vm5031_vm14, %v6378_v31, %v5030_v3 }
 0x3e0   : > { %v8186_v17 = vpop.f32.mrf.mxu1  ;;  %v5042_v34 = vrot.slane %v5038_v10, %v5041_v28  ;;  %v5049_v6 = vrot.slane %v5038_v10, %v5048_v48  ;;  %v5056_v15 = vrot.slane %v5038_v10, %v5055_v25  ;;  %v5063_v8 = vrot.slane %v5038_v10, %v5062_v32 }
 0x3e2   : > { %v8188_v56 = vpop.f32.mrf.mxu1  ;;  %5044 = vbcast.lane.b32.xlu1 %v5042_v34, 256 }
 0x3e4   : > { %v8190_v33 = vpop.f32.mrf.mxu1 }
 0x3e6   : > { %v8192_v50 = vpop.f32.mrf.mxu1  ;;  %5051 = vbcast.lane.b32.xlu1 %v5049_v6, 256 }
 0x3e8   : > { %v8194_v19 = vpop.f32.mrf.mxu1 }
 0x3ea   : > { %v8196_v43 = vpop.f32.mrf.mxu1  ;;  %5058 = vbcast.lane.b32.xlu1 %v5056_v15, 256 }
 0x3ec   : > { %v8198_v62 = vpop.f32.mrf.mxu1 }
 0x3ee   : > { %v8200_v36 = vpop.f32.mrf.mxu1  ;;  %5065 = vbcast.lane.b32.xlu1 %v5063_v8, 256 }
 0x3f0   : > { %v8205_v55 = vpop.f32.mrf.mxu1 }
 0x3f2   : > { %v8211_v38 = vpop.f32.mrf.mxu1 }
 0x3f4   : > { %v8220_v54 = vpop.f32.mrf.mxu1 }
 0x3f6   : > { %v8227_v47 = vpop.f32.mrf.mxu1 }
 0x3f7   : > { %8800 = vst [vmem:[#allocation34_spill] sm:$0xff] %v8227_v47 }
 0x3f8   : > { %v8230_v14 = vpop.f32.mrf.mxu1 }
 0x3fa   : > { %v8233_v2 = vpop.f32.mrf.mxu1 }
 0x3fb   : > { %8801 = vst [vmem:[#allocation35_spill] sm:$0xff] %v8233_v2 }
 0x3fc   : > { %v8235_v59 = vpop.f32.mrf.mxu1 }
 0x3fe   : > { %v8237_v3 = vpop.f32.mrf.mxu1 }
 0x3ff   : > { %8802 = vst [vmem:[#allocation36_spill] sm:$0xff] %v8237_v3 }
 0x400   : > { %v8239_v31 = vpop.f32.mrf.mxu1 }
 0x401   : > { %8803 = vst [vmem:[#allocation37_spill] sm:$0xff] %v8239_v31 }
 0x402   : > { %v8241_v34 = vpop.f32.mrf.mxu1 }
 0x403   : > { %8804 = vst [vmem:[#allocation38_spill] sm:$0xff] %v8241_v34 }
 0x404   : > { %v8243_v28 = vpop.f32.mrf.mxu1 }
 0x405   : > { %8805 = vst [vmem:[#allocation39_spill] sm:$0xff] %v8243_v28 }
 0x406   : > { %v8245_v48 = vpop.f32.mrf.mxu1 }
 0x407   : > { %8806 = vst [vmem:[#allocation40_spill] sm:$0xff] %v8245_v48 }
 0x408   : > { %v8247_v25 = vpop.f32.mrf.mxu1 }
 0x409   : > { %8807 = vst [vmem:[#allocation41_spill] sm:$0xff] %v8247_v25 }
 0x40a   : > { %v8249_v49 = vpop.f32.mrf.mxu1 }
 0x40b   : > { %8808 = vst [vmem:[#allocation42_spill] sm:$0xff] %v8249_v49 }
 0x40c   : > { %v8251_v58 = vpop.f32.mrf.mxu1 }
 0x40d   : > { %8809 = vst [vmem:[#allocation43_spill] sm:$0xff] %v8251_v58 }
 0x40e   : > { %v8253_v10 = vpop.f32.mrf.mxu1 }
 0x40f   : > { %8810 = vst [vmem:[#allocation44_spill] sm:$0xff] %v8253_v10 }
 0x410   : > { %v8255_v6 = vpop.f32.mrf.mxu1 }
 0x411   : > { %8811 = vst [vmem:[#allocation45_spill] sm:$0xff] %v8255_v6 }
 0x412   : > { %v8257_v15 = vpop.f32.mrf.mxu1 }
 0x413   : > { %8812 = vst [vmem:[#allocation46_spill] sm:$0xff] %v8257_v15 }
 0x414   : > { %v8259_v32 = vpop.f32.mrf.mxu1 }
 0x415   : > { %8813 = vst [vmem:[#allocation47_spill] sm:$0xff] %v8259_v32 }
 0x416   : > { %v8261_v8 = vpop.f32.mrf.mxu1 }
 0x417   : > { %8814 = vst [vmem:[#allocation48_spill] sm:$0xff] %v8261_v8 }
 0x418   : > { %v8263_v34 = vpop.f32.mrf.mxu1 }
 0x419   : > { %8815 = vst [vmem:[#allocation49_spill] sm:$0xff] %v8263_v34 }
 0x41a   : > { %v8265_v3 = vpop.f32.mrf.mxu1 }
 0x41b   : > { %8816 = vst [vmem:[#allocation50_spill] sm:$0xff] %v8265_v3 }
 0x41c   : > { %v8267_v48 = vpop.f32.mrf.mxu1 }
 0x41d   : > { %8817 = vst [vmem:[#allocation51_spill] sm:$0xff] %v8267_v48 }
 0x41e   : > { %v8269_v25 = vpop.f32.mrf.mxu1 }
 0x41f   : > { %8818 = vst [vmem:[#allocation52_spill] sm:$0xff] %v8269_v25 }
 0x420   : > { %v8271_v49 = vpop.f32.mrf.mxu1 }
 0x421   : > { %8819 = vst [vmem:[#allocation53_spill] sm:$0xff] %v8271_v49 }
 0x422   : > { %v8273_v58 = vpop.f32.mrf.mxu1 }
 0x423   : > { %8820 = vst [vmem:[#allocation54_spill] sm:$0xff] %v8273_v58 }
 0x424   : > { %v8276_v10 = vpop.f32.mrf.mxu1 }
 0x425   : > { %8821 = vst [vmem:[#allocation55_spill] sm:$0xff] %v8276_v10 }
 0x426   : > { %v8284_v25 = vpop.f32.mrf.mxu1 }
 0x427   : > { %8822 = vst [vmem:[#allocation56_spill] sm:$0xff] %v8284_v25 }
 0x428   : > { %v8287_v10 = vpop.f32.mrf.mxu1 }
 0x429   : > { %8823 = vst [vmem:[#allocation57_spill] sm:$0xff] %v8287_v10 }
 0x42a   : > { %v8291_v15 = vpop.f32.mrf.mxu1 }
 0x42b   : > { %8824 = vst [vmem:[#allocation58_spill] sm:$0xff] %v8291_v15 }
 0x42c   : > { %v8293_v32 = vpop.f32.mrf.mxu1 }
 0x42d   : > { %8825 = vst [vmem:[#allocation59_spill] sm:$0xff] %v8293_v32 }
 0x486   : > { %v6799_v3 = vpop.f32.mrf.mxu0 }
 0x487   : > { %v6366_v8 = vmul.f32 -1.442695, %v6799_v3  ;;  %4826 = vst [vmem:[%s8281_s30 + $0x20] sm:$0xff] %v6799_v3 }
 0x488   : > { %v4809_v48 = vpop.f32.mrf.mxu0 }
 0x489   : > { %7001 = vpow2.f32 %v6366_v8  ;;  %4824 = vst [vmem:[%s8281_s30] sm:$0xff] %v4809_v48  ;;  %v6364_v34 = vmul.f32 -1.442695, %v4809_v48 }
 0x48a   : > { %v6800_v58 = vpop.f32.mrf.mxu0 }
 0x48b   : > { %4827 = vst [vmem:[%s8281_s30 + $0x30] sm:$0xff] %v6800_v58  ;;  %7003 = vpow2.f32 %v6364_v34 }
 0x48c   : > { %v4812_v49 = vpop.f32.mrf.mxu0 }
 0x48d   : > { %4825 = vst [vmem:[%s8281_s30 + $0x10] sm:$0xff] %v4812_v49 }
 0x496   : > { %v7002_v8 = vpop.eup %7001 }
 0x497   : > { %v4842_v6 = vadd.f32 1.0, %v7002_v8 }
 0x498   : > { %v7004_v47 = vpop.eup %7003 }
 0x499   : > { %7005 = vrcp.f32 %v4842_v6  ;;  %v4965_v25 = vpop.f32.mrf.mxu1  ;;  %v4840_v8 = vadd.f32 1.0, %v7004_v47 }
 0x49a   : > { %v4978_v28 = vrot.slane %v4965_v25, %v8094_v16 }
 0x49b   : > { %v6811_v31 = vpop.f32.mrf.mxu1  ;;  %7007 = vrcp.f32 %v4840_v8 }
 0x49c   : > { %v4979_v2 = vcombine.high %v4978_v28, %v4978_v28  ;;  %v4986_v3 = vrot.slane %v4978_v28, %v8094_v16  ;;  %6373 = vst.sshfl [vmem:[%s8281_s30 + $0x8] sm:$0x1 pattern:$0x73625140] %v4978_v28  ;;  %v6367_v31 = vmul.f32 -1.442695, %v6800_v58 }
 0x49d   : > { %v4968_v48 = vpop.f32.mrf.mxu1  ;;  %v7048_v28 = vmov 17   ;;  %v7050_v58 = vmov 20  }
 0x49e   : > { %v4993_v10 = vrot.slane %v4979_v2, %v8094_v16  ;;  %v4994_v15 = vcombine.high %v4986_v3, %v4986_v3  ;;  %6374 = vst.sshfl [vmem:[%s8281_s30 + $0x18] sm:$0x1 pattern:$0x73625140] %v4979_v2  ;;  %7009 = vpow2.f32 %v6367_v31  ;;  %v7049_v2 = vmov 19  }
 0x49f   : > { %v6812_v34 = vpop.f32.mrf.mxu1  ;;  %v8827_v3 = vmov 18  }
 0x4a0   : > { %v4995_v32 = vcombine.high %v4993_v10, %v4993_v10  ;;  %5002 = vst [vmem:[%s8281_s30 + $0x28] sm:$0x1] %v4994_v15  ;;  %v8826_v10 = vmov 16   ;;  %v6365_v15 = vmul.f32 -1.442695, %v4812_v49 }
 0x4a2   : > { %5003 = vst [vmem:[%s8281_s30 + $0x38] sm:$0x1] %v4995_v32  ;;  %7011 = vpow2.f32 %v6365_v15 }
 0x4a6   : > { %v8302_v6 = vpop.eup %7005 }
 0x4a7   : > { %5445 = vperm.xlu0 %6910, %v8302_v6   ;;  %5083 = vperm.xlu1 %6908, %v8302_v6  }
 0x4a8   : > { %v7008_v25 = vpop.eup %7007 }
 0x4ab   : > { %6909 = vset.pattern.permute.xlu1 %v7048_v28  ;;  %v7010_v47 = vpop.eup %7009 }
 0x4ac   : > { %5268 = vperm.xlu1 %6909, %v8302_v6   ;;  %v4843_v32 = vadd.f32 1.0, %v7010_v47 }
 0x4ae   : > { %7013 = vrcp.f32 %v4843_v32  ;;  %v8828_v32 = vld [vmem:[#allocation7_spill] sm:$0xff] }
 0x4af   : > { %v7012_v48 = vpop.eup %7011 }
 0x4b0   : > { %6911 = vset.pattern.permute.xlu1 %v7049_v2  ;;  %v4841_v49 = vadd.f32 1.0, %v7012_v48 }
 0x4b1   : > { %5622 = vperm.xlu1 %6911, %v8302_v6  }
 0x4b2   : > { %7015 = vrcp.f32 %v4841_v49 }
 0x4b5   : > { %6912 = vset.pattern.permute.xlu1 %v8826_v10 }
 0x4b6   : > { %5073 = vperm.xlu1 %6912, %v7008_v25  }
 0x4ba   : > { %6913 = vset.pattern.permute.xlu1 %v7048_v28 }
 0x4bb   : > { %5260 = vperm.xlu1 %6913, %v7008_v25   ;;  %v8313_v34 = vpop.eup %7013 }
 0x4bf   : > { %6914 = vset.pattern.permute.xlu1 %v8827_v3 }
 0x4c0   : > { %5437 = vperm.xlu1 %6914, %v7008_v25  }
 0x4c4   : > { %6915 = vset.pattern.permute.xlu1 %v7049_v2 }
 0x4c5   : > { %5614 = vperm.xlu1 %6915, %v7008_v25   ;;  %4267 = vxpose.xlu0.b32.start [1/16] (narrow) %v8083_v21, 8  ;;  %v7051_v21 = vmov 21  }
 0x4c9   : > { %6916 = vset.pattern.permute.xlu1 %v7050_v58  ;;  %4268 = vxpose.xlu0.b32.cont [2/16] (narrow) %v8098_v39, 8  ;;  %v6973_v39 = vld [vmem:[%s8752_s7 + $0x30] sm:$0xff]  }
 0x4ca   : > { %5791 = vperm.xlu1 %6916, %v7008_v25  }
 0x4cd   : > { %4269 = vxpose.xlu0.b32.cont [3/16] (narrow) %v8077_v1, 8  ;;  %v7016_v1 = vpop.eup %7015 }
 0x4ce   : > { %6917 = vset.pattern.permute.xlu1 %v8826_v10 }
 0x4cf   : > { %5088 = vperm.xlu1 %6917, %v8313_v34  }
 0x4d1   : > { %4270 = vxpose.xlu0.b32.cont [4/16] (narrow) %v8089_v45, 8  ;;  %v6971_v45 = vld [vmem:[%s8752_s7 + $0x38] sm:$0xff]  }
 0x4d2   : > { %6826 = vmatpush3.bf16.msra.mxu1 %v6971_v45 }
 0x4d3   : > { %6918 = vset.pattern.permute.xlu1 %v7048_v28  ;;  %6827 = vmatprep.subr.bf16.mxu1 %v8798_v23 }
 0x4d4   : > { %5272 = vperm.xlu1 %6918, %v8313_v34  }
 0x4d5   : > { %4271 = vxpose.xlu0.b32.cont [5/16] (narrow) %v8115_v53, 8  ;;  %v8370_v53 = vpop.permute.xlu1 %5044 }
 0x4d6   : > { %6828 = vmatpush3.bf16.msra.mxu1 %v6973_v39  ;;  %vm5067_vm7 = vcmp.gt.f32.partialorder %v8370_v53, 0.5 }
 0x4d7   : > { %6829 = vmatprep.subr.bf16.mxu1 %v8798_v23 }
 0x4d8   : > { %6919 = vset.pattern.permute.xlu1 %v8827_v3 }
 0x4d9   : > { %5449 = vperm.xlu1 %6919, %v8313_v34   ;;  %4272 = vxpose.xlu0.b32.cont [6/16] (narrow) %v8120_v63, 8  ;;  %v8380_v63 = vpop.permute.xlu1 %5051 }
 0x4da   : > { %vm5068_vm10 = vcmp.gt.f32.partialorder %v8380_v63, 0.5  ;;  %v6987_v63 = vld [vmem:[%s8752_s7 + $0xb8] sm:$0xff]  }
 0x4dd   : > { %6920 = vset.pattern.permute.xlu1 %v7049_v2  ;;  %4273 = vxpose.xlu0.b32.cont [7/16] (narrow) %v8110_v29, 8  ;;  %v6975_v29 = vld [vmem:[%s8752_s7 + $0x28] sm:$0xff]  }
 0x4de   : > { %5626 = vperm.xlu1 %6920, %v8313_v34   ;;  %6830 = vmatpush3.bf16.msra.mxu1 %v6975_v29 }
 0x4df   : > { %6831 = vmatprep.subr.bf16.mxu1 %v8798_v23 }
 0x4e1   : > { %4274 = vxpose.xlu0.b32.cont [8/16] (narrow) %v8118_v61, 8  ;;  %v6976_v61 = vld [vmem:[%s8752_s7 + $0x20] sm:$0xff]  }
 0x4e2   : > { %6921 = vset.pattern.permute.xlu1 %v8826_v10  ;;  %6832 = vmatpush3.bf16.msra.mxu1 %v6976_v61 }
 0x4e3   : > { %5078 = vperm.xlu1 %6921, %v7016_v1   ;;  %6849 = vmatprep.subr.bf16.mxu1 %v8798_v23 }
 0x4e5   : > { %4275 = vxpose.xlu0.b32.cont [9/16] (narrow) %v8128_v42, 8 }
 0x4e7   : > { %6922 = vset.pattern.permute.xlu1 %v7048_v28 }
 0x4e8   : > { %5264 = vperm.xlu1 %6922, %v7016_v1  }
 0x4e9   : > { %4276 = vxpose.xlu0.b32.cont [10/16] (narrow) %v8149_v46, 8  ;;  %v6969_v46 = vld [vmem:[%s8752_s7 + $0x18] sm:$0xff]  }
 0x4ea   : > { %6814 = vmatpush3.bf16.msra.mxu0 %v6969_v46 }
 0x4eb   : > { %6815 = vmatprep.subr.bf16.mxu0 %v8798_v23 }
 0x4ec   : > { %6923 = vset.pattern.permute.xlu1 %v7051_v21 }
 0x4ed   : > { %5968 = vperm.xlu1 %6923, %v7008_v25   ;;  %4277 = vxpose.xlu0.b32.cont [11/16] (narrow) %v8122_v57, 8  ;;  %v8384_v57 = vpop.permute.xlu1 %5058 }
 0x4ee   : > { %vm5069_vm6 = vcmp.gt.f32.partialorder %v8384_v57, 0.5 }
 0x4f1   : > { %6924 = vset.pattern.permute.xlu1 %v7050_v58  ;;  %4278 = vxpose.xlu0.b32.cont [12/16] (narrow) %v8138_v9, 8  ;;  %v8388_v42 = vpop.permute.xlu1 %5065 }
 0x4f2   : > { %5799 = vperm.xlu1 %6924, %v8302_v6   ;;  %vm5070_vm9 = vcmp.gt.f32.partialorder %v8388_v42, 0.5 }
 0x4f5   : > { %4279 = vxpose.xlu0.b32.cont [13/16] (narrow) %v8156_v13, 8  ;;  %v6970_v13 = vld [vmem:[%s8752_s7 + $0x10] sm:$0xff]  }
 0x4f6   : > { %6925 = vset.pattern.permute.xlu1 %v8827_v3  ;;  %6816 = vmatpush3.bf16.msra.mxu0 %v6970_v13  ;;  %v8829_v13 = vld [vmem:[#allocation8_spill] sm:$0xff] }
 0x4f7   : > { %5441 = vperm.xlu1 %6925, %v7016_v1   ;;  %6817 = vmatprep.subr.bf16.mxu0 %v8798_v23 }
 0x4f9   : > { %4280 = vxpose.xlu0.b32.cont [14/16] (narrow) %v8162_v18, 8 }
 0x4fb   : > { %6926 = vset.pattern.permute.xlu1 %v7049_v2 }
 0x4fc   : > { %5618 = vperm.xlu1 %6926, %v7016_v1  }
 0x4fd   : > { %4281 = vxpose.xlu0.b32.cont [15/16] (narrow) %v8154_v7, 8  ;;  %v6972_v7 = vld [vmem:[%s8752_s7 + $0x8] sm:$0xff]  }
 0x4fe   : > { %6818 = vmatpush3.bf16.msra.mxu0 %v6972_v7 }
 0x4ff   : > { %6819 = vmatprep.subr.bf16.mxu0 %v8798_v23 }
 0x500   : > { %6927 = vset.pattern.permute.xlu1 %v7051_v21 }
 0x501   : > { %5976 = vperm.xlu1 %6927, %v8302_v6   ;;  %4282 = vxpose.xlu0.b32.end [16/16] (narrow) %v8158_v30, 8  ;;  %v6974_v30 = vld [vmem:[%s8752_s7] sm:$0xff]  }
 0x502   : > { %6820 = vmatpush3.bf16.msra.mxu0 %v6974_v30 }
 0x503   : > { %6837 = vmatprep.subr.bf16.mxu0 %v8798_v23 }
 0x505   : > { %6928 = vset.pattern.permute.xlu1 %v7050_v58  ;;  %4299 = vxpose.xlu0.b32.start [1/16] (narrow) %v8170_v52, 8 }
 0x506   : > { %5803 = vperm.xlu1 %6928, %v8313_v34  }
 0x509   : > { %4300 = vxpose.xlu0.b32.cont [2/16] (narrow) %v8174_v40, 8 }
 0x50a   : > { %5795 = vperm.xlu1 %6928, %v7016_v1  }
 0x50d   : > { %4301 = vxpose.xlu0.b32.cont [3/16] (narrow) %v8166_v35, 8 }
 0x50e   : > { %6929 = vset.pattern.permute.xlu1 %v7051_v21 }
 0x50f   : > { %5972 = vperm.xlu1 %6929, %v7016_v1  }
 0x511   : > { %4302 = vxpose.xlu0.b32.cont [4/16] (narrow) %v8172_v44, 8 }
 0x513   : > { %5980 = vperm.xlu1 %6929, %v8313_v34  }
 0x515   : > { %4303 = vxpose.xlu0.b32.cont [5/16] (narrow) %v8178_v26, 8 }
 0x519   : > { %4304 = vxpose.xlu0.b32.cont [6/16] (narrow) %v8182_v51, 8 }
 0x51d   : > { %4305 = vxpose.xlu0.b32.cont [7/16] (narrow) %v8176_v5, 8 }
 0x521   : > { %4306 = vxpose.xlu0.b32.cont [8/16] (narrow) %v8180_v11, 8 }
 0x522   : > { %v5084_v9 = vpop.permute.xlu1 %5083  ;;  %v5446_v26 = vpop.permute.xlu0 %5445 }
 0x523   : > { %v5454_v51 = vmul.f32 %v8124_v12, %v5446_v26 }
 0x525   : > { %4307 = vxpose.xlu0.b32.cont [9/16] (narrow) %v8186_v17, 8 }
 0x527   : > { %v5269_v18 = vpop.permute.xlu1 %5268 }
 0x529   : > { %4308 = vxpose.xlu0.b32.cont [10/16] (narrow) %v8190_v33, 8 }
 0x52c   : > { %v5623_v35 = vpop.permute.xlu1 %5622 }
 0x52d   : > { %4309 = vxpose.xlu0.b32.cont [11/16] (narrow) %v8184_v27, 8  ;;  %v5093_v27 = vmul.f32 %v8124_v12, %v5084_v9  ;;  %v5631_v25 = vmul.f32 %v8124_v12, %v5623_v35 }
 0x52f   : > { %v5635_v49 = vsel %vm5069_vm6, %v5631_v25, -1e+30 }
 0x530   : > { %v5651_v29 = vsel %vm617_vm2, %v5635_v49, -inf }
 0x531   : > { %v5074_v52 = vpop.permute.xlu1 %5073  ;;  %4310 = vxpose.xlu0.b32.cont [12/16] (narrow) %v8188_v56, 8  ;;  %v5105_v56 = vsel %vm5069_vm6, %v5093_v27, -1e+30  ;;  %v5652_v27 = vrot.slane %v5651_v29, 4 }
 0x535   : > { %4311 = vxpose.xlu0.b32.cont [13/16] (narrow) %v8194_v19, 8  ;;  %v5121_v19 = vsel %vm617_vm2, %v5105_v56, -inf }
 0x536   : > { %v5261_v44 = vpop.permute.xlu1 %5260  ;;  %v5122_v6 = vrot.slane %v5121_v19, 4 }
 0x538   : > { %v5123_v58 = vmax.f32 %v5121_v19, %v5122_v6  ;;  %v8834_v6 = vld [vmem:[#allocation35_spill] sm:$0xff] }
 0x539   : > { %4312 = vxpose.xlu0.b32.cont [14/16] (narrow) %v8198_v62, 8 }
 0x53a   : > { %v5124_v7 = vrot.slane %v5123_v58, 2 }
 0x53b   : > { %v8397_v40 = vpop.permute.xlu1 %5437 }
 0x53c   : > { %4331 = vxpose.xlu1.b32.start [1/16] (narrow) %v8027_v22, 8  ;;  %v5277_v22 = vmul.f32 %v8124_v12, %v5269_v18  ;;  %v5452_v9 = vmul.f32 %v8130_v41, %v8397_v40 }
 0x53d   : > { %4313 = vxpose.xlu0.b32.cont [15/16] (narrow) %v8192_v50, 8  ;;  %v5275_v50 = vmul.f32 %v8130_v41, %v5261_v44  ;;  %v8830_v44 = vld [vmem:[#allocation10_spill] sm:$0xff] }
 0x53e   : > { %v5281_v33 = vsel %vm5069_vm6, %v5277_v22, -1e+30  ;;  %v8831_v22 = vld [vmem:[#allocation34_spill] sm:$0xff] }
 0x53f   : > { %v5297_v62 = vsel %vm617_vm2, %v5281_v33, -inf }
 0x540   : > { %v8401_v5 = vpop.permute.xlu1 %5614  ;;  %4332 = vxpose.xlu1.b32.cont [2/16] (narrow) %v8031_v4, 8  ;;  %v5091_v4 = vmul.f32 %v8130_v41, %v5074_v52  ;;  %v5298_v28 = vrot.slane %v5297_v62, 4 }
 0x541   : > { %4314 = vxpose.xlu0.b32.end [16/16] (narrow) %v8196_v43, 8  ;;  %v5629_v56 = vmul.f32 %v8130_v41, %v8401_v5 }
 0x542   : > { %v5103_v43 = vsel %vm5067_vm7, %v5091_v4, -1e+30  ;;  %v5299_v48 = vmax.f32 %v5297_v62, %v5298_v28 }
 0x544   : > { %4333 = vxpose.xlu1.b32.cont [3/16] (narrow) %v8025_v0, 8  ;;  %v5458_v0 = vsel %vm5069_vm6, %v5454_v51, -1e+30  ;;  %v5125_v51 = vmax.f32 %v5123_v58, %v5124_v7 }
 0x545   : > { %v8406_v11 = vpop.permute.xlu1 %5791  ;;  %4363 = vxpose.xlu0.b32.start [1/16] (narrow) %v8205_v55, 8 }
 0x548   : > { %4334 = vxpose.xlu1.b32.cont [4/16] (narrow) %v8029_v20, 8 }
 0x549   : > { %4364 = vxpose.xlu0.b32.cont [2/16] (narrow) %v8220_v54, 8  ;;  %v5474_v54 = vsel %vm617_vm2, %v5458_v0, -inf }
 0x54a   : > { %v5089_v17 = vpop.permute.xlu1 %5088  ;;  %v5475_v8 = vrot.slane %v5474_v54, 4 }
 0x54b   : > { %v5094_v20 = vmul.f32 %v8134_v60, %v5089_v17 }
 0x54c   : > { %4335 = vxpose.xlu1.b32.cont [5/16] (narrow) %v8035_v24, 8  ;;  %v5279_v24 = vsel %vm5067_vm7, %v5275_v50, -1e+30  ;;  %v5476_v3 = vmax.f32 %v5474_v54, %v5475_v8  ;;  %v8832_v50 = vld [vmem:[#allocation33_spill] sm:$0xff] }
 0x54d   : > { %4365 = vxpose.xlu0.b32.cont [3/16] (narrow) %v8200_v36, 8  ;;  %v5107_v36 = vsel %vm617_vm2, %v5103_v43, -inf  ;;  %v5106_v31 = vsel %vm5070_vm9, %v5094_v20, -1e+30  ;;  %v5283_v10 = vsel %vm617_vm2, %v5279_v24, -inf  ;;  %v8833_v43 = vld [vmem:[#allocation12_spill] sm:$0xff]  ;;  %v5653_v24 = vmax.f32 %v5651_v29, %v5652_v27 }
 0x54e   : > { %v5108_v47 = vrot.slane %v5107_v36, 4  ;;  %v5128_v15 = vsel %vm617_vm2, %v5106_v31, -inf  ;;  %v5284_v34 = vrot.slane %v5283_v10, 4  ;;  %v5477_v45 = vrot.slane %v5476_v3, 2 }
 0x54f   : > { %v5273_v55 = vpop.permute.xlu1 %5272  ;;  %v5129_v1 = vrot.slane %v5128_v15, 4 }
 0x550   : > { %4336 = vxpose.xlu1.b32.cont [6/16] (narrow) %v8039_v37, 8  ;;  %v5278_v2 = vmul.f32 %v8134_v60, %v5273_v55  ;;  %v5109_v46 = vmax.f32 %v5107_v36, %v5108_v47  ;;  %v5285_v61 = vmax.f32 %v5283_v10, %v5284_v34  ;;  %v5478_v26 = vmax.f32 %v5476_v3, %v5477_v45 }
 0x551   : > { %4366 = vxpose.xlu0.b32.cont [4/16] (narrow) %v8211_v38, 8  ;;  %v5130_v18 = vmax.f32 %v5128_v15, %v5129_v1  ;;  %v5126_v55 = vrot.slane %v5125_v51, 1 }
 0x552   : > { %v5282_v38 = vsel %vm5070_vm9, %v5278_v2, -1e+30  ;;  %v5110_v35 = vrot.slane %v5109_v46, 2  ;;  %v5286_v17 = vrot.slane %v5285_v61, 2  ;;  %v5479_v62 = vrot.slane %v5478_v26, 1 }
 0x553   : > { %v5304_v39 = vsel %vm617_vm2, %v5282_v38, -inf  ;;  %v5131_v40 = vrot.slane %v5130_v18, 2  ;;  %v5633_v2 = vsel %vm5067_vm7, %v5629_v56, -1e+30  ;;  %v5127_v34 = vmax.f32 %v5125_v51, %v5126_v55 }
 0x554   : > { %v5450_v37 = vpop.permute.xlu1 %5449  ;;  %4337 = vxpose.xlu1.b32.cont [7/16] (narrow) %v8828_v32, 8  ;;  %v5305_v52 = vrot.slane %v5304_v39, 4  ;;  %v5111_v54 = vmax.f32 %v5109_v46, %v5110_v35  ;;  %v5287_v36 = vmax.f32 %v5285_v61, %v5286_v17  ;;  %v5654_v38 = vrot.slane %v5653_v24, 2  ;;  %v8836_v46 = vld [vmem:[#allocation37_spill] sm:$0xff] }
 0x555   : > { %4367 = vxpose.xlu0.b32.cont [5/16] (narrow) %v8230_v14, 8  ;;  %v5300_v14 = vrot.slane %v5299_v48, 2  ;;  %v5455_v33 = vmul.f32 %v8134_v60, %v5450_v37  ;;  %v5132_v25 = vmax.f32 %v5130_v18, %v5131_v40  ;;  %v5637_v45 = vsel %vm617_vm2, %v5633_v2, -inf }
 0x556   : > { %v5306_v19 = vmax.f32 %v5304_v39, %v5305_v52  ;;  %v5112_v37 = vrot.slane %v5111_v54, 1  ;;  %v8489_v27 = vmax.f32 %v5478_v26, %v5479_v62  ;;  %v8839_v62 = vld [vmem:[#allocation14_spill] sm:$0xff] }
 0x557   : > { %v5301_v4 = vmax.f32 %v5299_v48, %v5300_v14  ;;  %v5459_v10 = vsel %vm5070_vm9, %v5455_v33, -1e+30  ;;  %v8835_v48 = vld [vmem:[#allocation9_spill] sm:$0xff] }
 0x558   : > { %4338 = vxpose.xlu1.b32.cont [8/16] (narrow) %v8829_v13, 8  ;;  %v5307_v32 = vrot.slane %v5306_v19, 2  ;;  %v5288_v13 = vrot.slane %v5287_v36, 1  ;;  %v5481_v7 = vsel %vm617_vm2, %v5459_v10, -inf  ;;  %v8840_v10 = vld [vmem:[#allocation36_spill] sm:$0xff] }
 0x559   : > { %v5627_v30 = vpop.permute.xlu1 %5626  ;;  %4368 = vxpose.xlu0.b32.cont [6/16] (narrow) %v8235_v59, 8  ;;  %v5456_v59 = vsel %vm5067_vm7, %v5452_v9, -1e+30  ;;  %v5302_v5 = vrot.slane %v5301_v4, 1  ;;  %v5113_v9 = vmax.f32 %v5111_v54, %v5112_v37  ;;  %v5482_v17 = vrot.slane %v5481_v7, 4 }
 0x55a   : > { %v5460_v31 = vsel %vm617_vm2, %v5456_v59, -inf  ;;  %v5632_v3 = vmul.f32 %v8134_v60, %v5627_v30  ;;  %v5133_v30 = vrot.slane %v5132_v25, 1  ;;  %v5308_v18 = vmax.f32 %v5306_v19, %v5307_v32 }
 0x55b   : > { %v5461_v49 = vrot.slane %v5460_v31, 4  ;;  %v5303_v14 = vmax.f32 %v5301_v4, %v5302_v5  ;;  %v8838_v4 = vld [vmem:[#allocation39_spill] sm:$0xff]  ;;  %v5289_v56 = vmax.f32 %v5287_v36, %v5288_v13  ;;  %v5483_v2 = vmax.f32 %v5481_v7, %v5482_v17  ;;  %v8842_v7 = vld [vmem:[#allocation38_spill] sm:$0xff] }
 0x55c   : > { %4339 = vxpose.xlu1.b32.cont [9/16] (narrow) %v8830_v44, 8  ;;  %v5636_v35 = vsel %vm5070_vm9, %v5632_v3, -1e+30  ;;  %v8837_v44 = vld [vmem:[#allocation11_spill] sm:$0xff]  ;;  %v5134_v54 = vmax.f32 %v5132_v25, %v5133_v30 }
 0x55d   : > { %4369 = vxpose.xlu0.b32.cont [7/16] (narrow) %v8831_v22, 8  ;;  %v5638_v22 = vrot.slane %v5637_v45, 4  ;;  %v5462_v40 = vmax.f32 %v5460_v31, %v5461_v49  ;;  %v5658_v19 = vsel %vm617_vm2, %v5636_v35, -inf  ;;  %v5313_v55 = vpack.c.bf16 %v5303_v14, %v5303_v14 }
 0x55e   : > { %v5079_v0 = vpop.permute.xlu1 %5078  ;;  %v5138_v3 = vpack.c.bf16 %v5134_v54, %v5134_v54  ;;  %v5484_v13 = vrot.slane %v5483_v2, 2  ;;  %v6977_v54 = vld [vmem:[%s8752_s7 + $0x58] sm:$0xff]  }
 0x55f   : > { %v5092_v20 = vmul.f32 %v8832_v50, %v5079_v0  ;;  %v5137_v0 = vpack.c.bf16 %v5127_v34, %v5127_v34  ;;  %v5639_v5 = vmax.f32 %v5637_v45, %v5638_v22  ;;  %v5463_v25 = vrot.slane %v5462_v40, 2 }
 0x560   : > { %4340 = vxpose.xlu1.b32.cont [10/16] (narrow) %v8833_v43, 8 }
 0x561   : > { %v5104_v8 = vsel %vm5068_vm10, %v5092_v20, -1e+30  ;;  %4370 = vxpose.xlu0.b32.cont [8/16] (narrow) %v8834_v6, 8  ;;  %v8492_v20 = vmax.f32 %v5653_v24, %v5654_v38  ;;  %v5309_v6 = vrot.slane %v5308_v18, 1  ;;  %v5311_v24 = vpack.c.bf16 %v5289_v56, %v5289_v56 }
 0x562   : > { %v5114_v28 = vsel %vm617_vm2, %v5104_v8, -inf  ;;  %v5135_v8 = vpack.c.bf16 %v5113_v9, %v5113_v9  ;;  %v5153_v37 = vunpack.c.l.b16 %v5137_v0  ;;  %v5464_v14 = vmax.f32 %v5462_v40, %v5463_v25  ;;  %v8845_v25 = vld [vmem:[#allocation15_spill] sm:$0xff] }
 0x563   : > { %v5115_v47 = vrot.slane %v5114_v28, 4  ;;  %v5265_v15 = vpop.permute.xlu1 %5264  ;;  %v5656_v32 = vrot.slane %v8492_v20, 1  ;;  %v5310_v38 = vmax.f32 %v5308_v18, %v5309_v6  ;;  %v5154_v9 = vunpack.c.l.b16 %v5138_v3 }
 0x564   : > { %v5276_v58 = vmul.f32 %v8832_v50, %v5265_v15  ;;  %4341 = vxpose.xlu1.b32.cont [11/16] (narrow) %v8835_v48, 8  ;;  %v5330_v48 = vunpack.c.l.b16 %v5313_v55  ;;  %v5151_v34 = vunpack.c.l.b16 %v5135_v8  ;;  %v5485_v56 = vmax.f32 %v5483_v2, %v5484_v13 }
 0x565   : > { %v5116_v1 = vmax.f32 %v5114_v28, %v5115_v47  ;;  %4371 = vxpose.xlu0.b32.cont [9/16] (narrow) %v8836_v46, 8  ;;  %v5806_v28 = vmul.f32 %v8130_v41, %v8406_v11  ;;  %v5659_v47 = vrot.slane %v5658_v19, 4  ;;  %v5640_v11 = vrot.slane %v5639_v5, 2 }
 0x566   : > { %v5280_v39 = vsel %vm5068_vm10, %v5276_v58, -1e+30  ;;  %v5314_v22 = vpack.c.bf16 %v5310_v38, %v5310_v38 }
 0x567   : > { %v5117_v29 = vrot.slane %v5116_v1, 2  ;;  %v5290_v61 = vsel %vm617_vm2, %v5280_v39, -inf  ;;  %v5810_v46 = vsel %vm5067_vm7, %v5806_v28, -1e+30  ;;  %v5328_v39 = vunpack.c.l.b16 %v5311_v24 }
 0x568   : > { %v5291_v52 = vrot.slane %v5290_v61, 4  ;;  %4342 = vxpose.xlu1.b32.cont [12/16] (narrow) %v8837_v44, 8  ;;  %v8487_v51 = vpop.permute.xlu1 %5968  ;;  %v5660_v30 = vmax.f32 %v5658_v19, %v5659_v47  ;;  %v5814_v44 = vsel %vm617_vm2, %v5810_v46, -inf  ;;  %v5641_v0 = vmax.f32 %v5639_v5, %v5640_v11  ;;  %v8844_v19 = vld [vmem:[#allocation41_spill] sm:$0xff] }
 0x569   : > { %v5118_v59 = vmax.f32 %v5116_v1, %v5117_v29  ;;  %4372 = vxpose.xlu0.b32.cont [10/16] (narrow) %v8838_v4, 8  ;;  %v8841_v1 = vld [vmem:[#allocation16_spill] sm:$0xff] }
 0x56a   : > { %v5292_v33 = vmax.f32 %v5290_v61, %v5291_v52  ;;  %v5642_v47 = vrot.slane %v5641_v0, 1 }
 0x56b   : > { %v5119_v43 = vrot.slane %v5118_v59, 1 }
 0x56c   : > { %v5293_v26 = vrot.slane %v5292_v33, 2  ;;  %4343 = vxpose.xlu1.b32.cont [13/16] (narrow) %v8839_v62, 8  ;;  %v5983_v62 = vmul.f32 %v8130_v41, %v8487_v51  ;;  %v6978_v51 = vld [vmem:[%s8752_s7 + $0x50] sm:$0xff]  }
 0x56d   : > { %v5120_v36 = vmax.f32 %v5118_v59, %v5119_v43  ;;  %v5800_v31 = vpop.permute.xlu1 %5799  ;;  %4373 = vxpose.xlu0.b32.cont [11/16] (narrow) %v8840_v10, 8  ;;  %v8843_v59 = vld [vmem:[#allocation13_spill] sm:$0xff]  ;;  %v5661_v43 = vrot.slane %v5660_v30, 2 }
 0x56e   : > { %v5294_v15 = vmax.f32 %v5292_v33, %v5293_v26  ;;  %v5808_v18 = vmul.f32 %v8124_v12, %v5800_v31  ;;  %v5465_v26 = vrot.slane %v5464_v14, 1  ;;  %v5331_v31 = vunpack.c.l.b16 %v5314_v22 }
 0x56f   : > { %v5136_v58 = vpack.c.bf16 %v5120_v36, %v5120_v36  ;;  %v5815_v36 = vrot.slane %v5814_v44, 4  ;;  %v5662_v3 = vmax.f32 %v5660_v30, %v5661_v43  ;;  %v8847_v30 = vld [vmem:[#allocation18_spill] sm:$0xff] }
 0x570   : > { %v5295_v49 = vrot.slane %v5294_v15, 1  ;;  %4344 = vxpose.xlu1.b32.cont [14/16] (narrow) %v8841_v1, 8  ;;  %v5812_v5 = vsel %vm5069_vm6, %v5808_v18, -1e+30  ;;  %v5987_v1 = vsel %vm5067_vm7, %v5983_v62, -1e+30  ;;  %v5490_v18 = vpack.c.bf16 %v8489_v27, %v8489_v27 }
 0x571   : > { %v5152_v45 = vunpack.c.l.b16 %v5136_v58  ;;  %4374 = vxpose.xlu0.b32.cont [12/16] (narrow) %v8842_v7, 8  ;;  %v5828_v58 = vsel %vm617_vm2, %v5812_v5, -inf  ;;  %v5816_v7 = vmax.f32 %v5814_v44, %v5815_v36  ;;  %v5991_v44 = vsel %vm617_vm2, %v5987_v1, -inf }
 0x572   : > { %v5296_v29 = vmax.f32 %v5294_v15, %v5295_v49  ;;  %v5442_v61 = vpop.permute.xlu1 %5441  ;;  %v5486_v15 = vrot.slane %v5485_v56, 1  ;;  %v8846_v49 = vld [vmem:[#allocation43_spill] sm:$0xff] }
 0x573   : > { %v5155_v35 = vsel %vm950_vm3, %v5152_v45, %v5151_v34  ;;  %v5453_v52 = vmul.f32 %v8832_v50, %v5442_v61  ;;  %v5466_v45 = vmax.f32 %v5464_v14, %v5465_v26  ;;  %v8548_v61 = vmax.f32 %v8492_v20, %v5656_v32  ;;  %v6980_v14 = vld [vmem:[%s8752_s7 + $0x48] sm:$0xff]  }
 0x574   : > { %v5312_v17 = vpack.c.bf16 %v5296_v29, %v5296_v29  ;;  %4345 = vxpose.xlu1.b32.cont [15/16] (narrow) %v8843_v59, 8  ;;  %v5156_v4 = vsel %vm952_vm4, %v5153_v37, %v5155_v35  ;;  %v5487_v20 = vmax.f32 %v5485_v56, %v5486_v15  ;;  %v5663_v32 = vrot.slane %v5662_v3, 1 }
 0x575   : > { %v5457_v40 = vsel %vm5068_vm10, %v5453_v52, -1e+30  ;;  %v5157_v33 = vsel %vm954_vm5, %v5154_v9, %v5156_v4  ;;  %4375 = vxpose.xlu0.b32.cont [13/16] (narrow) %v8844_v19, 8  ;;  %v5829_v9 = vrot.slane %v5828_v58, 4  ;;  %v5643_v52 = vmax.f32 %v5641_v0, %v5642_v47 }
 0x576   : > { %v5329_v55 = vunpack.c.l.b16 %v5312_v17  ;;  %v5467_v8 = vsel %vm617_vm2, %v5457_v40, -inf  ;;  %v5158_v6 = vpack.c.b16 %v5157_v33, %v5157_v33  ;;  %v5488_v27 = vpack.c.bf16 %v5466_v45, %v5466_v45  ;;  %v8848_v33 = vld [vmem:[#allocation20_spill] sm:$0xff] }
 0x577   : > { %v5468_v28 = vrot.slane %v5467_v8, 4  ;;  %v5619_v2 = vpop.permute.xlu1 %5618  ;;  %v5817_v4 = vrot.slane %v5816_v7, 2  ;;  %v5667_v56 = vpack.c.bf16 %v8548_v61, %v8548_v61  ;;  %v5992_v19 = vrot.slane %v5991_v44, 4 }
 0x578   : > { %v5332_v10 = vsel %vm950_vm3, %v5329_v55, %v5328_v39  ;;  %v5630_v24 = vmul.f32 %v8832_v50, %v5619_v2  ;;  %4346 = vxpose.xlu1.b32.end [16/16] (narrow) %v8845_v25, 8  ;;  %6822 = vmatmul.mubr.msk.bf16.vlgmr.msra.gmra.mxu0 %vm617_vm2, %v5158_v6  ;;  %v5830_v57 = vmax.f32 %v5828_v58, %v5829_v9  ;;  %v5507_v6 = vunpack.c.l.b16 %v5490_v18  ;;  %v8852_v9 = vld [vmem:[#allocation19_spill] sm:$0xff] }
 0x579   : > { %v5469_v37 = vmax.f32 %v5467_v8, %v5468_v28  ;;  %v5333_v41 = vsel %vm952_vm4, %v5330_v48, %v5332_v10  ;;  %6838 = vmatpush3.bf16.msra.mxu0 %v6977_v54  ;;  %6845 = vmatprep.mubr.msk.bf16.mxu0 %vm7044_vm8, %v8798_v23  ;;  %v6979_v48 = vld [vmem:[%s8752_s7 + $0x78] sm:$0xff]   ;;  %v6982_v8 = vld [vmem:[%s8752_s7 + $0x40] sm:$0xff]   ;;  %v5665_v26 = vpack.c.bf16 %v5643_v52, %v5643_v52  ;;  %v6983_v28 = vld [vmem:[%s8752_s7 + $0x68] sm:$0xff]  }
 0x57a   : > { %v5634_v34 = vsel %vm5068_vm10, %v5630_v24, -1e+30  ;;  %v5334_v38 = vsel %vm954_vm5, %v5331_v31, %v5333_v41  ;;  %6839 = vmatprep.subr.bf16.mxu0 %v8798_v23  ;;  %4376 = vxpose.xlu0.b32.cont [14/16] (narrow) %v8846_v49, 8  ;;  %v8849_v54 = vld [vmem:[#allocation40_spill] sm:$0xff]  ;;  %v5491_v2 = vpack.c.bf16 %v5487_v20, %v5487_v20  ;;  %v5664_v36 = vmax.f32 %v5662_v3, %v5663_v32  ;;  %v8851_v41 = vld [vmem:[#allocation42_spill] sm:$0xff] }
 0x57b   : > { %v5470_v11 = vrot.slane %v5469_v37, 2  ;;  %v5644_v46 = vsel %vm617_vm2, %v5634_v34, -inf  ;;  %v5335_v13 = vpack.c.b16 %v5334_v38, %v5334_v38  ;;  %v5505_v24 = vunpack.c.l.b16 %v5488_v27 }
 0x57c   : > { %v5645_v39 = vrot.slane %v5644_v46, 4  ;;  %4395 = vxpose.xlu1.b32.start [1/16] (narrow) %v8847_v30, 8  ;;  %v5977_v29 = vpop.permute.xlu1 %5976  ;;  %v8581_v25 = vmax.f32 %v5816_v7, %v5817_v4  ;;  %v5831_v58 = vrot.slane %v5830_v57, 2  ;;  %v5668_v45 = vpack.c.bf16 %v5664_v36, %v5664_v36  ;;  %v8855_v36 = vld [vmem:[#allocation47_spill] sm:$0xff] }
 0x57d   : > { %v5471_v35 = vmax.f32 %v5469_v37, %v5470_v11  ;;  %v5985_v53 = vmul.f32 %v8124_v12, %v5977_v29  ;;  %6834 = vmatmul.mubr.msk.bf16.vlgmr.msra.gmra.mxu1 %vm617_vm2, %v5335_v13  ;;  %6840 = vmatpush3.bf16.msra.mxu0 %v6978_v51  ;;  %v6981_v12 = vld [vmem:[%s8752_s7 + $0x70] sm:$0xff]   ;;  %v8850_v37 = vld [vmem:[#allocation17_spill] sm:$0xff]  ;;  %v5993_v51 = vmax.f32 %v5991_v44, %v5992_v19  ;;  %v5508_v13 = vunpack.c.l.b16 %v5491_v2 }
 0x57e   : > { %v5646_v22 = vmax.f32 %v5644_v46, %v5645_v39  ;;  %6850 = vmatpush3.bf16.msra.mxu1 %v6979_v48  ;;  %6841 = vmatprep.subr.bf16.mxu0 %v8798_v23  ;;  %v5682_v48 = vunpack.c.l.b16 %v5665_v26  ;;  %v6984_v46 = vld [vmem:[%s8752_s7 + $0x60] sm:$0xff]   ;;  %v5832_v18 = vmax.f32 %v5830_v57, %v5831_v58  ;;  %v5684_v27 = vunpack.c.l.b16 %v5667_v56 }
 0x57f   : > { %v5472_v17 = vrot.slane %v5471_v35, 1  ;;  %v5989_v59 = vsel %vm5069_vm6, %v5985_v53, -1e+30  ;;  %6851 = vmatprep.subr.bf16.mxu1 %v8798_v23  ;;  %6857 = vmatprep.mubr.msk.bf16.mxu1 %vm7044_vm8, %v8798_v23  ;;  %v8853_v53 = vld [vmem:[#allocation45_spill] sm:$0xff]  ;;  %v5819_v4 = vrot.slane %v8581_v25, 1 }
 0x580   : > { %v5647_v0 = vrot.slane %v5646_v22, 2  ;;  %v6005_v40 = vsel %vm617_vm2, %v5989_v59, -inf  ;;  %4396 = vxpose.xlu1.b32.cont [2/16] (narrow) %v8848_v33, 8  ;;  %4377 = vxpose.xlu0.b32.cont [15/16] (narrow) %v8849_v54, 8 }
 0x581   : > { %v5473_v43 = vmax.f32 %v5471_v35, %v5472_v17  ;;  %v5804_v55 = vpop.permute.xlu1 %5803  ;;  %6842 = vmatpush3.bf16.msra.mxu0 %v6980_v14  ;;  %v6006_v10 = vrot.slane %v6005_v40, 4  ;;  %v5994_v14 = vrot.slane %v5993_v51, 2 }
 0x582   : > { %v5648_v62 = vmax.f32 %v5646_v22, %v5647_v0  ;;  %v5809_v5 = vmul.f32 %v8134_v60, %v5804_v55  ;;  %6852 = vmatpush3.bf16.msra.mxu1 %v6981_v12  ;;  %6843 = vmatprep.subr.bf16.mxu0 %v8798_v23  ;;  %v6985_v22 = vld [vmem:[%s8752_s7 + $0x98] sm:$0xff]   ;;  %v5685_v0 = vunpack.c.l.b16 %v5668_v45  ;;  %v8857_v45 = vld [vmem:[#allocation21_spill] sm:$0xff] }
 0x583   : > { %v5489_v31 = vpack.c.bf16 %v5473_v43, %v5473_v43  ;;  %6853 = vmatprep.subr.bf16.mxu1 %v8798_v23  ;;  %v6007_v39 = vmax.f32 %v6005_v40, %v6006_v10  ;;  %v8854_v43 = vld [vmem:[#allocation22_spill] sm:$0xff]  ;;  %v5995_v55 = vmax.f32 %v5993_v51, %v5994_v14 }
 0x584   : > { %v5649_v47 = vrot.slane %v5648_v62, 1  ;;  %v5813_v15 = vsel %vm5070_vm9, %v5809_v5, -1e+30  ;;  %4397 = vxpose.xlu1.b32.cont [3/16] (narrow) %v8850_v37, 8  ;;  %4378 = vxpose.xlu0.b32.end [16/16] (narrow) %v8851_v41, 8  ;;  %v8856_v41 = vld [vmem:[#allocation24_spill] sm:$0xff] }
 0x585   : > { %v5506_v34 = vunpack.c.l.b16 %v5489_v31  ;;  %v5835_v3 = vsel %vm617_vm2, %v5813_v15, -inf  ;;  %v5796_v38 = vpop.permute.xlu1 %5795  ;;  %6844 = vmatpush3.bf16.msra.mxu0 %v6982_v8  ;;  %v6008_v54 = vrot.slane %v6007_v39, 2  ;;  %v5833_v8 = vrot.slane %v5832_v18, 1  ;;  %v6991_v14 = vld [vmem:[%s8752_s7 + $0xa8] sm:$0xff]  }
 0x586   : > { %v5650_v49 = vmax.f32 %v5648_v62, %v5649_v47  ;;  %v5836_v1 = vrot.slane %v5835_v3, 4  ;;  %v5807_v11 = vmul.f32 %v8832_v50, %v5796_v38  ;;  %6854 = vmatpush3.bf16.msra.mxu1 %v6983_v28  ;;  %6861 = vmatprep.subr.bf16.mxu0 %v8798_v23  ;;  %v5820_v47 = vmax.f32 %v8581_v25, %v5819_v4 }
 0x587   : > { %v5509_v7 = vsel %vm950_vm3, %v5506_v34, %v5505_v24  ;;  %6855 = vmatprep.subr.bf16.mxu1 %v8798_v23  ;;  %v6009_v15 = vmax.f32 %v6007_v39, %v6008_v54  ;;  %v5996_v51 = vrot.slane %v5995_v55, 1  ;;  %v5834_v58 = vmax.f32 %v5832_v18, %v5833_v8 }
 0x588   : > { %v5666_v30 = vpack.c.bf16 %v5650_v49, %v5650_v49  ;;  %v5837_v29 = vmax.f32 %v5835_v3, %v5836_v1  ;;  %v5811_v61 = vsel %vm5068_vm10, %v5807_v11, -1e+30  ;;  %4398 = vxpose.xlu1.b32.cont [4/16] (narrow) %v8852_v9, 8  ;;  %v5510_v35 = vsel %vm952_vm4, %v5507_v6, %v5509_v7  ;;  %4427 = vxpose.xlu0.b32.start [1/16] (narrow) %v8853_v53, 8  ;;  %v6989_v49 = vld [vmem:[%s8752_s7 + $0xb0] sm:$0xff]   ;;  %v8858_v7 = vld [vmem:[#allocation44_spill] sm:$0xff] }
 0x589   : > { %v5821_v52 = vsel %vm617_vm2, %v5811_v61, -inf  ;;  %v5511_v44 = vsel %vm954_vm5, %v5508_v13, %v5510_v35  ;;  %v5842_v11 = vpack.c.bf16 %v5820_v47, %v5820_v47  ;;  %v5997_v39 = vmax.f32 %v5995_v55, %v5996_v51  ;;  %v6990_v9 = vld [vmem:[%s8752_s7 + $0x80] sm:$0xff]   ;;  %v8861_v55 = vld [vmem:[#allocation26_spill] sm:$0xff] }
 0x58a   : > { %v5683_v12 = vunpack.c.l.b16 %v5666_v30  ;;  %v5838_v20 = vrot.slane %v5837_v29, 2  ;;  %v5822_v32 = vrot.slane %v5821_v52, 4  ;;  %v5973_v17 = vpop.permute.xlu1 %5972  ;;  %v5512_v59 = vpack.c.b16 %v5511_v44, %v5511_v44  ;;  %6856 = vmatpush3.bf16.msra.mxu1 %v6984_v46  ;;  %v8869_v51 = vld [vmem:[#allocation30_spill] sm:$0xff] }
 0x58b   : > { %v5984_v40 = vmul.f32 %v8832_v50, %v5973_v17  ;;  %6873 = vmatprep.subr.bf16.mxu1 %v8798_v23  ;;  %v6986_v50 = vld [vmem:[%s8752_s7 + $0x90] sm:$0xff]   ;;  %v6010_v46 = vrot.slane %v6009_v15, 1  ;;  %v5844_v30 = vpack.c.bf16 %v5834_v58, %v5834_v58  ;;  %v5859_v44 = vunpack.c.l.b16 %v5842_v11  ;;  %v8870_v58 = vld [vmem:[#allocation53_spill] sm:$0xff]  ;;  %v8880_v11 = vld [vmem:[#allocation58_spill] sm:$0xff] }
 0x58c   : > { %v5686_v33 = vsel %vm950_vm3, %v5683_v12, %v5682_v48  ;;  %v5839_v19 = vmax.f32 %v5837_v29, %v5838_v20  ;;  %v5823_v57 = vmax.f32 %v5821_v52, %v5822_v32  ;;  %4399 = vxpose.xlu1.b32.cont [5/16] (narrow) %v8854_v43, 8  ;;  %6846 = vmatmul.mubr.msk.bf16.vlgmr.msra.gmra.mxu0 %vm617_vm2, %v5512_v59  ;;  %v8859_v20 = vld [vmem:[#allocation23_spill] sm:$0xff]  ;;  %v8860_v32 = vld [vmem:[#allocation46_spill] sm:$0xff] }
 0x58d   : > { %v5988_v56 = vsel %vm5068_vm10, %v5984_v40, -1e+30  ;;  %6862 = vmatpush3.bf16.msra.mxu0 %v6985_v22  ;;  %v5687_v6 = vsel %vm952_vm4, %v5684_v27, %v5686_v33  ;;  %6869 = vmatprep.mubr.msk.bf16.mxu0 %vm7044_vm8, %v8798_v23  ;;  %v6011_v22 = vmax.f32 %v6009_v15, %v6010_v46  ;;  %v6019_v17 = vpack.c.bf16 %v5997_v39, %v5997_v39  ;;  %v6992_v33 = vld [vmem:[%s8752_s7 + $0xa0] sm:$0xff]   ;;  %v8866_v15 = vld [vmem:[#allocation48_spill] sm:$0xff]  ;;  %v4283_v46 = vpop.trf.xlu0 }
 0x58e   : > { %v5840_v26 = vrot.slane %v5839_v19, 1  ;;  %v5824_v62 = vrot.slane %v5823_v57, 2  ;;  %v5998_v5 = vsel %vm617_vm2, %v5988_v56, -inf  ;;  %v5981_v28 = vpop.permute.xlu1 %5980  ;;  %v5688_v2 = vsel %vm954_vm5, %v5685_v0, %v5687_v6  ;;  %6863 = vmatprep.subr.bf16.mxu0 %v8798_v23  ;;  %4428 = vxpose.xlu0.b32.cont [2/16] (narrow) %v8855_v36, 8  ;;  %v8862_v56 = vld [vmem:[#allocation49_spill] sm:$0xff] }
 0x58f   : > { %v5999_v31 = vrot.slane %v5998_v5, 4  ;;  %v5986_v10 = vmul.f32 %v8134_v60, %v5981_v28  ;;  %v5689_v24 = vpack.c.b16 %v5688_v2, %v5688_v2  ;;  %v6988_v60 = vld [vmem:[%s8752_s7 + $0x88] sm:$0xff]   ;;  %v5861_v59 = vunpack.c.l.b16 %v5844_v30 }
 0x590   : > { %v5825_v37 = vmax.f32 %v5823_v57, %v5824_v62  ;;  %4400 = vxpose.xlu1.b32.cont [6/16] (narrow) %v8856_v41, 8  ;;  %v5841_v38 = vmax.f32 %v5839_v19, %v5840_v26  ;;  %v6021_v43 = vpack.c.bf16 %v6011_v22, %v6011_v22  ;;  %v6036_v6 = vunpack.c.l.b16 %v6019_v17  ;;  %v8868_v41 = vld [vmem:[#allocation50_spill] sm:$0xff] }
 0x591   : > { %v6000_v34 = vmax.f32 %v5998_v5, %v5999_v31  ;;  %v5990_v3 = vsel %vm5070_vm9, %v5986_v10, -1e+30  ;;  %6858 = vmatmul.mubr.msk.bf16.vlgmr.msra.gmra.mxu1 %vm617_vm2, %v5689_v24  ;;  %6864 = vmatpush3.bf16.msra.mxu0 %v6986_v50  ;;  %v8865_v24 = vld [vmem:[#allocation25_spill] sm:$0xff] }
 0x592   : > { %v5826_v48 = vrot.slane %v5825_v37, 1  ;;  %v6012_v25 = vsel %vm617_vm2, %v5990_v3, -inf  ;;  %6865 = vmatprep.subr.bf16.mxu0 %v8798_v23  ;;  %6874 = vmatpush3.bf16.msra.mxu1 %v6987_v63  ;;  %v5845_v35 = vpack.c.bf16 %v5841_v38, %v5841_v38  ;;  %v6038_v2 = vunpack.c.l.b16 %v6021_v43  ;;  %v8863_v63 = vld [vmem:[#allocation28_spill] sm:$0xff]  ;;  %v8872_v3 = vld [vmem:[#allocation55_spill] sm:$0xff] }
 0x593   : > { %v6001_v42 = vrot.slane %v6000_v34, 2  ;;  %v6013_v1 = vrot.slane %v6012_v25, 4  ;;  %6875 = vmatprep.subr.bf16.mxu1 %v8798_v23  ;;  %6881 = vmatprep.mubr.msk.bf16.mxu1 %vm7044_vm8, %v8798_v23  ;;  %v8874_v38 = vld [vmem:[#allocation52_spill] sm:$0xff] }
 0x594   : > { %v5827_v13 = vmax.f32 %v5825_v37, %v5826_v48  ;;  %4401 = vxpose.xlu1.b32.cont [7/16] (narrow) %v8857_v45, 8  ;;  %4429 = vxpose.xlu0.b32.cont [3/16] (narrow) %v8858_v7, 8  ;;  %v5862_v0 = vunpack.c.l.b16 %v5845_v35  ;;  %v8867_v37 = vld [vmem:[#allocation27_spill] sm:$0xff] }
 0x595   : > { %v6002_v29 = vmax.f32 %v6000_v34, %v6001_v42  ;;  %v6014_v61 = vmax.f32 %v6012_v25, %v6013_v1  ;;  %6866 = vmatpush3.bf16.msra.mxu0 %v6988_v60  ;;  %v8871_v34 = vld [vmem:[#allocation32_spill] sm:$0xff]  ;;  %v8873_v60 = vld [vmem:[#allocation29_spill] sm:$0xff]  ;;  %v8875_v48 = vld [vmem:[#allocation31_spill] sm:$0xff] }
 0x596   : > { %v5843_v53 = vpack.c.bf16 %v5827_v13, %v5827_v13  ;;  %6867 = vmatprep.subr.bf16.mxu0 %v8798_v23  ;;  %6876 = vmatpush3.bf16.msra.mxu1 %v6989_v49  ;;  %v8876_v25 = vld [vmem:[#allocation54_spill] sm:$0xff]  ;;  %v8877_v49 = vld [vmem:[#allocation57_spill] sm:$0xff]  ;;  %v8878_v42 = vld [vmem:[#allocation59_spill] sm:$0xff]  ;;  %v4315_v13 = vpop.trf.xlu0 }
 0x597   : > { %v6003_v18 = vrot.slane %v6002_v29, 1  ;;  %v6015_v52 = vrot.slane %v6014_v61, 2  ;;  %6877 = vmatprep.subr.bf16.mxu1 %v8798_v23  ;;  %v8879_v1 = vld [vmem:[#allocation56_spill] sm:$0xff] }
 0x598   : > { %v5860_v12 = vunpack.c.l.b16 %v5843_v53  ;;  %4402 = vxpose.xlu1.b32.cont [8/16] (narrow) %v8859_v20, 8  ;;  %4430 = vxpose.xlu0.b32.cont [4/16] (narrow) %v8860_v32, 8 }
 0x599   : > { %v6004_v27 = vmax.f32 %v6002_v29, %v6003_v18  ;;  %v6016_v4 = vmax.f32 %v6014_v61, %v6015_v52  ;;  %6868 = vmatpush3.bf16.msra.mxu0 %v6990_v9  ;;  %v8881_v29 = vld [vmem:[#allocation5_spill] sm:$0xff] }
 0x59a   : > { %v5863_v40 = vsel %vm950_vm3, %v5860_v12, %v5859_v44  ;;  %6878 = vmatpush3.bf16.msra.mxu1 %v6991_v14  ;;  %v8882_v44 = vld [vmem:[#allocation6_spill] sm:$0xff] }
 0x59b   : > { %v6020_v54 = vpack.c.bf16 %v6004_v27, %v6004_v27  ;;  %v6017_v19 = vrot.slane %v6016_v4, 1  ;;  %v5864_v57 = vsel %vm952_vm4, %v5861_v59, %v5863_v40  ;;  %6879 = vmatprep.subr.bf16.mxu1 %v8798_v23  ;;  %v8864_v23 = vld [vmem:[#allocation51_spill] sm:$0xff] }
 0x59c   : > { %4403 = vxpose.xlu1.b32.cont [9/16] (narrow) %v8861_v55, 8  ;;  %v5865_v8 = vsel %vm954_vm5, %v5862_v0, %v5864_v57  ;;  %4431 = vxpose.xlu0.b32.cont [5/16] (narrow) %v8862_v56, 8 }
 0x59d   : > { %v6037_v50 = vunpack.c.l.b16 %v6020_v54  ;;  %v6018_v26 = vmax.f32 %v6016_v4, %v6017_v19  ;;  %v5866_v62 = vpack.c.b16 %v5865_v8, %v5865_v8 }
 0x59e   : > { %6880 = vmatpush3.bf16.msra.mxu1 %v6992_v33 }
 0x59f   : > { %v6040_v5 = vsel %vm950_vm3, %v6037_v50, %v6036_v6  ;;  %v6022_v28 = vpack.c.bf16 %v6018_v26, %v6018_v26  ;;  %6870 = vmatmul.mubr.msk.bf16.vlgmr.msra.gmra.mxu0 %vm617_vm2, %v5866_v62 }
 0x5a0   : > { %4404 = vxpose.xlu1.b32.cont [10/16] (narrow) %v8863_v63, 8  ;;  %4432 = vxpose.xlu0.b32.cont [6/16] (narrow) %v8864_v23, 8  ;;  %v6041_v31 = vsel %vm952_vm4, %v6038_v2, %v6040_v5 }
 0x5a1   : > { %v6039_v36 = vunpack.c.l.b16 %v6022_v28 }
 0x5a3   : > { %v6042_v10 = vsel %vm954_vm5, %v6039_v36, %v6041_v31 }
 0x5a4   : > { %4405 = vxpose.xlu1.b32.cont [11/16] (narrow) %v8865_v24, 8  ;;  %v6043_v47 = vpack.c.b16 %v6042_v10, %v6042_v10  ;;  %4433 = vxpose.xlu0.b32.cont [7/16] (narrow) %v8866_v15, 8 }
 0x5a6   : > { %6882 = vmatmul.mubr.msk.bf16.vlgmr.msra.gmra.mxu1 %vm617_vm2, %v6043_v47 }
 0x5a8   : > { %4406 = vxpose.xlu1.b32.cont [12/16] (narrow) %v8867_v37, 8  ;;  %4434 = vxpose.xlu0.b32.cont [8/16] (narrow) %v8868_v41, 8 }
 0x5ac   : > { %4407 = vxpose.xlu1.b32.cont [13/16] (narrow) %v8869_v51, 8  ;;  %4435 = vxpose.xlu0.b32.cont [9/16] (narrow) %v8870_v58, 8 }
 0x5b0   : > { %4408 = vxpose.xlu1.b32.cont [14/16] (narrow) %v8871_v34, 8  ;;  %4436 = vxpose.xlu0.b32.cont [10/16] (narrow) %v8872_v3, 8 }
 0x5b4   : > { %4409 = vxpose.xlu1.b32.cont [15/16] (narrow) %v8873_v60, 8  ;;  %4437 = vxpose.xlu0.b32.cont [11/16] (narrow) %v8874_v38, 8 }
 0x5b8   : > { %4410 = vxpose.xlu1.b32.end [16/16] (narrow) %v8875_v48, 8  ;;  %4438 = vxpose.xlu0.b32.cont [12/16] (narrow) %v8876_v25, 8  ;;  %v4347_v7 = vpop.trf.xlu1 }
 0x5b9   : > { %v4459_v30 = vcombine.low %v4283_v46, %v4347_v7 }
 0x5bb   : > { %v4466_v9 = vrot.slane %v4459_v30, %v8881_v29 }
 0x5bc   : > { %4439 = vxpose.xlu0.b32.cont [13/16] (narrow) %v8877_v49, 8 }
 0x5c0   : > { %4440 = vxpose.xlu0.b32.cont [14/16] (narrow) %v8878_v42, 8 }
 0x5c4   : > { %4441 = vxpose.xlu0.b32.cont [15/16] (narrow) %v8879_v1, 8  ;;  %v4379_v45 = vpop.trf.xlu0 }
 0x5c5   : > { %v4467_v39 = vcombine.low %v4315_v13, %v4379_v45 }
 0x5c7   : > { %v4474_v61 = vrot.slane %v4467_v39, %v8881_v29 }
 0x5c8   : > { %4442 = vxpose.xlu0.b32.end [16/16] (narrow) %v8880_v11, 8 }
 0x5c9   : > { %v4489_v53 = vcombine.low %v4466_v9, %v4474_v61  ;;  %v4490_v14 = vcombine.high %v4466_v9, %v4474_v61 }
 0x5cb   : > { %v4497_v22 = vrot.slane %v4489_v53, %v8882_v44  ;;  %v4504_v12 = vrot.slane %v4490_v14, %v8882_v44 }
 0x5f1   : > { %6930 = vset.pattern.permute.xlu0 %v7051_v21 }
 0x5f8   : > { %v4411_v35 = vpop.trf.xlu1 }
 0x5f9   : > { %v4481_v18 = vrot.slane %v4411_v35, %v8881_v29 }
 0x608   : > { %v4443_v21 = vpop.trf.xlu0 }
 0x609   : > { %v4488_v52 = vrot.slane %v4443_v21, %v8881_v29 }
 0x60b   : > { %v4505_v20 = vcombine.low %v4481_v18, %v4488_v52  ;;  %v4506_v32 = vcombine.high %v4481_v18, %v4488_v52 }
 0x60d   : > { %v4513_v17 = vrot.slane %v4505_v20, %v8882_v44  ;;  %v4520_v59 = vrot.slane %v4506_v32, %v8882_v44 }
 0x60f   : > { %v4521_v27 = vcombine.low %v4497_v22, %v4513_v17  ;;  %v4522_v4 = vcombine.high %v4497_v22, %v4513_v17  ;;  %v4523_v0 = vcombine.low %v4504_v12, %v4520_v59  ;;  %v4524_v40 = vcombine.high %v4504_v12, %v4520_v59 }
 0x611   : > { %4525 = vst [vmem:[%s8105_s0] sm:$0x3f] %v4521_v27  ;;  %4526 = vst [vmem:[%s8105_s0 + $0x8] sm:$0x3f] %v4522_v4 }
 0x612   : > { %4527 = vst [vmem:[%s8105_s0 + $0x10] sm:$0x3f] %v4523_v0  ;;  %4528 = vst [vmem:[%s8105_s0 + $0x18] sm:$0x3f] %v4524_v40 }
 0x638   : > { %v5220_v33 = vpop.f32.mrf.mxu0 }
 0x639   : > { %v5233_v54 = vrot.slane %v5220_v33, %v8094_v16 }
 0x63a   : > { %v6823_v19 = vpop.f32.mrf.mxu0 }
 0x63b   : > { %v5234_v57 = vcombine.high %v5233_v54, %v5233_v54  ;;  %v5241_v43 = vrot.slane %v5233_v54, %v8094_v16  ;;  %6384 = vst.sshfl [vmem:[%s8281_s30 + $0x9] sm:$0x1 pattern:$0x73625140] %v5233_v54 }
 0x63c   : > { %v5223_v55 = vpop.f32.mrf.mxu0 }
 0x63d   : > { %v5248_v8 = vrot.slane %v5234_v57, %v8094_v16  ;;  %v5249_v56 = vcombine.high %v5241_v43, %v5241_v43  ;;  %6385 = vst.sshfl [vmem:[%s8281_s30 + $0x19] sm:$0x1 pattern:$0x73625140] %v5234_v57  ;;  %v5397_v6 = vpop.f32.mrf.mxu1 }
 0x63e   : > { %v5410_v50 = vrot.slane %v5397_v6, %v8094_v16  ;;  %v6824_v26 = vpop.f32.mrf.mxu0 }
 0x63f   : > { %v5250_v62 = vcombine.high %v5248_v8, %v5248_v8  ;;  %5257 = vst [vmem:[%s8281_s30 + $0x29] sm:$0x1] %v5249_v56  ;;  %v6835_v5 = vpop.f32.mrf.mxu1 }
 0x640   : > { %v5411_v28 = vcombine.high %v5410_v50, %v5410_v50  ;;  %v5418_v2 = vrot.slane %v5410_v50, %v8094_v16  ;;  %6399 = vst.sshfl [vmem:[%s8281_s30 + $0xa] sm:$0x1 pattern:$0x73625140] %v5410_v50 }
 0x641   : > { %5258 = vst [vmem:[%s8281_s30 + $0x39] sm:$0x1] %v5250_v62  ;;  %v5400_v63 = vpop.f32.mrf.mxu1 }
 0x642   : > { %v5425_v23 = vrot.slane %v5411_v28, %v8094_v16  ;;  %v5426_v36 = vcombine.high %v5418_v2, %v5418_v2  ;;  %6400 = vst.sshfl [vmem:[%s8281_s30 + $0x1a] sm:$0x1 pattern:$0x73625140] %v5411_v28 }
 0x643   : > { %v6836_v31 = vpop.f32.mrf.mxu1 }
 0x644   : > { %v5427_v10 = vcombine.high %v5425_v23, %v5425_v23  ;;  %5434 = vst [vmem:[%s8281_s30 + $0x2a] sm:$0x1] %v5426_v36 }
 0x646   : > { %5435 = vst [vmem:[%s8281_s30 + $0x3a] sm:$0x1] %v5427_v10 }
 0x64c   : > { %v5574_v24 = vpop.f32.mrf.mxu0 }
 0x64d   : > { %v5587_v47 = vrot.slane %v5574_v24, %v8094_v16 }
 0x64e   : > { %v6847_v15 = vpop.f32.mrf.mxu0 }
 0x64f   : > { %v5588_v37 = vcombine.high %v5587_v47, %v5587_v47  ;;  %v5595_v41 = vrot.slane %v5587_v47, %v8094_v16  ;;  %6414 = vst.sshfl [vmem:[%s8281_s30 + $0xb] sm:$0x1 pattern:$0x73625140] %v5587_v47 }
 0x650   : > { %v5577_v51 = vpop.f32.mrf.mxu0 }
 0x651   : > { %v5602_v58 = vrot.slane %v5588_v37, %v8094_v16  ;;  %v5603_v34 = vcombine.high %v5595_v41, %v5595_v41  ;;  %6415 = vst.sshfl [vmem:[%s8281_s30 + $0x1b] sm:$0x1 pattern:$0x73625140] %v5588_v37  ;;  %v5751_v3 = vpop.f32.mrf.mxu1 }
 0x652   : > { %v5764_v60 = vrot.slane %v5751_v3, %v8094_v16  ;;  %v6848_v38 = vpop.f32.mrf.mxu0 }
 0x653   : > { %v5604_v48 = vcombine.high %v5602_v58, %v5602_v58  ;;  %5611 = vst [vmem:[%s8281_s30 + $0x2b] sm:$0x1] %v5603_v34  ;;  %v6859_v25 = vpop.f32.mrf.mxu1 }
 0x654   : > { %v5765_v49 = vcombine.high %v5764_v60, %v5764_v60  ;;  %v5772_v42 = vrot.slane %v5764_v60, %v8094_v16  ;;  %6429 = vst.sshfl [vmem:[%s8281_s30 + $0xc] sm:$0x1 pattern:$0x73625140] %v5764_v60 }
 0x655   : > { %5612 = vst [vmem:[%s8281_s30 + $0x3b] sm:$0x1] %v5604_v48  ;;  %v5754_v1 = vpop.f32.mrf.mxu1 }
 0x656   : > { %v5779_v11 = vrot.slane %v5765_v49, %v8094_v16  ;;  %v5780_v46 = vcombine.high %v5772_v42, %v5772_v42  ;;  %6430 = vst.sshfl [vmem:[%s8281_s30 + $0x1c] sm:$0x1 pattern:$0x73625140] %v5765_v49 }
 0x657   : > { %v6860_v13 = vpop.f32.mrf.mxu1 }
 0x658   : > { %v5781_v45 = vcombine.high %v5779_v11, %v5779_v11  ;;  %5788 = vst [vmem:[%s8281_s30 + $0x2c] sm:$0x1] %v5780_v46 }
 0x65a   : > { %5789 = vst [vmem:[%s8281_s30 + $0x3c] sm:$0x1] %v5781_v45 }
 0x65f   : > { %v5928_v7 = vpop.f32.mrf.mxu0 }
 0x660   : > { %v5941_v39 = vrot.slane %v5928_v7, %v8094_v16 }
 0x661   : > { %v6871_v30 = vpop.f32.mrf.mxu0 }
 0x662   : > { %v5942_v29 = vcombine.high %v5941_v39, %v5941_v39  ;;  %v5949_v61 = vrot.slane %v5941_v39, %v8094_v16  ;;  %6444 = vst.sshfl [vmem:[%s8281_s30 + $0xd] sm:$0x1 pattern:$0x73625140] %v5941_v39 }
 0x663   : > { %v5931_v9 = vpop.f32.mrf.mxu0 }
 0x664   : > { %v5956_v35 = vrot.slane %v5942_v29, %v8094_v16  ;;  %v5957_v53 = vcombine.high %v5949_v61, %v5949_v61  ;;  %6445 = vst.sshfl [vmem:[%s8281_s30 + $0x1d] sm:$0x1 pattern:$0x73625140] %v5942_v29 }
 0x665   : > { %v6872_v14 = vpop.f32.mrf.mxu0 }
 0x666   : > { %v5958_v18 = vcombine.high %v5956_v35, %v5956_v35  ;;  %5965 = vst [vmem:[%s8281_s30 + $0x2d] sm:$0x1] %v5957_v53  ;;  %v6105_v21 = vpop.f32.mrf.mxu1 }
 0x667   : > { %v6118_v52 = vrot.slane %v6105_v21, %v8094_v16 }
 0x668   : > { %5966 = vst [vmem:[%s8281_s30 + $0x3d] sm:$0x1] %v5958_v18  ;;  %v6883_v44 = vpop.f32.mrf.mxu1 }
 0x669   : > { %v6119_v22 = vcombine.high %v6118_v52, %v6118_v52  ;;  %v6126_v12 = vrot.slane %v6118_v52, %v8094_v16  ;;  %6459 = vst.sshfl [vmem:[%s8281_s30 + $0xe] sm:$0x1 pattern:$0x73625140] %v6118_v52 }
 0x66a   : > { %v6108_v20 = vpop.f32.mrf.mxu1 }
 0x66b   : > { %v6133_v32 = vrot.slane %v6119_v22, %v8094_v16  ;;  %v6134_v17 = vcombine.high %v6126_v12, %v6126_v12  ;;  %6460 = vst.sshfl [vmem:[%s8281_s30 + $0x1e] sm:$0x1 pattern:$0x73625140] %v6119_v22 }
 0x66c   : > { %v6884_v59 = vpop.f32.mrf.mxu1 }
 0x66d   : > { %v6135_v27 = vcombine.high %v6133_v32, %v6133_v32  ;;  %6142 = vst [vmem:[%s8281_s30 + $0x2e] sm:$0x1] %v6134_v17 }
 0x66f   : > { %6143 = vst [vmem:[%s8281_s30 + $0x3e] sm:$0x1] %v6135_v27 }
 0x670 PF: > { %s27_s18 = sadd.s32 1, %s7037_s18  }
 0x671   : > { %p24_p9 = scmp.ge.s32.totalorder %s27_s18, 4  }
 0x673   :  { %26 = sbr.rel (!%p24_p9) target bundleno = 16 (0x10), region = 102 }

</bundles_post_ra>
